<compile_context>
chip_gen: v7x
topology: tpu7x:2x2x1
jax: 0.10.0
libtpu: 0.0.40
codegen_flags: <defaults>
</compile_context>

<pallas_src>
import functools

import jax
import jax.numpy as jnp
from jax.experimental import pallas as pl
from jax.experimental.pallas import tpu as pltpu

EPS = 1e-5
EXPANSION = 4
LANE = 128


def _default_vmem_limit():
    # v5e/v6e: 128 MiB VMEM per TensorCore, v7x: 64 MiB.  Leave headroom.
    try:
        cap = pltpu.get_tpu_info().vmem_capacity_bytes
        return int(min(cap * 3 // 4, 100 * 1024 * 1024))
    except Exception:  # no TPU visible at import (e.g. interpret/CPU harness)
        return 48 * 1024 * 1024


_VMEM_LIMIT = _default_vmem_limit()


# ---------------------------------------------------------------------------
# Small static helpers (wrapper-side)
# ---------------------------------------------------------------------------
def _rup(n, m=LANE):
    return ((n + m - 1) // m) * m


def _pad_vec(v, n_pad, fill):
    return jnp.pad(v.astype(jnp.float32), (0, n_pad - v.shape[0]),
                   constant_values=fill)


def _prep_w_1x1(w_oihw, k_pad, n_pad):
    w = jnp.transpose(w_oihw[:, :, 0, 0])          # (in, out)
    kk, nn = w.shape
    w = jnp.pad(w, ((0, k_pad - kk), (0, n_pad - nn)))
    return w.astype(jnp.bfloat16)


def _prep_w_3x3(w_oihw, c_pad):
    # TODO(synk): grouped 3x3 conv (groups > 1) not implemented; groups=1 only.
    taps = [jnp.transpose(w_oihw[:, :, dy, dx])    # (in, out) per tap
            for dy in range(3) for dx in range(3)]
    w = jnp.stack(taps, axis=0)                    # (9, in, out)
    _, kk, nn = w.shape
    w = jnp.pad(w, ((0, 0), (0, c_pad - kk), (0, c_pad - nn)))
    return w.astype(jnp.bfloat16)


def _finalize_bn(mom, count, gamma, beta):
    """Partial (sum, sumsq) moments -> per-channel BN scale/shift, f32."""
    s = jnp.sum(mom[:, 0, :], axis=0)
    ss = jnp.sum(mom[:, 1, :], axis=0)
    mean = s / count
    var = jnp.maximum(ss / count - mean * mean, 0.0)   # biased var, clamped
    scale = gamma * jax.lax.rsqrt(var + EPS)
    shift = beta - mean * scale
    return scale, shift


# ---------------------------------------------------------------------------
# Kernel 1: 1x1 conv (matmul) [+ fused input BN+ReLU] + partial BN moments.
# grid = (cdiv(M, tm),); weight block has a constant index_map -> fetched once
# and kept VMEM-resident; one MXU dot per M tile, no scratch accumulator.
# ---------------------------------------------------------------------------
def _mm_bn_stats_kernel(*refs, fuse, rows_valid, tm):
    if fuse:
        x_ref, sc_ref, sh_ref, w_ref, y_ref, mom_ref = refs
    else:
        x_ref, w_ref, y_ref, mom_ref = refs

    x = x_ref[...]
    if fuse:
        # Previous stage's BatchNorm + ReLU applied to the input tile in f32.
        x = jnp.maximum(x.astype(jnp.float32) * sc_ref[...] + sh_ref[...], 0.0)
    if rows_valid is not None:
        # cdiv remainder tile: zero rows past the true M so the BN moments and
        # the (masked) boundary store stay exact.
        row = (pl.program_id(0) * tm
               + jax.lax.broadcasted_iota(jnp.int32, x.shape, 0))
        x = jnp.where(row < rows_valid, x, 0)

    acc = jnp.dot(x.astype(jnp.bfloat16), w_ref[...],
                  preferred_element_type=jnp.float32)
    y_ref[...] = acc.astype(y_ref.dtype)
    # Single stacked (2, N) store of the per-tile BN moments.
    mom_ref[0] = jnp.concatenate(
        [jnp.sum(acc, axis=0, keepdims=True),
         jnp.sum(acc * acc, axis=0, keepdims=True)], axis=0)


def conv1x1_stats(x, w, in_scale=None, in_shift=None, *, tm_target=512):
    """y = [relu(in_scale*x + in_shift)] @ w  (bf16 out) + per-tile moments.

    tm capped at 512 so the widest padded ResNet stages (N=2048) stay well
    inside v7x's 64 MiB VMEM; on v5e/v6e _VMEM_LIMIT is raised and larger
    tiles would also fit (K axis re-introduced only for K >> 2048)."""
    M, K = x.shape
    Kw, N = w.shape
    assert K == Kw and K % LANE == 0 and N % LANE == 0
    tm = min(tm_target, M)
    n_mt = pl.cdiv(M, tm)
    rows_valid = None if M % tm == 0 else M
    fuse = in_scale is not None

    in_specs = [pl.BlockSpec((tm, K), lambda i: (i, 0))]
    args = [x]
    if fuse:
        in_specs += [pl.BlockSpec((1, K), lambda i: (0, 0)),
                     pl.BlockSpec((1, K), lambda i: (0, 0))]
        args += [in_scale.reshape(1, K).astype(jnp.float32),
                 in_shift.reshape(1, K).astype(jnp.float32)]
    in_specs += [pl.BlockSpec((K, N), lambda i: (0, 0))]   # resident weight
    args += [w]

    y, mom = pl.pallas_call(
        functools.partial(_mm_bn_stats_kernel, fuse=fuse,
                          rows_valid=rows_valid, tm=tm),
        out_shape=(jax.ShapeDtypeStruct((M, N), jnp.bfloat16),
                   jax.ShapeDtypeStruct((n_mt, 2, N), jnp.float32)),
        grid=(n_mt,),
        in_specs=in_specs,
        out_specs=(pl.BlockSpec((tm, N), lambda i: (i, 0)),
                   pl.BlockSpec((1, 2, N), lambda i: (i, 0, 0))),
        compiler_params=pltpu.CompilerParams(
            dimension_semantics=("parallel",),
            vmem_limit_bytes=_VMEM_LIMIT),
    )(*args)
    return y, mom


# ---------------------------------------------------------------------------
# Kernel 2: 3x3 conv (stride s) on the flattened stride-parity planes.
# Per image: <=2 sublane shifts (one per distinct column-tap offset), then 9
# aligned row-range slices -> MXU matmuls accumulated in f32.  grid = (B,).
# ---------------------------------------------------------------------------
def _conv3x3_stats_kernel(xf_ref, w_ref, y_ref, mom_ref, *,
                          stride, Ho, Wo, Wi_pad):
    s = stride
    Hi = Ho + (2 // s)
    cout = w_ref.shape[-1]
    x = xf_ref[...]                                    # (s*s, Lp, Cin) bf16

    # One sublane shift per distinct column offset ox, shared by all taps.
    xs = [x[:, ox:ox + Hi * Wi_pad, :] for ox in range((2 // s) + 1)]

    acc = jnp.zeros((Ho * Wi_pad, cout), jnp.float32)
    for dy in range(3):                                # 9 taps, static unroll
        for dx in range(3):
            p = (dy % s) * s + (dx % s)                # parity plane
            oy, ox = dy // s, dx // s
            lhs = xs[ox][p, oy * Wi_pad:(oy + Ho) * Wi_pad, :]  # aligned slice
            acc = acc + jnp.dot(lhs, w_ref[dy * 3 + dx],
                                preferred_element_type=jnp.float32)
            # TODO(synk): fuse taps pairwise along K (concat two shifted views
            # + stacked weights) to fill the 256-deep MXU on v6e/v7x.

    y = acc.reshape(Ho, Wi_pad, cout)[:, :Wo, :]       # drop garbage columns
    y_ref[...] = y.reshape(1, Ho, Wo, cout).astype(y_ref.dtype)
    mom_ref[0] = jnp.concatenate(
        [jnp.sum(y, axis=(0, 1))[None, :],
         jnp.sum(y * y, axis=(0, 1))[None, :]], axis=0)


def conv3x3_stats(hflat, w_taps, *, stride, Ho, Wo, Wi_pad):
    BS2, Lp, Cin = hflat.shape
    s2 = stride * stride
    B = BS2 // s2
    T, _, Cout = w_taps.shape
    # TODO(synk): give the (constant-index) weight pipeline_mode=pl.Buffered(1)
    # and add a parallel output row-band grid axis so both v7x cores get work
    # for B == 1 / odd B.
    y, mom = pl.pallas_call(
        functools.partial(_conv3x3_stats_kernel, stride=stride,
                          Ho=Ho, Wo=Wo, Wi_pad=Wi_pad),
        out_shape=(jax.ShapeDtypeStruct((B, Ho, Wo, Cout), jnp.bfloat16),
                   jax.ShapeDtypeStruct((B, 2, Cout), jnp.float32)),
        grid=(B,),
        in_specs=[pl.BlockSpec((s2, Lp, Cin), lambda b: (b, 0, 0)),
                  pl.BlockSpec((T, Cin, Cout), lambda b: (0, 0, 0))],
        out_specs=(pl.BlockSpec((1, Ho, Wo, Cout), lambda b: (b, 0, 0, 0)),
                   pl.BlockSpec((1, 2, Cout), lambda b: (b, 0, 0))),
        compiler_params=pltpu.CompilerParams(
            dimension_semantics=("parallel",),
            vmem_limit_bytes=_VMEM_LIMIT),
    )(hflat, w_taps)
    return y, mom


# ---------------------------------------------------------------------------
# Kernel 3: block epilogue — BN3(main) + BN_d(identity) + add + ReLU, tiled.
# ---------------------------------------------------------------------------
def _bn_add_relu_kernel(y_ref, id_ref, scy_ref, shy_ref, sci_ref, shi_ref,
                        o_ref):
    y = y_ref[...].astype(jnp.float32) * scy_ref[...] + shy_ref[...]
    iden = id_ref[...].astype(jnp.float32) * sci_ref[...] + shi_ref[...]
    o_ref[...] = jnp.maximum(y + iden, 0.0).astype(o_ref.dtype)


def bn_add_relu(y, iden, sc_y, sh_y, sc_i, sh_i, *, tm_target=512):
    M, N = y.shape
    tm = min(tm_target, M)
    n_mt = pl.cdiv(M, tm)
    return pl.pallas_call(
        _bn_add_relu_kernel,
        out_shape=jax.ShapeDtypeStruct((M, N), jnp.float32),
        grid=(n_mt,),
        in_specs=[
            pl.BlockSpec((tm, N), lambda i: (i, 0)),
            pl.BlockSpec((tm, N), lambda i: (i, 0)),
            pl.BlockSpec((1, N), lambda i: (0, 0)),
            pl.BlockSpec((1, N), lambda i: (0, 0)),
            pl.BlockSpec((1, N), lambda i: (0, 0)),
            pl.BlockSpec((1, N), lambda i: (0, 0)),
        ],
        out_specs=pl.BlockSpec((tm, N), lambda i: (i, 0)),
        compiler_params=pltpu.CompilerParams(
            dimension_semantics=("parallel",),
            vmem_limit_bytes=_VMEM_LIMIT),
    )(y, iden, sc_y.reshape(1, N), sh_y.reshape(1, N),
      sc_i.reshape(1, N), sh_i.reshape(1, N))


# ---------------------------------------------------------------------------
# Wrapper: full BottleNeckBlock forward (NCHW in, NCHW out)
# ---------------------------------------------------------------------------
@functools.partial(jax.jit, static_argnums=(2,))
def bottleneck_forward_pallas(x_nchw, p, stride):
    assert stride in (1, 2)
    x = jnp.transpose(x_nchw, (0, 2, 3, 1)).astype(jnp.float32)   # NHWC
    B, H, W, Cin = x.shape
    width = p["w1"].shape[0]
    Cout = p["w3"].shape[0]
    s = stride

    Cin_p, Wd, Cout_p = _rup(Cin), _rup(width), _rup(Cout)

    # Channel-pad the input once; padded channels stay exactly zero throughout.
    xp = jnp.pad(x, ((0, 0), (0, 0), (0, 0), (0, Cin_p - Cin)))
    M1 = B * H * W
    x_flat = xp.reshape(M1, Cin_p)

    # ---- conv1 (1x1) : MXU matmul + partial BN1 moments ---------------------
    w1 = _prep_w_1x1(p["w1"], Cin_p, Wd)
    h1_pre, mom1 = conv1x1_stats(x_flat, w1)                  # bf16 (M1, Wd)
    sc1, sh1 = _finalize_bn(mom1, M1, _pad_vec(p["g1"], Wd, 1.0),
                            _pad_vec(p["b1"], Wd, 0.0))

    # ---- BN1+ReLU + zero-pad + stride-parity split + flatten (bf16 pass) ----
    # TODO(synk): conv1 could write h1 directly in this padded/parity layout to
    # remove this remaining bf16 relayout pass entirely.
    Ho = (H - 1) // s + 1
    Wo = (W - 1) // s + 1
    Hi = Ho + (2 // s)
    Wi = Wo + (2 // s)
    Wi_p = _rup(Wi, 8)                      # plane width, sublane aligned
    Lp = Hi * Wi_p + 8                      # extra zero rows for shifted taps
    h1 = jnp.maximum(h1_pre.astype(jnp.float32) * sc1 + sh1, 0.0)
    h1 = h1.astype(jnp.bfloat16).reshape(B, H, W, Wd)
    hp = jnp.pad(h1, ((0, 0), (1, s * Hi - H - 1), (1, s * Wi - W - 1), (0, 0)))
    hps = jnp.transpose(hp.reshape(B, Hi, s, Wi, s, Wd), (0, 2, 4, 1, 3, 5))
    hps = jnp.pad(hps, ((0, 0), (0, 0), (0, 0), (0, 0), (0, Wi_p - Wi), (0, 0)))
    hflat = hps.reshape(B * s * s, Hi * Wi_p, Wd)
    hflat = jnp.pad(hflat, ((0, 0), (0, Lp - Hi * Wi_p), (0, 0)))

    # ---- conv2 (3x3, stride s) : 9 tap matmuls + partial BN2 moments --------
    w2 = _prep_w_3x3(p["w2"], Wd)
    h2_pre, mom2 = conv3x3_stats(hflat, w2, stride=s, Ho=Ho, Wo=Wo, Wi_pad=Wi_p)
    M2 = B * Ho * Wo
    sc2, sh2 = _finalize_bn(mom2, M2, _pad_vec(p["g2"], Wd, 1.0),
                            _pad_vec(p["b2"], Wd, 0.0))

    # ---- conv3 (1x1) with BN2+ReLU fused into its input load ----------------
    w3 = _prep_w_1x1(p["w3"], Wd, Cout_p)
    h3_pre, mom3 = conv1x1_stats(h2_pre.reshape(M2, Wd), w3,
                                 in_scale=sc2, in_shift=sh2)
    sc3, sh3 = _finalize_bn(mom3, M2, _pad_vec(p["g3"], Cout_p, 1.0),
                            _pad_vec(p["b3"], Cout_p, 0.0))

    # ---- identity / downsample path ------------------------------------------
    if "wd" in p:
        # TODO(synk): fold this strided subsample into the downsample conv's
        # BlockSpec index_map instead of a separate XLA gather pass.
        xs = xp[:, ::s, ::s, :].reshape(M2, Cin_p)
        wdw = _prep_w_1x1(p["wd"], Cin_p, Cout_p)
        id_pre, momd = conv1x1_stats(xs, wdw)                 # bf16 (M2, Cout_p)
        scd, shd = _finalize_bn(momd, M2, _pad_vec(p["gd"], Cout_p, 1.0),
                                _pad_vec(p["bd"], Cout_p, 0.0))
    else:
        id_pre = x_flat                        # f32; Cin_p == Cout_p, M1 == M2
        scd = jnp.ones((Cout_p,), jnp.float32)
        shd = jnp.zeros((Cout_p,), jnp.float32)

    # ---- epilogue: BN3(h3) + BN_d(identity) + add + ReLU, one kernel --------
    out = bn_add_relu(h3_pre, id_pre, sc3, sh3, scd, shd)     # (M2, Cout_p) f32
    out = out.reshape(B, Ho, Wo, Cout_p)[..., :Cout]
    return jnp.transpose(out, (0, 3, 1, 2))                   # back to NCHW


# ---------------------------------------------------------------------------
# Pure-JAX reference (independent path through lax.conv) for validation
# ---------------------------------------------------------------------------
def bottleneck_forward_ref(x_nchw, p, stride):
    x = jnp.transpose(x_nchw, (0, 2, 3, 1))  # NHWC

    def conv(inp, w_pt, s, padding):
        w = jnp.transpose(w_pt, (2, 3, 1, 0))  # OIHW -> HWIO
        return jax.lax.conv_general_dilated(
            inp, w, (s, s), padding,
            dimension_numbers=("NHWC", "HWIO", "NHWC"),
            precision=jax.lax.Precision.HIGHEST,
        )

    def bn(inp, g, b):
        mean = jnp.mean(inp, axis=(0, 1, 2), keepdims=True)
        var = jnp.mean((inp - mean) ** 2, axis=(0, 1, 2), keepdims=True)
        return g * (inp - mean) * jax.lax.rsqrt(var + EPS) + b

    identity = x
    if "wd" in p:
        identity = bn(conv(x, p["wd"], stride, "VALID"), p["gd"], p["bd"])
    h = jax.nn.relu(bn(conv(x, p["w1"], 1, "VALID"), p["g1"], p["b1"]))
    h = jax.nn.relu(
        bn(conv(h, p["w2"], stride, [(1, 1), (1, 1)]), p["g2"], p["b2"])
    )
    h = bn(conv(h, p["w3"], 1, "VALID"), p["g3"], p["b3"])
    out = jax.nn.relu(h + identity)
    return jnp.transpose(out, (0, 3, 1, 2))


# ---------------------------------------------------------------------------
# Deterministic parameter construction (PyTorch OIHW weight shapes)
# ---------------------------------------------------------------------------
def init_params(key, input_dim, layer_dim, stride, groups=1, width_per_group=64):
    output_dim = layer_dim * EXPANSION
    width = int(layer_dim * (width_per_group / 64.0)) * groups
    ks = jax.random.split(key, 12)

    def conv_w(k, o, i, kh, kw):
        # Fan-in scaled (He-like) init: keeps BN scales ~1 so the self-test's
        # bf16-vs-f32 comparison is not artificially amplified.
        std = (2.0 / (i * kh * kw)) ** 0.5
        return std * jax.random.normal(k, (o, i, kh, kw), jnp.float32)

    p = {
        "w1": conv_w(ks[0], width, input_dim, 1, 1),
        "g1": 1.0 + 0.1 * jax.random.normal(ks[1], (width,), jnp.float32),
        "b1": 0.1 * jax.random.normal(ks[2], (width,), jnp.float32),
        "w2": conv_w(ks[3], width, width // groups, 3, 3),
        "g2": 1.0 + 0.1 * jax.random.normal(ks[4], (width,), jnp.float32),
        "b2": 0.1 * jax.random.normal(ks[5], (width,), jnp.float32),
        "w3": conv_w(ks[6], output_dim, width, 1, 1),
        "g3": 1.0 + 0.1 * jax.random.normal(ks[7], (output_dim,), jnp.float32),
        "b3": 0.1 * jax.random.normal(ks[8], (output_dim,), jnp.float32),
    }
    if input_dim != output_dim or stride != 1:
        p["wd"] = conv_w(ks[9], output_dim, input_dim, 1, 1)
        p["gd"] = 1.0 + 0.1 * jax.random.normal(ks[10], (output_dim,), jnp.float32)
        p["bd"] = 0.1 * jax.random.normal(ks[11], (output_dim,), jnp.float32)
    return p


def _run_case(key, B, input_dim, H, W, layer_dim, stride):
    kx, kp = jax.random.split(key)
    x = jax.random.normal(kx, (B, input_dim, H, W), jnp.float32)
    params = init_params(kp, input_dim, layer_dim, stride)
    out = jax.block_until_ready(bottleneck_forward_pallas(x, params, stride))
    ref = jax.block_until_ready(bottleneck_forward_ref(x, params, stride))
    Ho = (H - 1) // stride + 1
    Wo = (W - 1) // stride + 1
    assert out.shape == ref.shape == (B, layer_dim * EXPANSION, Ho, Wo)
    # bf16 MXU operands / bf16 intermediates vs. an f32 HIGHEST reference:
    # tight relative-L2 bound + a loose elementwise bound.
    diff = out - ref
    rel_l2 = float(jnp.linalg.norm(diff) / (jnp.linalg.norm(ref) + 1e-12))
    assert rel_l2 < 2e-2, f"relative L2 error too large: {rel_l2}"
    assert jnp.allclose(out, ref, atol=6e-2, rtol=6e-2), "elementwise mismatch"


if __name__ == "__main__":
    key = jax.random.PRNGKey(0)
    k1, k2, k3 = jax.random.split(key, 3)
    # stride-2 block with downsample branch: Cin=16 -> Cout=32, 16x16 -> 8x8
    _run_case(k1, 2, 16, 16, 16, 8, 2)
    # stride-1 identity block: Cin == Cout == 32, no downsample, 16x16
    _run_case(k2, 2, 32, 16, 16, 8, 1)
    # stride-1 block with channel-change downsample and awkward spatial dims
    # (M = 2*18*18 = 648 exercises the cdiv / masked-remainder tiling path)
    _run_case(k3, 2, 16, 18, 18, 8, 1)
    print("KERNEL_OK")
</pallas_src>

<mosaic_0001>
module attributes {stable_mosaic.version = 11 : i64} {
  func.func @_mm_bn_stats_kernel(%arg0: i32, %arg1: memref<512x128xf32, #tpu.memory_space<vmem>>, %arg2: memref<128x128xbf16, #tpu.memory_space<vmem>>, %arg3: memref<512x128xbf16, #tpu.memory_space<vmem>>, %arg4: memref<1x2x128xf32, #tpu.memory_space<vmem>>) attributes {dimension_semantics = [#tpu.dimension_semantics<parallel>], iteration_bounds = array<i64: 1>, scalar_prefetch = 0 : i64, scratch_operands = 0 : i64, tpu.core_type = #tpu.core_type<tc>, window_params = [{transform_indices = @transform_0, window_bounds = array<i64: 512, 128>}, {pipeline_mode = #tpu.pipeline_mode<synchronous>, transform_indices = @transform_1, window_bounds = array<i64: 128, 128>}, {transform_indices = @transform_2, window_bounds = array<i64: 512, 128>}, {transform_indices = @transform_3, window_bounds = array<i64: 1, 2, 128>}]} {
    %c0 = arith.constant 0 : index
    %c0_0 = arith.constant 0 : index
    %0 = vector.load %arg1[%c0, %c0_0] : memref<512x128xf32, #tpu.memory_space<vmem>>, vector<512x128xf32>
    %1 = arith.truncf %0 : vector<512x128xf32> to vector<512x128xbf16>
    %c0_1 = arith.constant 0 : index
    %c0_2 = arith.constant 0 : index
    %2 = vector.load %arg2[%c0_1, %c0_2] : memref<128x128xbf16, #tpu.memory_space<vmem>>, vector<128x128xbf16>
    %cst = arith.constant dense<0.000000e+00> : vector<512x128xf32>
    %3 = tpu.matmul %1, %2, %cst {dimension_numbers = #tpu.dot_dimension_numbers<[1], [0], [0], [1], [0, 0, 1, 1], [], []>} : vector<512x128xbf16>, vector<128x128xbf16>, vector<512x128xf32> -> vector<512x128xf32>
    %4 = arith.truncf %3 : vector<512x128xf32> to vector<512x128xbf16>
    %c0_3 = arith.constant 0 : index
    %c0_4 = arith.constant 0 : index
    %5 = vector.load %arg3[%c0_3, %c0_4] : memref<512x128xbf16, #tpu.memory_space<vmem>>, vector<512x128xbf16>
    tpu.vector_store %arg3[%c0_3, %c0_4], %4 {strides = array<i32>} : memref<512x128xbf16, #tpu.memory_space<vmem>>, vector<512x128xbf16>,
    %cst_5 = arith.constant dense<0.000000e+00> : vector<128xf32>
    %6 = vector.multi_reduction <add>, %3, %cst_5 [0] : vector<512x128xf32> to vector<128xf32>
    %7 = vector.shape_cast %6 : vector<128xf32> to vector<1x128xf32>
    %8 = arith.mulf %3, %3 : vector<512x128xf32>
    %cst_6 = arith.constant dense<0.000000e+00> : vector<128xf32>
    %9 = vector.multi_reduction <add>, %8, %cst_6 [0] : vector<512x128xf32> to vector<128xf32>
    %10 = vector.shape_cast %9 : vector<128xf32> to vector<1x128xf32>
    %11 = tpu.concatenate %7, %10 in 0 : vector<1x128xf32>, vector<1x128xf32> -> vector<2x128xf32>
    %c0_7 = arith.constant 0 : index
    %c0_8 = arith.constant 0 : index
    %c0_9 = arith.constant 0 : index
    %12 = vector.load %arg4[%c0_7, %c0_8, %c0_9] : memref<1x2x128xf32, #tpu.memory_space<vmem>>, vector<1x2x128xf32>
    %13 = vector.shape_cast %12 : vector<1x2x128xf32> to vector<2x128xf32>
    %14 = vector.shape_cast %11 : vector<2x128xf32> to vector<1x2x128xf32>
    tpu.vector_store %arg4[%c0_7, %c0_8, %c0_9], %14 {strides = array<i32>} : memref<1x2x128xf32, #tpu.memory_space<vmem>>, vector<1x2x128xf32>,
    return
  }
  func.func @transform_0(%arg0: i32) -> (i32, i32) {
    %c0_i32 = arith.constant 0 : i32
    %c0_i32_0 = arith.constant 0 : i32
    return %arg0, %c0_i32 : i32, i32
  }
  func.func @transform_1(%arg0: i32) -> (i32, i32) {
    %c0_i32 = arith.constant 0 : i32
    %c0_i32_0 = arith.constant 0 : i32
    %c0_i32_1 = arith.constant 0 : i32
    return %c0_i32, %c0_i32_0 : i32, i32
  }
  func.func @transform_2(%arg0: i32) -> (i32, i32) {
    %c0_i32 = arith.constant 0 : i32
    %c0_i32_0 = arith.constant 0 : i32
    return %arg0, %c0_i32 : i32, i32
  }
  func.func @transform_3(%arg0: i32) -> (i32, i32, i32) {
    %c0_i32 = arith.constant 0 : i32
    %c0_i32_0 = arith.constant 0 : i32
    %c0_i32_1 = arith.constant 0 : i32
    return %arg0, %c0_i32, %c0_i32_0 : i32, i32, i32
  }
}

module attributes {stable_mosaic.version = 11 : i64} {
  func.func @_conv3x3_stats_kernel(%arg0: i32, %arg1: memref<4x152x128xbf16, #tpu.memory_space<vmem>>, %arg2: memref<9x128x128xbf16, #tpu.memory_space<vmem>>, %arg3: memref<1x8x8x128xbf16, #tpu.memory_space<vmem>>, %arg4: memref<1x2x128xf32, #tpu.memory_space<vmem>>) attributes {dimension_semantics = [#tpu.dimension_semantics<parallel>], iteration_bounds = array<i64: 2>, scalar_prefetch = 0 : i64, scratch_operands = 0 : i64, tpu.core_type = #tpu.core_type<tc>, window_params = [{transform_indices = @transform_0, window_bounds = array<i64: 4, 152, 128>}, {pipeline_mode = #tpu.pipeline_mode<synchronous>, transform_indices = @transform_1, window_bounds = array<i64: 9, 128, 128>}, {transform_indices = @transform_2, window_bounds = array<i64: 1, 8, 8, 128>}, {transform_indices = @transform_3, window_bounds = array<i64: 1, 2, 128>}]} {
    %c0 = arith.constant 0 : index
    %c0_0 = arith.constant 0 : index
    %c0_1 = arith.constant 0 : index
    %0 = vector.load %arg1[%c0, %c0_0, %c0_1] : memref<4x152x128xbf16, #tpu.memory_space<vmem>>, vector<4x152x128xbf16>
    %1 = vector.extract_strided_slice %0 {offsets = [0, 0, 0], sizes = [4, 144, 128], strides = [1, 1, 1]} : vector<4x152x128xbf16> to vector<4x144x128xbf16>
    %2 = vector.extract_strided_slice %0 {offsets = [0, 1, 0], sizes = [4, 144, 128], strides = [1, 1, 1]} : vector<4x152x128xbf16> to vector<4x144x128xbf16>
    %cst = arith.constant 0.000000e+00 : f32
    %3 = vector.broadcast %cst : f32 to vector<128x128xf32>
    %4 = vector.extract_strided_slice %1 {offsets = [0, 0, 0], sizes = [1, 128, 128], strides = [1, 1, 1]} : vector<4x144x128xbf16> to vector<1x128x128xbf16>
    %5 = vector.shape_cast %4 : vector<1x128x128xbf16> to vector<128x128xbf16>
    %c0_2 = arith.constant 0 : index
    %c0_3 = arith.constant 0 : index
    %c0_4 = arith.constant 0 : index
    %6 = vector.load %arg2[%c0_2, %c0_3, %c0_4] : memref<9x128x128xbf16, #tpu.memory_space<vmem>>, vector<1x128x128xbf16>
    %7 = vector.shape_cast %6 : vector<1x128x128xbf16> to vector<128x128xbf16>
    %cst_5 = arith.constant dense<0.000000e+00> : vector<128x128xf32>
    %8 = tpu.matmul %5, %7, %cst_5 {dimension_numbers = #tpu.dot_dimension_numbers<[1], [0], [0], [1], [0, 0, 1, 1], [], []>} : vector<128x128xbf16>, vector<128x128xbf16>, vector<128x128xf32> -> vector<128x128xf32>
    %9 = arith.addf %3, %8 : vector<128x128xf32>
    %10 = vector.extract_strided_slice %1 {offsets = [1, 0, 0], sizes = [1, 128, 128], strides = [1, 1, 1]} : vector<4x144x128xbf16> to vector<1x128x128xbf16>
    %11 = vector.shape_cast %10 : vector<1x128x128xbf16> to vector<128x128xbf16>
    %c1 = arith.constant 1 : index
    %c0_6 = arith.constant 0 : index
    %c0_7 = arith.constant 0 : index
    %12 = vector.load %arg2[%c1, %c0_6, %c0_7] : memref<9x128x128xbf16, #tpu.memory_space<vmem>>, vector<1x128x128xbf16>
    %13 = vector.shape_cast %12 : vector<1x128x128xbf16> to vector<128x128xbf16>
    %cst_8 = arith.constant dense<0.000000e+00> : vector<128x128xf32>
    %14 = tpu.matmul %11, %13, %cst_8 {dimension_numbers = #tpu.dot_dimension_numbers<[1], [0], [0], [1], [0, 0, 1, 1], [], []>} : vector<128x128xbf16>, vector<128x128xbf16>, vector<128x128xf32> -> vector<128x128xf32>
    %15 = arith.addf %9, %14 : vector<128x128xf32>
    %16 = vector.extract_strided_slice %2 {offsets = [0, 0, 0], sizes = [1, 128, 128], strides = [1, 1, 1]} : vector<4x144x128xbf16> to vector<1x128x128xbf16>
    %17 = vector.shape_cast %16 : vector<1x128x128xbf16> to vector<128x128xbf16>
    %c2 = arith.constant 2 : index
    %c0_9 = arith.constant 0 : index
    %c0_10 = arith.constant 0 : index
    %18 = vector.load %arg2[%c2, %c0_9, %c0_10] : memref<9x128x128xbf16, #tpu.memory_space<vmem>>, vector<1x128x128xbf16>
    %19 = vector.shape_cast %18 : vector<1x128x128xbf16> to vector<128x128xbf16>
    %cst_11 = arith.constant dense<0.000000e+00> : vector<128x128xf32>
    %20 = tpu.matmul %17, %19, %cst_11 {dimension_numbers = #tpu.dot_dimension_numbers<[1], [0], [0], [1], [0, 0, 1, 1], [], []>} : vector<128x128xbf16>, vector<128x128xbf16>, vector<128x128xf32> -> vector<128x128xf32>
    %21 = arith.addf %15, %20 : vector<128x128xf32>
    %22 = vector.extract_strided_slice %1 {offsets = [2, 0, 0], sizes = [1, 128, 128], strides = [1, 1, 1]} : vector<4x144x128xbf16> to vector<1x128x128xbf16>
    %23 = vector.shape_cast %22 : vector<1x128x128xbf16> to vector<128x128xbf16>
    %c3 = arith.constant 3 : index
    %c0_12 = arith.constant 0 : index
    %c0_13 = arith.constant 0 : index
    %24 = vector.load %arg2[%c3, %c0_12, %c0_13] : memref<9x128x128xbf16, #tpu.memory_space<vmem>>, vector<1x128x128xbf16>
    %25 = vector.shape_cast %24 : vector<1x128x128xbf16> to vector<128x128xbf16>
    %cst_14 = arith.constant dense<0.000000e+00> : vector<128x128xf32>
    %26 = tpu.matmul %23, %25, %cst_14 {dimension_numbers = #tpu.dot_dimension_numbers<[1], [0], [0], [1], [0, 0, 1, 1], [], []>} : vector<128x128xbf16>, vector<128x128xbf16>, vector<128x128xf32> -> vector<128x128xf32>
    %27 = arith.addf %21, %26 : vector<128x128xf32>
    %28 = vector.extract_strided_slice %1 {offsets = [3, 0, 0], sizes = [1, 128, 128], strides = [1, 1, 1]} : vector<4x144x128xbf16> to vector<1x128x128xbf16>
    %29 = vector.shape_cast %28 : vector<1x128x128xbf16> to vector<128x128xbf16>
    %c4 = arith.constant 4 : index
    %c0_15 = arith.constant 0 : index
    %c0_16 = arith.constant 0 : index
    %30 = vector.load %arg2[%c4, %c0_15, %c0_16] : memref<9x128x128xbf16, #tpu.memory_space<vmem>>, vector<1x128x128xbf16>
    %31 = vector.shape_cast %30 : vector<1x128x128xbf16> to vector<128x128xbf16>
    %cst_17 = arith.constant dense<0.000000e+00> : vector<128x128xf32>
    %32 = tpu.matmul %29, %31, %cst_17 {dimension_numbers = #tpu.dot_dimension_numbers<[1], [0], [0], [1], [0, 0, 1, 1], [], []>} : vector<128x128xbf16>, vector<128x128xbf16>, vector<128x128xf32> -> vector<128x128xf32>
    %33 = arith.addf %27, %32 : vector<128x128xf32>
    %34 = vector.extract_strided_slice %2 {offsets = [2, 0, 0], sizes = [1, 128, 128], strides = [1, 1, 1]} : vector<4x144x128xbf16> to vector<1x128x128xbf16>
    %35 = vector.shape_cast %34 : vector<1x128x128xbf16> to vector<128x128xbf16>
    %c5 = arith.constant 5 : index
    %c0_18 = arith.constant 0 : index
    %c0_19 = arith.constant 0 : index
    %36 = vector.load %arg2[%c5, %c0_18, %c0_19] : memref<9x128x128xbf16, #tpu.memory_space<vmem>>, vector<1x128x128xbf16>
    %37 = vector.shape_cast %36 : vector<1x128x128xbf16> to vector<128x128xbf16>
    %cst_20 = arith.constant dense<0.000000e+00> : vector<128x128xf32>
    %38 = tpu.matmul %35, %37, %cst_20 {dimension_numbers = #tpu.dot_dimension_numbers<[1], [0], [0], [1], [0, 0, 1, 1], [], []>} : vector<128x128xbf16>, vector<128x128xbf16>, vector<128x128xf32> -> vector<128x128xf32>
    %39 = arith.addf %33, %38 : vector<128x128xf32>
    %40 = vector.extract_strided_slice %1 {offsets = [0, 16, 0], sizes = [1, 128, 128], strides = [1, 1, 1]} : vector<4x144x128xbf16> to vector<1x128x128xbf16>
    %41 = vector.shape_cast %40 : vector<1x128x128xbf16> to vector<128x128xbf16>
    %c6 = arith.constant 6 : index
    %c0_21 = arith.constant 0 : index
    %c0_22 = arith.constant 0 : index
    %42 = vector.load %arg2[%c6, %c0_21, %c0_22] : memref<9x128x128xbf16, #tpu.memory_space<vmem>>, vector<1x128x128xbf16>
    %43 = vector.shape_cast %42 : vector<1x128x128xbf16> to vector<128x128xbf16>
    %cst_23 = arith.constant dense<0.000000e+00> : vector<128x128xf32>
    %44 = tpu.matmul %41, %43, %cst_23 {dimension_numbers = #tpu.dot_dimension_numbers<[1], [0], [0], [1], [0, 0, 1, 1], [], []>} : vector<128x128xbf16>, vector<128x128xbf16>, vector<128x128xf32> -> vector<128x128xf32>
    %45 = arith.addf %39, %44 : vector<128x128xf32>
    %46 = vector.extract_strided_slice %1 {offsets = [1, 16, 0], sizes = [1, 128, 128], strides = [1, 1, 1]} : vector<4x144x128xbf16> to vector<1x128x128xbf16>
    %47 = vector.shape_cast %46 : vector<1x128x128xbf16> to vector<128x128xbf16>
    %c7 = arith.constant 7 : index
    %c0_24 = arith.constant 0 : index
    %c0_25 = arith.constant 0 : index
    %48 = vector.load %arg2[%c7, %c0_24, %c0_25] : memref<9x128x128xbf16, #tpu.memory_space<vmem>>, vector<1x128x128xbf16>
    %49 = vector.shape_cast %48 : vector<1x128x128xbf16> to vector<128x128xbf16>
    %cst_26 = arith.constant dense<0.000000e+00> : vector<128x128xf32>
    %50 = tpu.matmul %47, %49, %cst_26 {dimension_numbers = #tpu.dot_dimension_numbers<[1], [0], [0], [1], [0, 0, 1, 1], [], []>} : vector<128x128xbf16>, vector<128x128xbf16>, vector<128x128xf32> -> vector<128x128xf32>
    %51 = arith.addf %45, %50 : vector<128x128xf32>
    %52 = vector.extract_strided_slice %2 {offsets = [0, 16, 0], sizes = [1, 128, 128], strides = [1, 1, 1]} : vector<4x144x128xbf16> to vector<1x128x128xbf16>
    %53 = vector.shape_cast %52 : vector<1x128x128xbf16> to vector<128x128xbf16>
    %c8 = arith.constant 8 : index
    %c0_27 = arith.constant 0 : index
    %c0_28 = arith.constant 0 : index
    %54 = vector.load %arg2[%c8, %c0_27, %c0_28] : memref<9x128x128xbf16, #tpu.memory_space<vmem>>, vector<1x128x128xbf16>
    %55 = vector.shape_cast %54 : vector<1x128x128xbf16> to vector<128x128xbf16>
    %cst_29 = arith.constant dense<0.000000e+00> : vector<128x128xf32>
    %56 = tpu.matmul %53, %55, %cst_29 {dimension_numbers = #tpu.dot_dimension_numbers<[1], [0], [0], [1], [0, 0, 1, 1], [], []>} : vector<128x128xbf16>, vector<128x128xbf16>, vector<128x128xf32> -> vector<128x128xf32>
    %57 = arith.addf %51, %56 : vector<128x128xf32>
    %58 = vector.shape_cast %57 : vector<128x128xf32> to vector<8x16x128xf32>
    %59 = vector.extract_strided_slice %58 {offsets = [0, 0, 0], sizes = [8, 8, 128], strides = [1, 1, 1]} : vector<8x16x128xf32> to vector<8x8x128xf32>
    %60 = vector.shape_cast %59 : vector<8x8x128xf32> to vector<1x8x8x128xf32>
    %61 = arith.truncf %60 : vector<1x8x8x128xf32> to vector<1x8x8x128xbf16>
    %c0_30 = arith.constant 0 : index
    %c0_31 = arith.constant 0 : index
    %c0_32 = arith.constant 0 : index
    %c0_33 = arith.constant 0 : index
    %62 = vector.load %arg3[%c0_30, %c0_31, %c0_32, %c0_33] : memref<1x8x8x128xbf16, #tpu.memory_space<vmem>>, vector<1x8x8x128xbf16>
    tpu.vector_store %arg3[%c0_30, %c0_31, %c0_32, %c0_33], %61 {strides = array<i32>} : memref<1x8x8x128xbf16, #tpu.memory_space<vmem>>, vector<1x8x8x128xbf16>,
    %cst_34 = arith.constant dense<0.000000e+00> : vector<128xf32>
    %63 = vector.multi_reduction <add>, %59, %cst_34 [0, 1] : vector<8x8x128xf32> to vector<128xf32>
    %64 = vector.shape_cast %63 : vector<128xf32> to vector<1x128xf32>
    %65 = arith.mulf %59, %59 : vector<8x8x128xf32>
    %cst_35 = arith.constant dense<0.000000e+00> : vector<128xf32>
    %66 = vector.multi_reduction <add>, %65, %cst_35 [0, 1] : vector<8x8x128xf32> to vector<128xf32>
    %67 = vector.shape_cast %66 : vector<128xf32> to vector<1x128xf32>
    %68 = tpu.concatenate %64, %67 in 0 : vector<1x128xf32>, vector<1x128xf32> -> vector<2x128xf32>
    %c0_36 = arith.constant 0 : index
    %c0_37 = arith.constant 0 : index
    %c0_38 = arith.constant 0 : index
    %69 = vector.load %arg4[%c0_36, %c0_37, %c0_38] : memref<1x2x128xf32, #tpu.memory_space<vmem>>, vector<1x2x128xf32>
    %70 = vector.shape_cast %69 : vector<1x2x128xf32> to vector<2x128xf32>
    %71 = vector.shape_cast %68 : vector<2x128xf32> to vector<1x2x128xf32>
    tpu.vector_store %arg4[%c0_36, %c0_37, %c0_38], %71 {strides = array<i32>} : memref<1x2x128xf32, #tpu.memory_space<vmem>>, vector<1x2x128xf32>,
    return
  }
  func.func @transform_0(%arg0: i32) -> (i32, i32, i32) {
    %c0_i32 = arith.constant 0 : i32
    %c0_i32_0 = arith.constant 0 : i32
    %c0_i32_1 = arith.constant 0 : i32
    return %arg0, %c0_i32, %c0_i32_0 : i32, i32, i32
  }
  func.func @transform_1(%arg0: i32) -> (i32, i32, i32) {
    %c0_i32 = arith.constant 0 : i32
    %c0_i32_0 = arith.constant 0 : i32
    %c0_i32_1 = arith.constant 0 : i32
    %c0_i32_2 = arith.constant 0 : i32
    return %c0_i32, %c0_i32_0, %c0_i32_1 : i32, i32, i32
  }
  func.func @transform_2(%arg0: i32) -> (i32, i32, i32, i32) {
    %c0_i32 = arith.constant 0 : i32
    %c0_i32_0 = arith.constant 0 : i32
    %c0_i32_1 = arith.constant 0 : i32
    %c0_i32_2 = arith.constant 0 : i32
    return %arg0, %c0_i32, %c0_i32_0, %c0_i32_1 : i32, i32, i32, i32
  }
  func.func @transform_3(%arg0: i32) -> (i32, i32, i32) {
    %c0_i32 = arith.constant 0 : i32
    %c0_i32_0 = arith.constant 0 : i32
    %c0_i32_1 = arith.constant 0 : i32
    return %arg0, %c0_i32, %c0_i32_0 : i32, i32, i32
  }
}

module attributes {stable_mosaic.version = 11 : i64} {
  func.func @_mm_bn_stats_kernel(%arg0: i32, %arg1: memref<128x128xbf16, #tpu.memory_space<vmem>>, %arg2: memref<1x128xf32, #tpu.memory_space<vmem>>, %arg3: memref<1x128xf32, #tpu.memory_space<vmem>>, %arg4: memref<128x128xbf16, #tpu.memory_space<vmem>>, %arg5: memref<128x128xbf16, #tpu.memory_space<vmem>>, %arg6: memref<1x2x128xf32, #tpu.memory_space<vmem>>) attributes {dimension_semantics = [#tpu.dimension_semantics<parallel>], iteration_bounds = array<i64: 1>, scalar_prefetch = 0 : i64, scratch_operands = 0 : i64, tpu.core_type = #tpu.core_type<tc>, window_params = [{transform_indices = @transform_0, window_bounds = array<i64: 128, 128>}, {pipeline_mode = #tpu.pipeline_mode<synchronous>, transform_indices = @transform_1, window_bounds = array<i64: 1, 128>}, {pipeline_mode = #tpu.pipeline_mode<synchronous>, transform_indices = @transform_2, window_bounds = array<i64: 1, 128>}, {pipeline_mode = #tpu.pipeline_mode<synchronous>, transform_indices = @transform_3, window_bounds = array<i64: 128, 128>}, {transform_indices = @transform_4, window_bounds = array<i64: 128, 128>}, {transform_indices = @transform_5, window_bounds = array<i64: 1, 2, 128>}]} {
    %c0 = arith.constant 0 : index
    %c0_0 = arith.constant 0 : index
    %0 = vector.load %arg1[%c0, %c0_0] : memref<128x128xbf16, #tpu.memory_space<vmem>>, vector<128x128xbf16>
    %1 = arith.extf %0 : vector<128x128xbf16> to vector<128x128xf32>
    %c0_1 = arith.constant 0 : index
    %c0_2 = arith.constant 0 : index
    %2 = vector.load %arg2[%c0_1, %c0_2] : memref<1x128xf32, #tpu.memory_space<vmem>>, vector<1x128xf32>
    %3 = vector.broadcast %2 : vector<1x128xf32> to vector<128x128xf32>
    %4 = arith.mulf %1, %3 : vector<128x128xf32>
    %c0_3 = arith.constant 0 : index
    %c0_4 = arith.constant 0 : index
    %5 = vector.load %arg3[%c0_3, %c0_4] : memref<1x128xf32, #tpu.memory_space<vmem>>, vector<1x128xf32>
    %6 = vector.broadcast %5 : vector<1x128xf32> to vector<128x128xf32>
    %7 = arith.addf %4, %6 : vector<128x128xf32>
    %cst = arith.constant 0.000000e+00 : f32
    %8 = vector.broadcast %cst : f32 to vector<128x128xf32>
    %9 = arith.maximumf %7, %8 : vector<128x128xf32>
    %10 = arith.truncf %9 : vector<128x128xf32> to vector<128x128xbf16>
    %c0_5 = arith.constant 0 : index
    %c0_6 = arith.constant 0 : index
    %11 = vector.load %arg4[%c0_5, %c0_6] : memref<128x128xbf16, #tpu.memory_space<vmem>>, vector<128x128xbf16>
    %cst_7 = arith.constant dense<0.000000e+00> : vector<128x128xf32>
    %12 = tpu.matmul %10, %11, %cst_7 {dimension_numbers = #tpu.dot_dimension_numbers<[1], [0], [0], [1], [0, 0, 1, 1], [], []>} : vector<128x128xbf16>, vector<128x128xbf16>, vector<128x128xf32> -> vector<128x128xf32>
    %13 = arith.truncf %12 : vector<128x128xf32> to vector<128x128xbf16>
    %c0_8 = arith.constant 0 : index
    %c0_9 = arith.constant 0 : index
    %14 = vector.load %arg5[%c0_8, %c0_9] : memref<128x128xbf16, #tpu.memory_space<vmem>>, vector<128x128xbf16>
    tpu.vector_store %arg5[%c0_8, %c0_9], %13 {strides = array<i32>} : memref<128x128xbf16, #tpu.memory_space<vmem>>, vector<128x128xbf16>,
    %cst_10 = arith.constant dense<0.000000e+00> : vector<128xf32>
    %15 = vector.multi_reduction <add>, %12, %cst_10 [0] : vector<128x128xf32> to vector<128xf32>
    %16 = vector.shape_cast %15 : vector<128xf32> to vector<1x128xf32>
    %17 = arith.mulf %12, %12 : vector<128x128xf32>
    %cst_11 = arith.constant dense<0.000000e+00> : vector<128xf32>
    %18 = vector.multi_reduction <add>, %17, %cst_11 [0] : vector<128x128xf32> to vector<128xf32>
    %19 = vector.shape_cast %18 : vector<128xf32> to vector<1x128xf32>
    %20 = tpu.concatenate %16, %19 in 0 : vector<1x128xf32>, vector<1x128xf32> -> vector<2x128xf32>
    %c0_12 = arith.constant 0 : index
    %c0_13 = arith.constant 0 : index
    %c0_14 = arith.constant 0 : index
    %21 = vector.load %arg6[%c0_12, %c0_13, %c0_14] : memref<1x2x128xf32, #tpu.memory_space<vmem>>, vector<1x2x128xf32>
    %22 = vector.shape_cast %21 : vector<1x2x128xf32> to vector<2x128xf32>
    %23 = vector.shape_cast %20 : vector<2x128xf32> to vector<1x2x128xf32>
    tpu.vector_store %arg6[%c0_12, %c0_13, %c0_14], %23 {strides = array<i32>} : memref<1x2x128xf32, #tpu.memory_space<vmem>>, vector<1x2x128xf32>,
    return
  }
  func.func @transform_0(%arg0: i32) -> (i32, i32) {
    %c0_i32 = arith.constant 0 : i32
    %c0_i32_0 = arith.constant 0 : i32
    return %arg0, %c0_i32 : i32, i32
  }
  func.func @transform_1(%arg0: i32) -> (i32, i32) {
    %c0_i32 = arith.constant 0 : i32
    %c0_i32_0 = arith.constant 0 : i32
    %c0_i32_1 = arith.constant 0 : i32
    return %c0_i32, %c0_i32_0 : i32, i32
  }
  func.func @transform_2(%arg0: i32) -> (i32, i32) {
    %c0_i32 = arith.constant 0 : i32
    %c0_i32_0 = arith.constant 0 : i32
    %c0_i32_1 = arith.constant 0 : i32
    return %c0_i32, %c0_i32_0 : i32, i32
  }
  func.func @transform_3(%arg0: i32) -> (i32, i32) {
    %c0_i32 = arith.constant 0 : i32
    %c0_i32_0 = arith.constant 0 : i32
    %c0_i32_1 = arith.constant 0 : i32
    return %c0_i32, %c0_i32_0 : i32, i32
  }
  func.func @transform_4(%arg0: i32) -> (i32, i32) {
    %c0_i32 = arith.constant 0 : i32
    %c0_i32_0 = arith.constant 0 : i32
    return %arg0, %c0_i32 : i32, i32
  }
  func.func @transform_5(%arg0: i32) -> (i32, i32, i32) {
    %c0_i32 = arith.constant 0 : i32
    %c0_i32_0 = arith.constant 0 : i32
    %c0_i32_1 = arith.constant 0 : i32
    return %arg0, %c0_i32, %c0_i32_0 : i32, i32, i32
  }
}

module attributes {stable_mosaic.version = 11 : i64} {
  func.func @_bn_add_relu_kernel(%arg0: i32, %arg1: memref<128x128xbf16, #tpu.memory_space<vmem>>, %arg2: memref<128x128xbf16, #tpu.memory_space<vmem>>, %arg3: memref<1x128xf32, #tpu.memory_space<vmem>>, %arg4: memref<1x128xf32, #tpu.memory_space<vmem>>, %arg5: memref<1x128xf32, #tpu.memory_space<vmem>>, %arg6: memref<1x128xf32, #tpu.memory_space<vmem>>, %arg7: memref<128x128xf32, #tpu.memory_space<vmem>>) attributes {dimension_semantics = [#tpu.dimension_semantics<parallel>], iteration_bounds = array<i64: 1>, scalar_prefetch = 0 : i64, scratch_operands = 0 : i64, tpu.core_type = #tpu.core_type<tc>, window_params = [{transform_indices = @transform_0, window_bounds = array<i64: 128, 128>}, {transform_indices = @transform_1, window_bounds = array<i64: 128, 128>}, {pipeline_mode = #tpu.pipeline_mode<synchronous>, transform_indices = @transform_2, window_bounds = array<i64: 1, 128>}, {pipeline_mode = #tpu.pipeline_mode<synchronous>, transform_indices = @transform_3, window_bounds = array<i64: 1, 128>}, {pipeline_mode = #tpu.pipeline_mode<synchronous>, transform_indices = @transform_4, window_bounds = array<i64: 1, 128>}, {pipeline_mode = #tpu.pipeline_mode<synchronous>, transform_indices = @transform_5, window_bounds = array<i64: 1, 128>}, {transform_indices = @transform_6, window_bounds = array<i64: 128, 128>}]} {
    %c0 = arith.constant 0 : index
    %c0_0 = arith.constant 0 : index
    %0 = vector.load %arg1[%c0, %c0_0] : memref<128x128xbf16, #tpu.memory_space<vmem>>, vector<128x128xbf16>
    %1 = arith.extf %0 : vector<128x128xbf16> to vector<128x128xf32>
    %c0_1 = arith.constant 0 : index
    %c0_2 = arith.constant 0 : index
    %2 = vector.load %arg3[%c0_1, %c0_2] : memref<1x128xf32, #tpu.memory_space<vmem>>, vector<1x128xf32>
    %3 = vector.broadcast %2 : vector<1x128xf32> to vector<128x128xf32>
    %4 = arith.mulf %1, %3 : vector<128x128xf32>
    %c0_3 = arith.constant 0 : index
    %c0_4 = arith.constant 0 : index
    %5 = vector.load %arg4[%c0_3, %c0_4] : memref<1x128xf32, #tpu.memory_space<vmem>>, vector<1x128xf32>
    %6 = vector.broadcast %5 : vector<1x128xf32> to vector<128x128xf32>
    %7 = arith.addf %4, %6 : vector<128x128xf32>
    %c0_5 = arith.constant 0 : index
    %c0_6 = arith.constant 0 : index
    %8 = vector.load %arg2[%c0_5, %c0_6] : memref<128x128xbf16, #tpu.memory_space<vmem>>, vector<128x128xbf16>
    %9 = arith.extf %8 : vector<128x128xbf16> to vector<128x128xf32>
    %c0_7 = arith.constant 0 : index
    %c0_8 = arith.constant 0 : index
    %10 = vector.load %arg5[%c0_7, %c0_8] : memref<1x128xf32, #tpu.memory_space<vmem>>, vector<1x128xf32>
    %11 = vector.broadcast %10 : vector<1x128xf32> to vector<128x128xf32>
    %12 = arith.mulf %9, %11 : vector<128x128xf32>
    %c0_9 = arith.constant 0 : index
    %c0_10 = arith.constant 0 : index
    %13 = vector.load %arg6[%c0_9, %c0_10] : memref<1x128xf32, #tpu.memory_space<vmem>>, vector<1x128xf32>
    %14 = vector.broadcast %13 : vector<1x128xf32> to vector<128x128xf32>
    %15 = arith.addf %12, %14 : vector<128x128xf32>
    %16 = arith.addf %7, %15 : vector<128x128xf32>
    %cst = arith.constant 0.000000e+00 : f32
    %17 = vector.broadcast %cst : f32 to vector<128x128xf32>
    %18 = arith.maximumf %16, %17 : vector<128x128xf32>
    %c0_11 = arith.constant 0 : index
    %c0_12 = arith.constant 0 : index
    %19 = vector.load %arg7[%c0_11, %c0_12] : memref<128x128xf32, #tpu.memory_space<vmem>>, vector<128x128xf32>
    tpu.vector_store %arg7[%c0_11, %c0_12], %18 {strides = array<i32>} : memref<128x128xf32, #tpu.memory_space<vmem>>, vector<128x128xf32>,
    return
  }
  func.func @transform_0(%arg0: i32) -> (i32, i32) {
    %c0_i32 = arith.constant 0 : i32
    %c0_i32_0 = arith.constant 0 : i32
    return %arg0, %c0_i32 : i32, i32
  }
  func.func @transform_1(%arg0: i32) -> (i32, i32) {
    %c0_i32 = arith.constant 0 : i32
    %c0_i32_0 = arith.constant 0 : i32
    return %arg0, %c0_i32 : i32, i32
  }
  func.func @transform_2(%arg0: i32) -> (i32, i32) {
    %c0_i32 = arith.constant 0 : i32
    %c0_i32_0 = arith.constant 0 : i32
    %c0_i32_1 = arith.constant 0 : i32
    return %c0_i32, %c0_i32_0 : i32, i32
  }
  func.func @transform_3(%arg0: i32) -> (i32, i32) {
    %c0_i32 = arith.constant 0 : i32
    %c0_i32_0 = arith.constant 0 : i32
    %c0_i32_1 = arith.constant 0 : i32
    return %c0_i32, %c0_i32_0 : i32, i32
  }
  func.func @transform_4(%arg0: i32) -> (i32, i32) {
    %c0_i32 = arith.constant 0 : i32
    %c0_i32_0 = arith.constant 0 : i32
    %c0_i32_1 = arith.constant 0 : i32
    return %c0_i32, %c0_i32_0 : i32, i32
  }
  func.func @transform_5(%arg0: i32) -> (i32, i32) {
    %c0_i32 = arith.constant 0 : i32
    %c0_i32_0 = arith.constant 0 : i32
    %c0_i32_1 = arith.constant 0 : i32
    return %c0_i32, %c0_i32_0 : i32, i32
  }
  func.func @transform_6(%arg0: i32) -> (i32, i32) {
    %c0_i32 = arith.constant 0 : i32
    %c0_i32_0 = arith.constant 0 : i32
    return %arg0, %c0_i32 : i32, i32
  }
}

module attributes {stable_mosaic.version = 11 : i64} {
  func.func @_mm_bn_stats_kernel(%arg0: i32, %arg1: memref<128x128xf32, #tpu.memory_space<vmem>>, %arg2: memref<128x128xbf16, #tpu.memory_space<vmem>>, %arg3: memref<128x128xbf16, #tpu.memory_space<vmem>>, %arg4: memref<1x2x128xf32, #tpu.memory_space<vmem>>) attributes {dimension_semantics = [#tpu.dimension_semantics<parallel>], iteration_bounds = array<i64: 1>, scalar_prefetch = 0 : i64, scratch_operands = 0 : i64, tpu.core_type = #tpu.core_type<tc>, window_params = [{transform_indices = @transform_0, window_bounds = array<i64: 128, 128>}, {pipeline_mode = #tpu.pipeline_mode<synchronous>, transform_indices = @transform_1, window_bounds = array<i64: 128, 128>}, {transform_indices = @transform_2, window_bounds = array<i64: 128, 128>}, {transform_indices = @transform_3, window_bounds = array<i64: 1, 2, 128>}]} {
    %c0 = arith.constant 0 : index
    %c0_0 = arith.constant 0 : index
    %0 = vector.load %arg1[%c0, %c0_0] : memref<128x128xf32, #tpu.memory_space<vmem>>, vector<128x128xf32>
    %1 = arith.truncf %0 : vector<128x128xf32> to vector<128x128xbf16>
    %c0_1 = arith.constant 0 : index
    %c0_2 = arith.constant 0 : index
    %2 = vector.load %arg2[%c0_1, %c0_2] : memref<128x128xbf16, #tpu.memory_space<vmem>>, vector<128x128xbf16>
    %cst = arith.constant dense<0.000000e+00> : vector<128x128xf32>
    %3 = tpu.matmul %1, %2, %cst {dimension_numbers = #tpu.dot_dimension_numbers<[1], [0], [0], [1], [0, 0, 1, 1], [], []>} : vector<128x128xbf16>, vector<128x128xbf16>, vector<128x128xf32> -> vector<128x128xf32>
    %4 = arith.truncf %3 : vector<128x128xf32> to vector<128x128xbf16>
    %c0_3 = arith.constant 0 : index
    %c0_4 = arith.constant 0 : index
    %5 = vector.load %arg3[%c0_3, %c0_4] : memref<128x128xbf16, #tpu.memory_space<vmem>>, vector<128x128xbf16>
    tpu.vector_store %arg3[%c0_3, %c0_4], %4 {strides = array<i32>} : memref<128x128xbf16, #tpu.memory_space<vmem>>, vector<128x128xbf16>,
    %cst_5 = arith.constant dense<0.000000e+00> : vector<128xf32>
    %6 = vector.multi_reduction <add>, %3, %cst_5 [0] : vector<128x128xf32> to vector<128xf32>
    %7 = vector.shape_cast %6 : vector<128xf32> to vector<1x128xf32>
    %8 = arith.mulf %3, %3 : vector<128x128xf32>
    %cst_6 = arith.constant dense<0.000000e+00> : vector<128xf32>
    %9 = vector.multi_reduction <add>, %8, %cst_6 [0] : vector<128x128xf32> to vector<128xf32>
    %10 = vector.shape_cast %9 : vector<128xf32> to vector<1x128xf32>
    %11 = tpu.concatenate %7, %10 in 0 : vector<1x128xf32>, vector<1x128xf32> -> vector<2x128xf32>
    %c0_7 = arith.constant 0 : index
    %c0_8 = arith.constant 0 : index
    %c0_9 = arith.constant 0 : index
    %12 = vector.load %arg4[%c0_7, %c0_8, %c0_9] : memref<1x2x128xf32, #tpu.memory_space<vmem>>, vector<1x2x128xf32>
    %13 = vector.shape_cast %12 : vector<1x2x128xf32> to vector<2x128xf32>
    %14 = vector.shape_cast %11 : vector<2x128xf32> to vector<1x2x128xf32>
    tpu.vector_store %arg4[%c0_7, %c0_8, %c0_9], %14 {strides = array<i32>} : memref<1x2x128xf32, #tpu.memory_space<vmem>>, vector<1x2x128xf32>,
    return
  }
  func.func @transform_0(%arg0: i32) -> (i32, i32) {
    %c0_i32 = arith.constant 0 : i32
    %c0_i32_0 = arith.constant 0 : i32
    return %arg0, %c0_i32 : i32, i32
  }
  func.func @transform_1(%arg0: i32) -> (i32, i32) {
    %c0_i32 = arith.constant 0 : i32
    %c0_i32_0 = arith.constant 0 : i32
    %c0_i32_1 = arith.constant 0 : i32
    return %c0_i32, %c0_i32_0 : i32, i32
  }
  func.func @transform_2(%arg0: i32) -> (i32, i32) {
    %c0_i32 = arith.constant 0 : i32
    %c0_i32_0 = arith.constant 0 : i32
    return %arg0, %c0_i32 : i32, i32
  }
  func.func @transform_3(%arg0: i32) -> (i32, i32, i32) {
    %c0_i32 = arith.constant 0 : i32
    %c0_i32_0 = arith.constant 0 : i32
    %c0_i32_1 = arith.constant 0 : i32
    return %arg0, %c0_i32, %c0_i32_0 : i32, i32, i32
  }
}

</mosaic_0001>

<bundles_post_ra>
// kernel: bottleneck_forward_pallas.5
= control target key start
LH: loop header
LB: loop body
LE: loop exit
PB: predicated region body
PF: predicated region fallthrough
CT: control target
= control target key end

     0   :  { %vm985_vm0 = vcmask 1040384   ;;  %s1994_s1 = inlined_call_operand.vmem [shape: bf16[128,128], index: 1, kind: input, shape index: {}]   ;;  %s1995_s0 = inlined_call_operand.vmem [shape: f32[512,128], index: 0, kind: input, shape index: {}]   ;;  %s1996_s2 = inlined_call_operand.vmem [shape: bf16[512,128], index: 2, kind: output, shape index: {0}]   ;;  %s1997_s3 = inlined_call_operand.vmem [shape: f32[1,2,128], index: 3, kind: output, shape index: {1}]  }
   0x1   :  { %v1459_v0 = vld [vmem:[%s1994_s1] sm:$0xff]   ;;  %v1460_v1 = vld [vmem:[%s1994_s1 + $0x8] sm:$0xff]   ;;  %v1461_v2 = vld [vmem:[%s1994_s1 + $0x10] sm:$0xff]  }
   0x2   :  { %1363 = vmatprep.subr.bf16.mxu0 %v1459_v0  ;;  %1443 = vmatprep.subr.bf16.mxu1 %v1459_v0  ;;  %v1462_v3 = vld [vmem:[%s1994_s1 + $0x18] sm:$0xff]   ;;  %v14_v4 = vld [vmem:[%s1995_s0] sm:$0xff]  ;;  %v15_v5 = vld [vmem:[%s1995_s0 + $0x8] sm:$0xff] }
   0x3   :  { %1364 = vmatpush3.bf16.msra.mxu0 %v1459_v0  ;;  %1451 = vmatpush3.bf16.msra.mxu1 %v1459_v0  ;;  %v78_v6 = vpack.c.bf16 %v15_v5, %v14_v4  ;;  %v1463_v7 = vld [vmem:[%s1994_s1 + $0x20] sm:$0xff]   ;;  %v1464_v8 = vld [vmem:[%s1994_s1 + $0x28] sm:$0xff]   ;;  %v1465_v11 = vld [vmem:[%s1994_s1 + $0x30] sm:$0xff]  }
   0x4   :  { %1365 = vmatprep.subr.bf16.mxu0 %v1460_v1  ;;  %1444 = vmatprep.subr.bf16.mxu1 %v1460_v1  ;;  %v46_v9 = vld [vmem:[%s1995_s0 + $0x100] sm:$0xff]  ;;  %v47_v10 = vld [vmem:[%s1995_s0 + $0x108] sm:$0xff]  ;;  %v1466_v13 = vld [vmem:[%s1994_s1 + $0x38] sm:$0xff]  }
   0x5   :  { %1379 = vmatprep.mubr.bf16.mxu0 %v78_v6  ;;  %v94_v12 = vpack.c.bf16 %v47_v10, %v46_v9  ;;  %v16_v14 = vld [vmem:[%s1995_s0 + $0x10] sm:$0xff]  ;;  %v17_v15 = vld [vmem:[%s1995_s0 + $0x18] sm:$0xff]  ;;  %v18_v16 = vld [vmem:[%s1995_s0 + $0x20] sm:$0xff] }
   0x6   :  { %v19_v17 = vld [vmem:[%s1995_s0 + $0x28] sm:$0xff]  ;;  %v48_v18 = vld [vmem:[%s1995_s0 + $0x110] sm:$0xff]  ;;  %v49_v19 = vld [vmem:[%s1995_s0 + $0x118] sm:$0xff]  ;;  %v79_v22 = vpack.c.bf16 %v17_v15, %v16_v14 }
   0x7   :  { %1366 = vmatpush3.bf16.msra.mxu0 %v1460_v1  ;;  %1452 = vmatpush3.bf16.msra.mxu1 %v1460_v1  ;;  %v50_v20 = vld [vmem:[%s1995_s0 + $0x120] sm:$0xff]  ;;  %v51_v21 = vld [vmem:[%s1995_s0 + $0x128] sm:$0xff]  ;;  %v80_v23 = vpack.c.bf16 %v19_v17, %v18_v16  ;;  %v95_v24 = vpack.c.bf16 %v49_v19, %v48_v18  ;;  %v20_v26 = vld [vmem:[%s1995_s0 + $0x30] sm:$0xff] }
   0x8   :  { %1367 = vmatprep.subr.bf16.mxu0 %v1461_v2  ;;  %1445 = vmatprep.subr.bf16.mxu1 %v1461_v2  ;;  %v96_v25 = vpack.c.bf16 %v51_v21, %v50_v20  ;;  %v21_v27 = vld [vmem:[%s1995_s0 + $0x38] sm:$0xff]  ;;  %v22_v28 = vld [vmem:[%s1995_s0 + $0x40] sm:$0xff]  ;;  %v23_v29 = vld [vmem:[%s1995_s0 + $0x48] sm:$0xff] }
   0x9   :  { %1411 = vmatprep.mubr.bf16.mxu1 %v94_v12  ;;  %v52_v30 = vld [vmem:[%s1995_s0 + $0x130] sm:$0xff]  ;;  %v53_v31 = vld [vmem:[%s1995_s0 + $0x138] sm:$0xff]  ;;  %v54_v32 = vld [vmem:[%s1995_s0 + $0x140] sm:$0xff]  ;;  %v81_v34 = vpack.c.bf16 %v21_v27, %v20_v26  ;;  %v82_v35 = vpack.c.bf16 %v23_v29, %v22_v28 }
   0xa   :  { %v55_v33 = vld [vmem:[%s1995_s0 + $0x148] sm:$0xff]  ;;  %v97_v36 = vpack.c.bf16 %v53_v31, %v52_v30  ;;  %v24_v38 = vld [vmem:[%s1995_s0 + $0x50] sm:$0xff]  ;;  %v25_v39 = vld [vmem:[%s1995_s0 + $0x58] sm:$0xff] }
   0xb   :  { %1368 = vmatpush3.bf16.msra.mxu0 %v1461_v2  ;;  %1453 = vmatpush3.bf16.msra.mxu1 %v1461_v2  ;;  %v98_v37 = vpack.c.bf16 %v55_v33, %v54_v32  ;;  %v26_v40 = vld [vmem:[%s1995_s0 + $0x60] sm:$0xff]  ;;  %v27_v41 = vld [vmem:[%s1995_s0 + $0x68] sm:$0xff]  ;;  %v56_v42 = vld [vmem:[%s1995_s0 + $0x150] sm:$0xff]  ;;  %v83_v46 = vpack.c.bf16 %v25_v39, %v24_v38 }
   0xc   :  { %1369 = vmatprep.subr.bf16.mxu0 %v1462_v3  ;;  %1446 = vmatprep.subr.bf16.mxu1 %v1462_v3  ;;  %v57_v43 = vld [vmem:[%s1995_s0 + $0x158] sm:$0xff]  ;;  %v58_v44 = vld [vmem:[%s1995_s0 + $0x160] sm:$0xff]  ;;  %v59_v45 = vld [vmem:[%s1995_s0 + $0x168] sm:$0xff]  ;;  %v84_v47 = vpack.c.bf16 %v27_v41, %v26_v40 }
   0xd   :  { %v99_v48 = vpack.c.bf16 %v57_v43, %v56_v42  ;;  %v100_v49 = vpack.c.bf16 %v59_v45, %v58_v44  ;;  %v28_v50 = vld [vmem:[%s1995_s0 + $0x70] sm:$0xff]  ;;  %v29_v51 = vld [vmem:[%s1995_s0 + $0x78] sm:$0xff]  ;;  %v30_v52 = vld [vmem:[%s1995_s0 + $0x80] sm:$0xff] }
   0xe   :  { %v31_v53 = vld [vmem:[%s1995_s0 + $0x88] sm:$0xff]  ;;  %v60_v54 = vld [vmem:[%s1995_s0 + $0x170] sm:$0xff]  ;;  %v61_v55 = vld [vmem:[%s1995_s0 + $0x178] sm:$0xff]  ;;  %v85_v58 = vpack.c.bf16 %v29_v51, %v28_v50 }
   0xf   :  { %1370 = vmatpush3.bf16.msra.mxu0 %v1462_v3  ;;  %1454 = vmatpush3.bf16.msra.mxu1 %v1462_v3  ;;  %v62_v56 = vld [vmem:[%s1995_s0 + $0x180] sm:$0xff]  ;;  %v63_v57 = vld [vmem:[%s1995_s0 + $0x188] sm:$0xff]  ;;  %v86_v59 = vpack.c.bf16 %v31_v53, %v30_v52  ;;  %v101_v60 = vpack.c.bf16 %v61_v55, %v60_v54  ;;  %v32_v62 = vld [vmem:[%s1995_s0 + $0x90] sm:$0xff] }
  0x10   :  { %1371 = vmatprep.subr.bf16.mxu0 %v1463_v7  ;;  %1447 = vmatprep.subr.bf16.mxu1 %v1463_v7  ;;  %v102_v61 = vpack.c.bf16 %v63_v57, %v62_v56  ;;  %v33_v63 = vld [vmem:[%s1995_s0 + $0x98] sm:$0xff]  ;;  %v34_v0 = vld [vmem:[%s1995_s0 + $0xa0] sm:$0xff]  ;;  %v35_v1 = vld [vmem:[%s1995_s0 + $0xa8] sm:$0xff] }
  0x11   :  { %v64_v2 = vld [vmem:[%s1995_s0 + $0x190] sm:$0xff]  ;;  %v65_v3 = vld [vmem:[%s1995_s0 + $0x198] sm:$0xff]  ;;  %v66_v4 = vld [vmem:[%s1995_s0 + $0x1a0] sm:$0xff]  ;;  %v87_v6 = vpack.c.bf16 %v33_v63, %v32_v62 }
  0x12   :  { %v67_v5 = vld [vmem:[%s1995_s0 + $0x1a8] sm:$0xff]  ;;  %v36_v10 = vld [vmem:[%s1995_s0 + $0xb0] sm:$0xff]  ;;  %v38_v12 = vld [vmem:[%s1995_s0 + $0xc0] sm:$0xff] }
  0x13   :  { %1372 = vmatpush3.bf16.msra.mxu0 %v1463_v7  ;;  %1455 = vmatpush3.bf16.msra.mxu1 %v1463_v7  ;;  %v88_v7 = vpack.c.bf16 %v35_v1, %v34_v0  ;;  %v104_v9 = vpack.c.bf16 %v67_v5, %v66_v4  ;;  %v68_v14 = vld [vmem:[%s1995_s0 + $0x1b0] sm:$0xff]  ;;  %v69_v15 = vld [vmem:[%s1995_s0 + $0x1b8] sm:$0xff]  ;;  %v70_v16 = vld [vmem:[%s1995_s0 + $0x1c0] sm:$0xff] }
  0x14   :  { %1373 = vmatprep.subr.bf16.mxu0 %v1464_v8  ;;  %1448 = vmatprep.subr.bf16.mxu1 %v1464_v8  ;;  %v71_v17 = vld [vmem:[%s1995_s0 + $0x1c8] sm:$0xff]  ;;  %v105_v20 = vpack.c.bf16 %v69_v15, %v68_v14  ;;  %v72_v26 = vld [vmem:[%s1995_s0 + $0x1d0] sm:$0xff]  ;;  %v73_v27 = vld [vmem:[%s1995_s0 + $0x1d8] sm:$0xff] }
  0x15   :  { %v106_v21 = vpack.c.bf16 %v71_v17, %v70_v16  ;;  %v74_v28 = vld [vmem:[%s1995_s0 + $0x1e0] sm:$0xff]  ;;  %v75_v29 = vld [vmem:[%s1995_s0 + $0x1e8] sm:$0xff]  ;;  %v107_v32 = vpack.c.bf16 %v73_v27, %v72_v26 }
  0x16   :  { %v108_v33 = vpack.c.bf16 %v75_v29, %v74_v28 }
  0x17   :  { %1374 = vmatpush3.bf16.msra.mxu0 %v1464_v8  ;;  %1456 = vmatpush3.bf16.msra.mxu1 %v1464_v8  ;;  %v103_v8 = vpack.c.bf16 %v65_v3, %v64_v2 }
  0x18   :  { %1375 = vmatprep.subr.bf16.mxu0 %v1465_v11  ;;  %1449 = vmatprep.subr.bf16.mxu1 %v1465_v11 }
  0x1b   :  { %1376 = vmatpush3.bf16.msra.mxu0 %v1465_v11  ;;  %1457 = vmatpush3.bf16.msra.mxu1 %v1465_v11  ;;  %v37_v11 = vld [vmem:[%s1995_s0 + $0xb8] sm:$0xff] }
  0x1c   :  { %1377 = vmatprep.subr.bf16.mxu0 %v1466_v13  ;;  %1450 = vmatprep.subr.bf16.mxu1 %v1466_v13  ;;  %v89_v18 = vpack.c.bf16 %v37_v11, %v36_v10 }
  0x1f   :  { %1378 = vmatpush3.bf16.msra.mxu0 %v1466_v13  ;;  %1458 = vmatpush3.bf16.msra.mxu1 %v1466_v13  ;;  %v39_v13 = vld [vmem:[%s1995_s0 + $0xc8] sm:$0xff] }
  0x20   :  { %v90_v19 = vpack.c.bf16 %v39_v13, %v38_v12 }
  0x22   :  { %1380 = vmatmul.mubr.bf16.vlgmr.msra.gmra.mrb[0].mxu0 %v79_v22  ;;  %1412 = vmatmul.mubr.bf16.vlgmr.msra.gmra.mrb[0].mxu1 %v95_v24  ;;  %v40_v22 = vld [vmem:[%s1995_s0 + $0xd0] sm:$0xff]  ;;  %v42_v24 = vld [vmem:[%s1995_s0 + $0xe0] sm:$0xff] }
  0x23   :  { %1383 = vmatprep.mubr.bf16.mxu0 %v80_v23  ;;  %1415 = vmatprep.mubr.bf16.mxu1 %v96_v25  ;;  %v41_v23 = vld [vmem:[%s1995_s0 + $0xd8] sm:$0xff]  ;;  %v43_v25 = vld [vmem:[%s1995_s0 + $0xe8] sm:$0xff] }
  0x24   :  { %v91_v30 = vpack.c.bf16 %v41_v23, %v40_v22  ;;  %v92_v31 = vpack.c.bf16 %v43_v25, %v42_v24 }
  0x2a   :  { %1384 = vmatmul.mubr.bf16.gmra.mrb[4].mxu0 %v81_v34  ;;  %1416 = vmatmul.mubr.bf16.gmra.mrb[4].mxu1 %v97_v36  ;;  %v44_v34 = vld [vmem:[%s1995_s0 + $0xf0] sm:$0xff] }
  0x2b   :  { %1387 = vmatprep.mubr.bf16.mxu0 %v82_v35  ;;  %1419 = vmatprep.mubr.bf16.mxu1 %v98_v37  ;;  %v45_v35 = vld [vmem:[%s1995_s0 + $0xf8] sm:$0xff]  ;;  %v76_v36 = vld [vmem:[%s1995_s0 + $0x1f0] sm:$0xff] }
  0x2c   :  { %v77_v37 = vld [vmem:[%s1995_s0 + $0x1f8] sm:$0xff]  ;;  %v93_v38 = vpack.c.bf16 %v45_v35, %v44_v34 }
  0x2d   :  { %v109_v39 = vpack.c.bf16 %v77_v37, %v76_v36 }
  0x32   :  { %1388 = vmatmul.mubr.bf16.gmra.mrb[8].mxu0 %v83_v46  ;;  %1420 = vmatmul.mubr.bf16.gmra.mrb[8].mxu1 %v99_v48 }
  0x33   :  { %1391 = vmatprep.mubr.bf16.mxu0 %v84_v47  ;;  %1423 = vmatprep.mubr.bf16.mxu1 %v100_v49 }
  0x3a   :  { %1392 = vmatmul.mubr.bf16.gmra.mrb[12].mxu0 %v85_v58  ;;  %1424 = vmatmul.mubr.bf16.gmra.mrb[12].mxu1 %v101_v60 }
  0x3b   :  { %1395 = vmatprep.mubr.bf16.mxu0 %v86_v59  ;;  %1427 = vmatprep.mubr.bf16.mxu1 %v102_v61 }
  0x42   :  { %1396 = vmatmul.mubr.bf16.gmra.mrb[16].mxu0 %v87_v6  ;;  %1428 = vmatmul.mubr.bf16.gmra.mrb[16].mxu1 %v103_v8 }
  0x43   :  { %1399 = vmatprep.mubr.bf16.mxu0 %v88_v7  ;;  %1431 = vmatprep.mubr.bf16.mxu1 %v104_v9 }
  0x4a   :  { %1400 = vmatmul.mubr.bf16.gmra.mrb[20].mxu0 %v89_v18  ;;  %1432 = vmatmul.mubr.bf16.gmra.mrb[20].mxu1 %v105_v20 }
  0x4b   :  { %1403 = vmatprep.mubr.bf16.mxu0 %v90_v19  ;;  %1435 = vmatprep.mubr.bf16.mxu1 %v106_v21 }
  0x52   :  { %1404 = vmatmul.mubr.bf16.gmra.mrb[24].mxu0 %v91_v30  ;;  %1436 = vmatmul.mubr.bf16.gmra.mrb[24].mxu1 %v107_v32 }
  0x53   :  { %1407 = vmatprep.mubr.bf16.mxu0 %v92_v31  ;;  %1439 = vmatprep.mubr.bf16.mxu1 %v108_v33 }
  0x5a   :  { %1408 = vmatmul.mubr.bf16.gmra.mrb[28].mxu0 %v93_v38  ;;  %1440 = vmatmul.mubr.bf16.gmra.mrb[28].mxu1 %v109_v39 }
  0xf5   :  { %v1381_v40 = vpop.f32.mrb[0].mxu0  ;;  %v1703_v42 = vpop.f32.mrb[0].mxu1 }
  0xf6   :  { %v208_v41 = vpop.f32.mrb[1].mxu0  ;;  %v1705_v44 = vpop.f32.mrb[1].mxu1  ;;  %v854_v55 = vmul.f32 %v1381_v40, %v1381_v40 }
  0xf7   :  { %v1382_v43 = vpop.f32.mrb[2].mxu0  ;;  %v852_v45 = vmul.f32 %v208_v41, %v208_v41  ;;  %v1707_v48 = vpop.f32.mrb[2].mxu1 }
  0xf8   :  { %v1140_v46 = vpack.c.bf16 %v1382_v43, %v1381_v40  ;;  %v211_v47 = vpop.f32.mrb[3].mxu0  ;;  %v1220_v52 = vpack.c.bf16 %v1707_v48, %v1703_v42  ;;  %v1711_v53 = vpop.f32.mrb[3].mxu1  ;;  %v855_v58 = vmul.f32 %v1382_v43, %v1382_v43 }
  0xf9   :  { %v1135_v49 = vpack.c.bf16 %v211_v47, %v208_v41  ;;  %v783_v50 = vadd.f32 %v211_v47, %v208_v41  ;;  %v853_v51 = vmul.f32 %v211_v47, %v211_v47  ;;  %v1215_v54 = vpack.c.bf16 %v1711_v53, %v1705_v44 }
  0xfa   :  { %1292 = vst [vmem:[%s1996_s2 + $0x8] sm:$0xff] %v1140_v46   ;;  %1308 = vst [vmem:[%s1996_s2 + $0x88] sm:$0xff] %v1220_v52  }
  0xfb   :  { %1136 = vst [vmem:[%s1996_s2] sm:$0xff] %v1135_v49   ;;  %v784_v56 = vadd.f32 %v1381_v40, %v783_v50  ;;  %v916_v57 = vadd.f32 %v853_v51, %v852_v45  ;;  %1307 = vst [vmem:[%s1996_s2 + $0x80] sm:$0xff] %v1215_v54  }
  0xfd   :  { %v917_v59 = vadd.f32 %v916_v57, %v854_v55  ;;  %v1385_v60 = vpop.f32.mrb[4].mxu0  ;;  %v785_v61 = vadd.f32 %v1382_v43, %v784_v56  ;;  %v1727_v63 = vpop.f32.mrb[4].mxu1 }
  0xfe   :  { %v224_v62 = vpop.f32.mrb[5].mxu0  ;;  %v1729_v4 = vpop.f32.mrb[5].mxu1  ;;  %v858_v15 = vmul.f32 %v1385_v60, %v1385_v60 }
  0xff   :  { %v786_v0 = vadd.f32 %v785_v61, %v224_v62  ;;  %v856_v1 = vmul.f32 %v224_v62, %v224_v62  ;;  %v918_v2 = vadd.f32 %v917_v59, %v855_v58  ;;  %v1386_v3 = vpop.f32.mrb[6].mxu0  ;;  %v1731_v7 = vpop.f32.mrb[6].mxu1 }
 0x100   :  { %v1150_v5 = vpack.c.bf16 %v1386_v3, %v1385_v60  ;;  %v227_v6 = vpop.f32.mrb[7].mxu0  ;;  %v1733_v12 = vpop.f32.mrb[7].mxu1  ;;  %v1230_v13 = vpack.c.bf16 %v1731_v7, %v1727_v63  ;;  %v859_v18 = vmul.f32 %v1386_v3, %v1386_v3 }
 0x101   :  { %v919_v8 = vadd.f32 %v918_v2, %v856_v1  ;;  %v1145_v9 = vpack.c.bf16 %v227_v6, %v224_v62  ;;  %v787_v10 = vadd.f32 %v786_v0, %v227_v6  ;;  %v857_v11 = vmul.f32 %v227_v6, %v227_v6 }
 0x102   :  { %1294 = vst [vmem:[%s1996_s2 + $0x18] sm:$0xff] %v1150_v5   ;;  %v1225_v14 = vpack.c.bf16 %v1733_v12, %v1729_v4  ;;  %1310 = vst [vmem:[%s1996_s2 + $0x98] sm:$0xff] %v1230_v13  }
 0x103   :  { %1293 = vst [vmem:[%s1996_s2 + $0x10] sm:$0xff] %v1145_v9   ;;  %v788_v16 = vadd.f32 %v1385_v60, %v787_v10  ;;  %v920_v17 = vadd.f32 %v919_v8, %v857_v11 }
 0x104   :  { %1309 = vst [vmem:[%s1996_s2 + $0x90] sm:$0xff] %v1225_v14  }
 0x105   :  { %v921_v19 = vadd.f32 %v920_v17, %v858_v15  ;;  %v1389_v20 = vpop.f32.mrb[8].mxu0  ;;  %v789_v21 = vadd.f32 %v1386_v3, %v788_v16  ;;  %v1751_v23 = vpop.f32.mrb[8].mxu1 }
 0x106   :  { %v240_v22 = vpop.f32.mrb[9].mxu0  ;;  %v1753_v28 = vpop.f32.mrb[9].mxu1  ;;  %v862_v39 = vmul.f32 %v1389_v20, %v1389_v20 }
 0x107   :  { %v790_v24 = vadd.f32 %v789_v21, %v240_v22  ;;  %v860_v25 = vmul.f32 %v240_v22, %v240_v22  ;;  %v922_v26 = vadd.f32 %v921_v19, %v859_v18  ;;  %v1390_v27 = vpop.f32.mrb[10].mxu0  ;;  %v1755_v31 = vpop.f32.mrb[10].mxu1 }
 0x108   :  { %v1160_v29 = vpack.c.bf16 %v1390_v27, %v1389_v20  ;;  %v243_v30 = vpop.f32.mrb[11].mxu0  ;;  %v1757_v36 = vpop.f32.mrb[11].mxu1  ;;  %v1240_v37 = vpack.c.bf16 %v1755_v31, %v1751_v23  ;;  %v863_v43 = vmul.f32 %v1390_v27, %v1390_v27 }
 0x109   :  { %v923_v32 = vadd.f32 %v922_v26, %v860_v25  ;;  %v1155_v33 = vpack.c.bf16 %v243_v30, %v240_v22  ;;  %v791_v34 = vadd.f32 %v790_v24, %v243_v30  ;;  %v861_v35 = vmul.f32 %v243_v30, %v243_v30 }
 0x10a   :  { %1296 = vst [vmem:[%s1996_s2 + $0x28] sm:$0xff] %v1160_v29   ;;  %v1235_v38 = vpack.c.bf16 %v1757_v36, %v1753_v28  ;;  %1312 = vst [vmem:[%s1996_s2 + $0xa8] sm:$0xff] %v1240_v37  }
 0x10b   :  { %1295 = vst [vmem:[%s1996_s2 + $0x20] sm:$0xff] %v1155_v33   ;;  %v792_v40 = vadd.f32 %v1389_v20, %v791_v34  ;;  %v924_v41 = vadd.f32 %v923_v32, %v861_v35 }
 0x10c   :  { %1311 = vst [vmem:[%s1996_s2 + $0xa0] sm:$0xff] %v1235_v38  }
 0x10d   :  { %v925_v45 = vadd.f32 %v924_v41, %v862_v39  ;;  %v1393_v46 = vpop.f32.mrb[12].mxu0  ;;  %v793_v47 = vadd.f32 %v1390_v27, %v792_v40  ;;  %v1775_v50 = vpop.f32.mrb[12].mxu1 }
 0x10e   :  { %v256_v49 = vpop.f32.mrb[13].mxu0  ;;  %v1777_v56 = vpop.f32.mrb[13].mxu1  ;;  %v866_v5 = vmul.f32 %v1393_v46, %v1393_v46 }
 0x10f   :  { %v794_v51 = vadd.f32 %v793_v47, %v256_v49  ;;  %v864_v52 = vmul.f32 %v256_v49, %v256_v49  ;;  %v926_v54 = vadd.f32 %v925_v45, %v863_v43  ;;  %v1394_v55 = vpop.f32.mrb[14].mxu0  ;;  %v1779_v59 = vpop.f32.mrb[14].mxu1 }
 0x110   :  { %v1170_v57 = vpack.c.bf16 %v1394_v55, %v1393_v46  ;;  %v259_v58 = vpop.f32.mrb[15].mxu0  ;;  %v1781_v1 = vpop.f32.mrb[15].mxu1  ;;  %v1250_v2 = vpack.c.bf16 %v1779_v59, %v1775_v50  ;;  %v867_v9 = vmul.f32 %v1394_v55, %v1394_v55 }
 0x111   :  { %v927_v60 = vadd.f32 %v926_v54, %v864_v52  ;;  %v1165_v61 = vpack.c.bf16 %v259_v58, %v256_v49  ;;  %v795_v62 = vadd.f32 %v794_v51, %v259_v58  ;;  %v865_v0 = vmul.f32 %v259_v58, %v259_v58 }
 0x112   :  { %1298 = vst [vmem:[%s1996_s2 + $0x38] sm:$0xff] %v1170_v57   ;;  %v1245_v3 = vpack.c.bf16 %v1781_v1, %v1777_v56  ;;  %1314 = vst [vmem:[%s1996_s2 + $0xb8] sm:$0xff] %v1250_v2  }
 0x113   :  { %1297 = vst [vmem:[%s1996_s2 + $0x30] sm:$0xff] %v1165_v61   ;;  %v796_v6 = vadd.f32 %v1393_v46, %v795_v62  ;;  %v928_v8 = vadd.f32 %v927_v60, %v865_v0 }
 0x114   :  { %1313 = vst [vmem:[%s1996_s2 + $0xb0] sm:$0xff] %v1245_v3  }
 0x115   :  { %v929_v10 = vadd.f32 %v928_v8, %v866_v5  ;;  %v1397_v11 = vpop.f32.mrb[16].mxu0  ;;  %v797_v13 = vadd.f32 %v1394_v55, %v796_v6  ;;  %v1799_v15 = vpop.f32.mrb[16].mxu1 }
 0x116   :  { %v272_v14 = vpop.f32.mrb[17].mxu0  ;;  %v1801_v20 = vpop.f32.mrb[17].mxu1  ;;  %v870_v34 = vmul.f32 %v1397_v11, %v1397_v11 }
 0x117   :  { %v798_v16 = vadd.f32 %v797_v13, %v272_v14  ;;  %v868_v17 = vmul.f32 %v272_v14, %v272_v14  ;;  %v930_v18 = vadd.f32 %v929_v10, %v867_v9  ;;  %v1398_v19 = vpop.f32.mrb[18].mxu0  ;;  %v1803_v24 = vpop.f32.mrb[18].mxu1 }
 0x118   :  { %v1180_v21 = vpack.c.bf16 %v1398_v19, %v1397_v11  ;;  %v275_v22 = vpop.f32.mrb[19].mxu0  ;;  %v1805_v30 = vpop.f32.mrb[19].mxu1  ;;  %v1260_v32 = vpack.c.bf16 %v1803_v24, %v1799_v15  ;;  %v871_v38 = vmul.f32 %v1398_v19, %v1398_v19 }
 0x119   :  { %v931_v25 = vadd.f32 %v930_v18, %v868_v17  ;;  %v1175_v26 = vpack.c.bf16 %v275_v22, %v272_v14  ;;  %v799_v27 = vadd.f32 %v798_v16, %v275_v22  ;;  %v869_v29 = vmul.f32 %v275_v22, %v275_v22 }
 0x11a   :  { %1300 = vst [vmem:[%s1996_s2 + $0x48] sm:$0xff] %v1180_v21   ;;  %v1255_v33 = vpack.c.bf16 %v1805_v30, %v1801_v20  ;;  %1316 = vst [vmem:[%s1996_s2 + $0xc8] sm:$0xff] %v1260_v32  }
 0x11b   :  { %1299 = vst [vmem:[%s1996_s2 + $0x40] sm:$0xff] %v1175_v26   ;;  %v800_v35 = vadd.f32 %v1397_v11, %v799_v27  ;;  %v932_v37 = vadd.f32 %v931_v25, %v869_v29 }
 0x11c   :  { %1315 = vst [vmem:[%s1996_s2 + $0xc0] sm:$0xff] %v1255_v33  }
 0x11d   :  { %v933_v39 = vadd.f32 %v932_v37, %v870_v34  ;;  %v1401_v40 = vpop.f32.mrb[20].mxu0  ;;  %v801_v41 = vadd.f32 %v1398_v19, %v800_v35  ;;  %v1823_v45 = vpop.f32.mrb[20].mxu1 }
 0x11e   :  { %v288_v43 = vpop.f32.mrb[21].mxu0  ;;  %v1825_v52 = vpop.f32.mrb[21].mxu1  ;;  %v874_v5 = vmul.f32 %v1401_v40, %v1401_v40 }
 0x11f   :  { %v802_v46 = vadd.f32 %v801_v41, %v288_v43  ;;  %v872_v47 = vmul.f32 %v288_v43, %v288_v43  ;;  %v934_v49 = vadd.f32 %v933_v39, %v871_v38  ;;  %v1402_v51 = vpop.f32.mrb[22].mxu0  ;;  %v1827_v57 = vpop.f32.mrb[22].mxu1 }
 0x120   :  { %v1190_v54 = vpack.c.bf16 %v1402_v51, %v1401_v40  ;;  %v291_v55 = vpop.f32.mrb[23].mxu0  ;;  %v1829_v0 = vpop.f32.mrb[23].mxu1  ;;  %v1270_v2 = vpack.c.bf16 %v1827_v57, %v1823_v45  ;;  %v875_v9 = vmul.f32 %v1402_v51, %v1402_v51 }
 0x121   :  { %v935_v58 = vadd.f32 %v934_v49, %v872_v47  ;;  %v1185_v60 = vpack.c.bf16 %v291_v55, %v288_v43  ;;  %v803_v61 = vadd.f32 %v802_v46, %v291_v55  ;;  %v873_v62 = vmul.f32 %v291_v55, %v291_v55 }
 0x122   :  { %1302 = vst [vmem:[%s1996_s2 + $0x58] sm:$0xff] %v1190_v54   ;;  %v1265_v3 = vpack.c.bf16 %v1829_v0, %v1825_v52  ;;  %1318 = vst [vmem:[%s1996_s2 + $0xd8] sm:$0xff] %v1270_v2  }
 0x123   :  { %1301 = vst [vmem:[%s1996_s2 + $0x50] sm:$0xff] %v1185_v60   ;;  %v804_v6 = vadd.f32 %v1401_v40, %v803_v61  ;;  %v936_v8 = vadd.f32 %v935_v58, %v873_v62 }
 0x124   :  { %1317 = vst [vmem:[%s1996_s2 + $0xd0] sm:$0xff] %v1265_v3  }
 0x125   :  { %v937_v10 = vadd.f32 %v936_v8, %v874_v5  ;;  %v1405_v11 = vpop.f32.mrb[24].mxu0  ;;  %v805_v13 = vadd.f32 %v1402_v51, %v804_v6  ;;  %v1847_v16 = vpop.f32.mrb[24].mxu1 }
 0x126   :  { %v304_v14 = vpop.f32.mrb[25].mxu0  ;;  %v1849_v22 = vpop.f32.mrb[25].mxu1  ;;  %v878_v39 = vmul.f32 %v1405_v11, %v1405_v11 }
 0x127   :  { %v806_v17 = vadd.f32 %v805_v13, %v304_v14  ;;  %v876_v18 = vmul.f32 %v304_v14, %v304_v14  ;;  %v938_v19 = vadd.f32 %v937_v10, %v875_v9  ;;  %v1406_v21 = vpop.f32.mrb[26].mxu0  ;;  %v1851_v27 = vpop.f32.mrb[26].mxu1 }
 0x128   :  { %v1200_v25 = vpack.c.bf16 %v1406_v21, %v1405_v11  ;;  %v307_v26 = vpop.f32.mrb[27].mxu0  ;;  %v1853_v35 = vpop.f32.mrb[27].mxu1  ;;  %v1280_v37 = vpack.c.bf16 %v1851_v27, %v1847_v16  ;;  %v879_v43 = vmul.f32 %v1406_v21, %v1406_v21 }
 0x129   :  { %v939_v29 = vadd.f32 %v938_v19, %v876_v18  ;;  %v1195_v32 = vpack.c.bf16 %v307_v26, %v304_v14  ;;  %v807_v33 = vadd.f32 %v806_v17, %v307_v26  ;;  %v877_v34 = vmul.f32 %v307_v26, %v307_v26 }
 0x12a   :  { %1304 = vst [vmem:[%s1996_s2 + $0x68] sm:$0xff] %v1200_v25   ;;  %v1275_v38 = vpack.c.bf16 %v1853_v35, %v1849_v22  ;;  %1320 = vst [vmem:[%s1996_s2 + $0xe8] sm:$0xff] %v1280_v37  }
 0x12b   :  { %1303 = vst [vmem:[%s1996_s2 + $0x60] sm:$0xff] %v1195_v32   ;;  %v808_v40 = vadd.f32 %v1405_v11, %v807_v33  ;;  %v940_v41 = vadd.f32 %v939_v29, %v877_v34  ;;  %v884_v29 = vmul.f32 %v1705_v44, %v1705_v44 }
 0x12c   :  { %1319 = vst [vmem:[%s1996_s2 + $0xe0] sm:$0xff] %v1275_v38   ;;  %v885_v38 = vmul.f32 %v1711_v53, %v1711_v53 }
 0x12d   :  { %v941_v46 = vadd.f32 %v940_v41, %v878_v39  ;;  %v1409_v47 = vpop.f32.mrb[28].mxu0  ;;  %v809_v49 = vadd.f32 %v1406_v21, %v808_v40  ;;  %v1871_v54 = vpop.f32.mrb[28].mxu1  ;;  %v886_v39 = vmul.f32 %v1703_v42, %v1703_v42 }
 0x12e   :  { %v320_v51 = vpop.f32.mrb[29].mxu0  ;;  %v1873_v62 = vpop.f32.mrb[29].mxu1  ;;  %v882_v17 = vmul.f32 %v1409_v47, %v1409_v47 }
 0x12f   :  { %v810_v55 = vadd.f32 %v809_v49, %v320_v51  ;;  %v880_v58 = vmul.f32 %v320_v51, %v320_v51  ;;  %v942_v60 = vadd.f32 %v941_v46, %v879_v43  ;;  %v1410_v61 = vpop.f32.mrb[30].mxu0  ;;  %v1875_v5 = vpop.f32.mrb[30].mxu1  ;;  %v887_v43 = vmul.f32 %v1707_v48, %v1707_v48 }
 0x130   :  { %v1210_v2 = vpack.c.bf16 %v1410_v61, %v1409_v47  ;;  %v323_v3 = vpop.f32.mrb[31].mxu0  ;;  %v1877_v11 = vpop.f32.mrb[31].mxu1  ;;  %v1290_v13 = vpack.c.bf16 %v1875_v5, %v1871_v54  ;;  %v883_v21 = vmul.f32 %v1410_v61, %v1410_v61 }
 0x131   :  { %v943_v6 = vadd.f32 %v942_v60, %v880_v58  ;;  %v1205_v8 = vpack.c.bf16 %v323_v3, %v320_v51  ;;  %v811_v9 = vadd.f32 %v810_v55, %v323_v3  ;;  %v881_v10 = vmul.f32 %v323_v3, %v323_v3 }
 0x132   :  { %1306 = vst [vmem:[%s1996_s2 + $0x78] sm:$0xff] %v1210_v2   ;;  %v1285_v14 = vpack.c.bf16 %v1877_v11, %v1873_v62  ;;  %1322 = vst [vmem:[%s1996_s2 + $0xf8] sm:$0xff] %v1290_v13   ;;  %v889_v58 = vmul.f32 %v1733_v12, %v1733_v12 }
 0x133   :  { %1305 = vst [vmem:[%s1996_s2 + $0x70] sm:$0xff] %v1205_v8   ;;  %v812_v18 = vadd.f32 %v1409_v47, %v811_v9  ;;  %v944_v19 = vadd.f32 %v943_v6, %v881_v10  ;;  %v893_v10 = vmul.f32 %v1757_v36, %v1757_v36 }
 0x134   :  { %1321 = vst [vmem:[%s1996_s2 + $0xf0] sm:$0xff] %v1285_v14  }
 0x135   :  { %v945_v25 = vadd.f32 %v944_v19, %v882_v17  ;;  %v813_v26 = vadd.f32 %v1410_v61, %v812_v18 }
 0x137   :  { %v814_v32 = vadd.f32 %v813_v26, %v1705_v44  ;;  %v946_v33 = vadd.f32 %v945_v25, %v883_v21  ;;  %v888_v44 = vmul.f32 %v1729_v4, %v1729_v4  ;;  %v897_v26 = vmul.f32 %v1781_v1, %v1781_v1 }
 0x139   :  { %v947_v34 = vadd.f32 %v946_v33, %v884_v29  ;;  %v815_v37 = vadd.f32 %v814_v32, %v1711_v53 }
 0x13b   :  { %v816_v40 = vadd.f32 %v1703_v42, %v815_v37  ;;  %v948_v41 = vadd.f32 %v947_v34, %v885_v38  ;;  %v890_v42 = vmul.f32 %v1727_v63, %v1727_v63 }
 0x13d   :  { %v949_v46 = vadd.f32 %v948_v41, %v886_v39  ;;  %v817_v47 = vadd.f32 %v1707_v48, %v816_v40  ;;  %v891_v48 = vmul.f32 %v1731_v7, %v1731_v7  ;;  %v901_v40 = vmul.f32 %v1805_v30, %v1805_v30 }
 0x13f   :  { %v818_v49 = vadd.f32 %v817_v47, %v1729_v4  ;;  %v950_v51 = vadd.f32 %v949_v46, %v887_v43  ;;  %v892_v4 = vmul.f32 %v1753_v28, %v1753_v28 }
 0x141   :  { %v951_v55 = vadd.f32 %v950_v51, %v888_v44  ;;  %v819_v53 = vadd.f32 %v818_v49, %v1733_v12 }
 0x143   :  { %v820_v60 = vadd.f32 %v1727_v63, %v819_v53  ;;  %v952_v61 = vadd.f32 %v951_v55, %v889_v58  ;;  %v894_v63 = vmul.f32 %v1751_v23, %v1751_v23  ;;  %v905_v55 = vmul.f32 %v1829_v0, %v1829_v0 }
 0x145   :  { %v953_v2 = vadd.f32 %v952_v61, %v890_v42  ;;  %v821_v3 = vadd.f32 %v1731_v7, %v820_v60  ;;  %v895_v7 = vmul.f32 %v1755_v31, %v1755_v31 }
 0x147   :  { %v822_v6 = vadd.f32 %v821_v3, %v1753_v28  ;;  %v954_v8 = vadd.f32 %v953_v2, %v891_v48  ;;  %v896_v28 = vmul.f32 %v1777_v56, %v1777_v56  ;;  %v909_v3 = vmul.f32 %v1853_v35, %v1853_v35 }
 0x149   :  { %v955_v9 = vadd.f32 %v954_v8, %v892_v4  ;;  %v823_v12 = vadd.f32 %v822_v6, %v1757_v36 }
 0x14b   :  { %v824_v13 = vadd.f32 %v1751_v23, %v823_v12  ;;  %v956_v14 = vadd.f32 %v955_v9, %v893_v10  ;;  %v898_v23 = vmul.f32 %v1775_v50, %v1775_v50 }
 0x14d   :  { %v957_v17 = vadd.f32 %v956_v14, %v894_v63  ;;  %v825_v18 = vadd.f32 %v1755_v31, %v824_v13  ;;  %v899_v31 = vmul.f32 %v1779_v59, %v1779_v59  ;;  %v913_v13 = vmul.f32 %v1877_v11, %v1877_v11 }
 0x14f   :  { %v826_v19 = vadd.f32 %v825_v18, %v1777_v56  ;;  %v958_v21 = vadd.f32 %v957_v17, %v895_v7  ;;  %v900_v56 = vmul.f32 %v1801_v20, %v1801_v20 }
 0x151   :  { %v959_v25 = vadd.f32 %v958_v21, %v896_v28  ;;  %v827_v36 = vadd.f32 %v826_v19, %v1781_v1 }
 0x153   :  { %v828_v29 = vadd.f32 %v1775_v50, %v827_v36  ;;  %v960_v32 = vadd.f32 %v959_v25, %v897_v26  ;;  %v902_v50 = vmul.f32 %v1799_v15, %v1799_v15 }
 0x155   :  { %v961_v33 = vadd.f32 %v960_v32, %v898_v23  ;;  %v829_v34 = vadd.f32 %v1779_v59, %v828_v29  ;;  %v903_v59 = vmul.f32 %v1803_v24, %v1803_v24 }
 0x157   :  { %v830_v37 = vadd.f32 %v829_v34, %v1801_v20  ;;  %v962_v38 = vadd.f32 %v961_v33, %v899_v31  ;;  %v904_v20 = vmul.f32 %v1825_v52, %v1825_v52 }
 0x159   :  { %v963_v39 = vadd.f32 %v962_v38, %v900_v56  ;;  %v831_v1 = vadd.f32 %v830_v37, %v1805_v30 }
 0x15b   :  { %v832_v41 = vadd.f32 %v1799_v15, %v831_v1  ;;  %v964_v43 = vadd.f32 %v963_v39, %v901_v40  ;;  %v906_v15 = vmul.f32 %v1823_v45, %v1823_v45 }
 0x15d   :  { %v965_v46 = vadd.f32 %v964_v43, %v902_v50  ;;  %v833_v47 = vadd.f32 %v1803_v24, %v832_v41  ;;  %v907_v24 = vmul.f32 %v1827_v57, %v1827_v57 }
 0x15f   :  { %v834_v44 = vadd.f32 %v833_v47, %v1825_v52  ;;  %v966_v49 = vadd.f32 %v965_v46, %v903_v59  ;;  %v908_v52 = vmul.f32 %v1849_v22, %v1849_v22 }
 0x161   :  { %v967_v51 = vadd.f32 %v966_v49, %v904_v20  ;;  %v835_v30 = vadd.f32 %v834_v44, %v1829_v0 }
 0x163   :  { %v836_v53 = vadd.f32 %v1823_v45, %v835_v30  ;;  %v968_v58 = vadd.f32 %v967_v51, %v905_v55  ;;  %v910_v45 = vmul.f32 %v1847_v16, %v1847_v16 }
 0x165   :  { %v969_v42 = vadd.f32 %v968_v58, %v906_v15  ;;  %v837_v60 = vadd.f32 %v1827_v57, %v836_v53  ;;  %v911_v57 = vmul.f32 %v1851_v27, %v1851_v27 }
 0x167   :  { %v838_v61 = vadd.f32 %v837_v60, %v1849_v22  ;;  %v970_v48 = vadd.f32 %v969_v42, %v907_v24  ;;  %v912_v22 = vmul.f32 %v1873_v62, %v1873_v62 }
 0x169   :  { %v971_v2 = vadd.f32 %v970_v48, %v908_v52  ;;  %v839_v0 = vadd.f32 %v838_v61, %v1853_v35 }
 0x16b   :  { %v840_v4 = vadd.f32 %v1847_v16, %v839_v0  ;;  %v972_v6 = vadd.f32 %v971_v2, %v909_v3  ;;  %v914_v16 = vmul.f32 %v1871_v54, %v1871_v54 }
 0x16d   :  { %v973_v8 = vadd.f32 %v972_v6, %v910_v45  ;;  %v841_v9 = vadd.f32 %v1851_v27, %v840_v4  ;;  %v915_v27 = vmul.f32 %v1875_v5, %v1875_v5 }
 0x16f   :  { %v842_v12 = vadd.f32 %v841_v9, %v1873_v62  ;;  %v974_v10 = vadd.f32 %v973_v8, %v911_v57 }
 0x171   :  { %v975_v63 = vadd.f32 %v974_v10, %v912_v22  ;;  %v843_v35 = vadd.f32 %v842_v12, %v1877_v11 }
 0x173   :  { %v844_v14 = vadd.f32 %v1871_v54, %v843_v35  ;;  %v976_v7 = vadd.f32 %v975_v63, %v913_v13 }
 0x175   :  { %v845_v17 = vadd.f32 %v1875_v5, %v844_v14  ;;  %v977_v18 = vadd.f32 %v976_v7, %v914_v16 }
 0x177   :  { %v846_v62 = vrot.slane %v845_v17, 4  ;;  %v978_v28 = vadd.f32 %v977_v18, %v915_v27 }
 0x179   :  { %v847_v19 = vadd.f32 %v846_v62, %v845_v17  ;;  %v979_v21 = vrot.slane %v978_v28, 4 }
 0x17b   :  { %v848_v25 = vrot.slane %v847_v19, 2  ;;  %v980_v36 = vadd.f32 %v979_v21, %v978_v28 }
 0x17d   :  { %v849_v26 = vadd.f32 %v848_v25, %v847_v19  ;;  %v981_v11 = vrot.slane %v980_v36, 2 }
 0x17f   :  { %v850_v23 = vrot.slane %v849_v26, 1  ;;  %v982_v29 = vadd.f32 %v981_v11, %v980_v36 }
 0x181   :  { %v983_v32 = vrot.slane %v982_v29, 1  ;;  %v851_v54 = vadd.f32 %v850_v23, %v849_v26 }
 0x183   :  { %v984_v31 = vadd.f32 %v983_v32, %v982_v29 }
 0x185   :  { %v986_v33 = vsel %vm985_vm0, %v851_v54, %v984_v31 }
 0x186   :  { %987 = vst [vmem:[%s1997_s3] sm:$0x3] %v986_v33 }

// kernel: bottleneck_forward_pallas.7
= control target key start
LH: loop header
LB: loop body
LE: loop exit
PB: predicated region body
PF: predicated region fallthrough
CT: control target
= control target key end

     0   :  { %vm421_vm0 = vcmask 1040384   ;;  %s779_s3 = inlined_call_operand.vmem [shape: bf16[128,128], index: 3, kind: input, shape index: {}]   ;;  %s780_s0 = inlined_call_operand.vmem [shape: bf16[128,128], index: 0, kind: input, shape index: {}]   ;;  %s781_s1 = inlined_call_operand.vmem [shape: f32[1,128], index: 1, kind: input, shape index: {}]   ;;  %s782_s2 = inlined_call_operand.vmem [shape: f32[1,128], index: 2, kind: input, shape index: {}]   ;;  %s783_s4 = inlined_call_operand.vmem [shape: bf16[128,128], index: 4, kind: output, shape index: {0}]   ;;  %s784_s5 = inlined_call_operand.vmem [shape: f32[1,2,128], index: 5, kind: output, shape index: {1}]  }
   0x1   :  { %v624_v0 = vld [vmem:[%s779_s3] sm:$0xff]   ;;  %v625_v1 = vld [vmem:[%s779_s3 + $0x8] sm:$0xff]   ;;  %v626_v2 = vld [vmem:[%s779_s3 + $0x10] sm:$0xff]  }
   0x2   :  { %576 = vmatprep.subr.bf16.mxu0 %v624_v0  ;;  %608 = vmatprep.subr.bf16.mxu1 %v624_v0  ;;  %v627_v3 = vld [vmem:[%s779_s3 + $0x18] sm:$0xff]   ;;  %v475_v4 = vld [vmem:[%s780_s0] sm:$0xff]   ;;  %v546_v8 = vld [vmem:[%s780_s0 + $0x8] sm:$0xff]  }
   0x3   :  { %577 = vmatpush3.bf16.msra.mxu0 %v624_v0  ;;  %616 = vmatpush3.bf16.msra.mxu1 %v624_v0  ;;  %v680_v5 = vld [vmem:[%s781_s1] ss:$0 sm:$0xff]  ;;  %v476_v6 = vunpack.c.l.bf16 %v475_v4  ;;  %v477_v7 = vunpack.c.h.bf16 %v475_v4  ;;  %v547_v9 = vld [vmem:[%s780_s0 + $0x10] sm:$0xff]   ;;  %v480_v11 = vunpack.c.l.bf16 %v546_v8  ;;  %v481_v14 = vunpack.c.h.bf16 %v546_v8  ;;  %v548_v22 = vld [vmem:[%s780_s0 + $0x18] sm:$0xff]  }
   0x4   :  { %578 = vmatprep.subr.bf16.mxu0 %v625_v1  ;;  %609 = vmatprep.subr.bf16.mxu1 %v625_v1  ;;  %v691_v10 = vld [vmem:[%s782_s2] ss:$0 sm:$0xff]  ;;  %v484_v17 = vunpack.c.l.bf16 %v547_v9  ;;  %v485_v21 = vunpack.c.h.bf16 %v547_v9  ;;  %v550_v27 = vld [vmem:[%s780_s0 + $0x28] sm:$0xff]   ;;  %v551_v30 = vld [vmem:[%s780_s0 + $0x30] sm:$0xff]   ;;  %v488_v32 = vunpack.c.l.bf16 %v548_v22  ;;  %v489_v33 = vunpack.c.h.bf16 %v548_v22 }
   0x5   :  { %v59_v12 = vmul.f32 %v476_v6, %v680_v5  ;;  %v60_v13 = vmul.f32 %v477_v7, %v680_v5  ;;  %v549_v15 = vld [vmem:[%s780_s0 + $0x20] sm:$0xff]   ;;  %v61_v20 = vmul.f32 %v480_v11, %v680_v5  ;;  %v62_v26 = vmul.f32 %v481_v14, %v680_v5  ;;  %v629_v28 = vld [vmem:[%s779_s3 + $0x28] sm:$0xff]   ;;  %v552_v39 = vld [vmem:[%s780_s0 + $0x38] sm:$0xff]  }
   0x6   :  { %v628_v16 = vld [vmem:[%s779_s3 + $0x20] sm:$0xff]   ;;  %v492_v23 = vunpack.c.l.bf16 %v549_v15  ;;  %v63_v29 = vmul.f32 %v484_v17, %v680_v5  ;;  %v493_v34 = vunpack.c.h.bf16 %v549_v15  ;;  %v64_v36 = vmul.f32 %v485_v21, %v680_v5  ;;  %v630_v44 = vld [vmem:[%s779_s3 + $0x30] sm:$0xff]   ;;  %v631_v61 = vld [vmem:[%s779_s3 + $0x38] sm:$0xff]  }
   0x7   :  { %579 = vmatpush3.bf16.msra.mxu0 %v625_v1  ;;  %617 = vmatpush3.bf16.msra.mxu1 %v625_v1  ;;  %v82_v18 = vadd.f32 %v691_v10, %v59_v12  ;;  %v83_v19 = vadd.f32 %v691_v10, %v60_v13  ;;  %v84_v35 = vadd.f32 %v691_v10, %v61_v20  ;;  %v496_v38 = vunpack.c.l.bf16 %v550_v27 }
   0x8   :  { %580 = vmatprep.subr.bf16.mxu0 %v626_v2  ;;  %610 = vmatprep.subr.bf16.mxu1 %v626_v2  ;;  %v67_v37 = vmul.f32 %v492_v23, %v680_v5  ;;  %v85_v40 = vadd.f32 %v691_v10, %v62_v26  ;;  %v68_v41 = vmul.f32 %v493_v34, %v680_v5  ;;  %v497_v42 = vunpack.c.h.bf16 %v550_v27 }
   0x9   :  { %v98_v24 = vmax.f32 %v82_v18, 0.0  ;;  %v99_v25 = vmax.f32 %v83_v19, 0.0  ;;  %v500_v43 = vunpack.c.l.bf16 %v551_v30  ;;  %v86_v45 = vadd.f32 %v691_v10, %v63_v29 }
   0xa   :  { %v90_v46 = vadd.f32 %v691_v10, %v67_v37  ;;  %v69_v47 = vmul.f32 %v496_v38, %v680_v5  ;;  %v501_v48 = vunpack.c.h.bf16 %v551_v30  ;;  %v91_v49 = vadd.f32 %v691_v10, %v68_v41 }
   0xb   :  { %581 = vmatpush3.bf16.msra.mxu0 %v626_v2  ;;  %618 = vmatpush3.bf16.msra.mxu1 %v626_v2  ;;  %v114_v31 = vpack.c.bf16 %v99_v25, %v98_v24  ;;  %v70_v50 = vmul.f32 %v497_v42, %v680_v5  ;;  %v71_v51 = vmul.f32 %v500_v43, %v680_v5  ;;  %v504_v52 = vunpack.c.l.bf16 %v552_v39 }
   0xc   :  { %582 = vmatprep.subr.bf16.mxu0 %v627_v3  ;;  %611 = vmatprep.subr.bf16.mxu1 %v627_v3  ;;  %v106_v53 = vmax.f32 %v90_v46, 0.0  ;;  %v92_v54 = vadd.f32 %v691_v10, %v69_v47  ;;  %v72_v55 = vmul.f32 %v501_v48, %v680_v5  ;;  %v505_v56 = vunpack.c.h.bf16 %v552_v39 }
   0xd   :  { %592 = vmatprep.mubr.bf16.mxu0 %v114_v31  ;;  %v87_v57 = vadd.f32 %v691_v10, %v64_v36  ;;  %v107_v58 = vmax.f32 %v91_v49, 0.0  ;;  %v93_v59 = vadd.f32 %v691_v10, %v70_v50  ;;  %v94_v60 = vadd.f32 %v691_v10, %v71_v51 }
   0xe   :  { %v65_v62 = vmul.f32 %v488_v32, %v680_v5  ;;  %v95_v63 = vadd.f32 %v691_v10, %v72_v55  ;;  %v100_v0 = vmax.f32 %v84_v35, 0.0  ;;  %v101_v1 = vmax.f32 %v85_v40, 0.0 }
   0xf   :  { %583 = vmatpush3.bf16.msra.mxu0 %v627_v3  ;;  %619 = vmatpush3.bf16.msra.mxu1 %v627_v3  ;;  %v66_v2 = vmul.f32 %v489_v33, %v680_v5  ;;  %v118_v3 = vpack.c.bf16 %v107_v58, %v106_v53  ;;  %v108_v4 = vmax.f32 %v92_v54, 0.0  ;;  %v109_v6 = vmax.f32 %v93_v59, 0.0 }
  0x10   :  { %584 = vmatprep.subr.bf16.mxu0 %v628_v16  ;;  %612 = vmatprep.subr.bf16.mxu1 %v628_v16  ;;  %v73_v7 = vmul.f32 %v504_v52, %v680_v5  ;;  %v74_v8 = vmul.f32 %v505_v56, %v680_v5  ;;  %v102_v9 = vmax.f32 %v86_v45, 0.0  ;;  %v103_v11 = vmax.f32 %v87_v57, 0.0 }
  0x11   :  { %v110_v12 = vmax.f32 %v94_v60, 0.0  ;;  %v111_v13 = vmax.f32 %v95_v63, 0.0  ;;  %v88_v14 = vadd.f32 %v691_v10, %v65_v62  ;;  %v89_v15 = vadd.f32 %v691_v10, %v66_v2  ;;  %600 = vmatprep.mubr.bf16.mxu1 %v118_v3 }
  0x12   :  { %v119_v17 = vpack.c.bf16 %v109_v6, %v108_v4  ;;  %v96_v18 = vadd.f32 %v691_v10, %v73_v7  ;;  %v97_v19 = vadd.f32 %v691_v10, %v74_v8  ;;  %v116_v5 = vpack.c.bf16 %v103_v11, %v102_v9 }
  0x13   :  { %585 = vmatpush3.bf16.msra.mxu0 %v628_v16  ;;  %620 = vmatpush3.bf16.msra.mxu1 %v628_v16  ;;  %v115_v16 = vpack.c.bf16 %v101_v1, %v100_v0  ;;  %v120_v20 = vpack.c.bf16 %v111_v13, %v110_v12  ;;  %v104_v21 = vmax.f32 %v88_v14, 0.0  ;;  %v105_v22 = vmax.f32 %v89_v15, 0.0 }
  0x14   :  { %586 = vmatprep.subr.bf16.mxu0 %v629_v28  ;;  %613 = vmatprep.subr.bf16.mxu1 %v629_v28  ;;  %v112_v23 = vmax.f32 %v96_v18, 0.0  ;;  %v113_v24 = vmax.f32 %v97_v19, 0.0 }
  0x15   :  { %v117_v25 = vpack.c.bf16 %v105_v22, %v104_v21 }
  0x16   :  { %v121_v26 = vpack.c.bf16 %v113_v24, %v112_v23 }
  0x17   :  { %587 = vmatpush3.bf16.msra.mxu0 %v629_v28  ;;  %621 = vmatpush3.bf16.msra.mxu1 %v629_v28 }
  0x18   :  { %588 = vmatprep.subr.bf16.mxu0 %v630_v44  ;;  %614 = vmatprep.subr.bf16.mxu1 %v630_v44 }
  0x1b   :  { %589 = vmatpush3.bf16.msra.mxu0 %v630_v44  ;;  %622 = vmatpush3.bf16.msra.mxu1 %v630_v44 }
  0x1c   :  { %590 = vmatprep.subr.bf16.mxu0 %v631_v61  ;;  %615 = vmatprep.subr.bf16.mxu1 %v631_v61 }
  0x1f   :  { %591 = vmatpush3.bf16.msra.mxu0 %v631_v61  ;;  %623 = vmatpush3.bf16.msra.mxu1 %v631_v61 }
  0x22   :  { %593 = vmatmul.mubr.bf16.vlgmr.msra.gmra.mrb[0].mxu0 %v115_v16  ;;  %601 = vmatmul.mubr.bf16.vlgmr.msra.gmra.mrb[0].mxu1 %v119_v17 }
  0x23   :  { %596 = vmatprep.mubr.bf16.mxu0 %v116_v5  ;;  %604 = vmatprep.mubr.bf16.mxu1 %v120_v20 }
  0x2a   :  { %597 = vmatmul.mubr.bf16.gmra.mrb[4].mxu0 %v117_v25  ;;  %605 = vmatmul.mubr.bf16.gmra.mrb[4].mxu1 %v121_v26 }
  0xf5   :  { %v594_v27 = vpop.f32.mrb[0].mxu0  ;;  %v602_v28 = vpop.f32.mrb[0].mxu1 }
  0xf6   :  { %v220_v29 = vpop.f32.mrb[1].mxu0  ;;  %v252_v10 = vpop.f32.mrb[1].mxu1  ;;  %v386_v41 = vmul.f32 %v594_v27, %v594_v27  ;;  %v394_v15 = vmul.f32 %v602_v28, %v602_v28 }
  0xf7   :  { %v595_v30 = vpop.f32.mrb[2].mxu0  ;;  %v603_v31 = vpop.f32.mrb[2].mxu1  ;;  %v384_v32 = vmul.f32 %v220_v29, %v220_v29  ;;  %v392_v8 = vmul.f32 %v252_v10, %v252_v10 }
  0xf8   :  { %v514_v33 = vpack.c.bf16 %v595_v30, %v594_v27  ;;  %v223_v34 = vpop.f32.mrb[3].mxu0  ;;  %v534_v35 = vpack.c.bf16 %v603_v31, %v602_v28  ;;  %v255_v36 = vpop.f32.mrb[3].mxu1  ;;  %v387_v44 = vmul.f32 %v595_v30, %v595_v30  ;;  %v395_v18 = vmul.f32 %v603_v31, %v603_v31 }
  0xf9   :  { %v509_v37 = vpack.c.bf16 %v223_v34, %v220_v29  ;;  %v363_v38 = vadd.f32 %v223_v34, %v220_v29  ;;  %v385_v39 = vmul.f32 %v223_v34, %v223_v34  ;;  %v529_v40 = vpack.c.bf16 %v255_v36, %v252_v10 }
  0xfa   :  { %553 = vst [vmem:[%s783_s4 + $0x8] sm:$0xff] %v514_v33   ;;  %557 = vst [vmem:[%s783_s4 + $0x28] sm:$0xff] %v534_v35   ;;  %v393_v14 = vmul.f32 %v255_v36, %v255_v36 }
  0xfb   :  { %510 = vst [vmem:[%s783_s4] sm:$0xff] %v509_v37   ;;  %v364_v42 = vadd.f32 %v594_v27, %v363_v38  ;;  %v400_v43 = vadd.f32 %v385_v39, %v384_v32  ;;  %556 = vst [vmem:[%s783_s4 + $0x20] sm:$0xff] %v529_v40  }
  0xfd   :  { %v401_v45 = vadd.f32 %v400_v43, %v386_v41  ;;  %v598_v46 = vpop.f32.mrb[4].mxu0  ;;  %v365_v47 = vadd.f32 %v595_v30, %v364_v42  ;;  %v606_v48 = vpop.f32.mrb[4].mxu1 }
  0xfe   :  { %v236_v49 = vpop.f32.mrb[5].mxu0  ;;  %v268_v50 = vpop.f32.mrb[5].mxu1  ;;  %v390_v1 = vmul.f32 %v598_v46, %v598_v46  ;;  %v398_v26 = vmul.f32 %v606_v48, %v606_v48 }
  0xff   :  { %v366_v51 = vadd.f32 %v365_v47, %v236_v49  ;;  %v388_v52 = vmul.f32 %v236_v49, %v236_v49  ;;  %v402_v53 = vadd.f32 %v401_v45, %v387_v44  ;;  %v599_v54 = vpop.f32.mrb[6].mxu0  ;;  %v607_v55 = vpop.f32.mrb[6].mxu1  ;;  %v396_v20 = vmul.f32 %v268_v50, %v268_v50 }
 0x100   :  { %v524_v56 = vpack.c.bf16 %v599_v54, %v598_v46  ;;  %v239_v57 = vpop.f32.mrb[7].mxu0  ;;  %v544_v58 = vpack.c.bf16 %v607_v55, %v606_v48  ;;  %v271_v59 = vpop.f32.mrb[7].mxu1  ;;  %v391_v4 = vmul.f32 %v599_v54, %v599_v54 }
 0x101   :  { %v403_v60 = vadd.f32 %v402_v53, %v388_v52  ;;  %v519_v61 = vpack.c.bf16 %v239_v57, %v236_v49  ;;  %v367_v62 = vadd.f32 %v366_v51, %v239_v57  ;;  %v389_v63 = vmul.f32 %v239_v57, %v239_v57 }
 0x102   :  { %555 = vst [vmem:[%s783_s4 + $0x18] sm:$0xff] %v524_v56   ;;  %559 = vst [vmem:[%s783_s4 + $0x38] sm:$0xff] %v544_v58   ;;  %v539_v0 = vpack.c.bf16 %v271_v59, %v268_v50  ;;  %v397_v25 = vmul.f32 %v271_v59, %v271_v59 }
 0x103   :  { %554 = vst [vmem:[%s783_s4 + $0x10] sm:$0xff] %v519_v61   ;;  %v368_v2 = vadd.f32 %v598_v46, %v367_v62  ;;  %v404_v3 = vadd.f32 %v403_v60, %v389_v63 }
 0x104   :  { %558 = vst [vmem:[%s783_s4 + $0x30] sm:$0xff] %v539_v0  }
 0x105   :  { %v405_v6 = vadd.f32 %v404_v3, %v390_v1  ;;  %v369_v7 = vadd.f32 %v599_v54, %v368_v2 }
 0x107   :  { %v370_v9 = vadd.f32 %v369_v7, %v252_v10  ;;  %v406_v11 = vadd.f32 %v405_v6, %v391_v4  ;;  %v399_v10 = vmul.f32 %v607_v55, %v607_v55 }
 0x109   :  { %v407_v12 = vadd.f32 %v406_v11, %v392_v8  ;;  %v371_v13 = vadd.f32 %v370_v9, %v255_v36 }
 0x10b   :  { %v372_v16 = vadd.f32 %v602_v28, %v371_v13  ;;  %v408_v17 = vadd.f32 %v407_v12, %v393_v14 }
 0x10d   :  { %v409_v19 = vadd.f32 %v408_v17, %v394_v15  ;;  %v373_v5 = vadd.f32 %v603_v31, %v372_v16 }
 0x10f   :  { %v374_v21 = vadd.f32 %v373_v5, %v268_v50  ;;  %v410_v22 = vadd.f32 %v409_v19, %v395_v18 }
 0x111   :  { %v411_v23 = vadd.f32 %v410_v22, %v396_v20  ;;  %v375_v24 = vadd.f32 %v374_v21, %v271_v59 }
 0x113   :  { %v376_v27 = vadd.f32 %v606_v48, %v375_v24  ;;  %v412_v29 = vadd.f32 %v411_v23, %v397_v25 }
 0x115   :  { %v377_v30 = vadd.f32 %v607_v55, %v376_v27  ;;  %v413_v32 = vadd.f32 %v412_v29, %v398_v26 }
 0x117   :  { %v378_v33 = vrot.slane %v377_v30, 4  ;;  %v414_v34 = vadd.f32 %v413_v32, %v399_v10 }
 0x119   :  { %v379_v35 = vadd.f32 %v378_v33, %v377_v30  ;;  %v415_v28 = vrot.slane %v414_v34, 4 }
 0x11b   :  { %v380_v36 = vrot.slane %v379_v35, 2  ;;  %v416_v37 = vadd.f32 %v415_v28, %v414_v34 }
 0x11d   :  { %v381_v38 = vadd.f32 %v380_v36, %v379_v35  ;;  %v417_v31 = vrot.slane %v416_v37, 2 }
 0x11f   :  { %v382_v39 = vrot.slane %v381_v38, 1  ;;  %v418_v40 = vadd.f32 %v417_v31, %v416_v37 }
 0x121   :  { %v419_v41 = vrot.slane %v418_v40, 1  ;;  %v383_v42 = vadd.f32 %v382_v39, %v381_v38 }
 0x123   :  { %v420_v43 = vadd.f32 %v419_v41, %v418_v40 }
 0x125   :  { %v422_v44 = vsel %vm421_vm0, %v383_v42, %v420_v43 }
 0x126   :  { %423 = vst [vmem:[%s784_s5] sm:$0x3] %v422_v44 }

// kernel: bottleneck_forward_pallas.6
= control target key start
LH: loop header
LB: loop body
LE: loop exit
PB: predicated region body
PF: predicated region fallthrough
CT: control target
= control target key end

     0   :  { %s3200_s12 = smov 0   ;;  %s3656_s0 = inlined_call_operand.vmem [shape: bf16[8,152,128], index: 0, kind: input, shape index: {}]   ;;  %s3657_s1 = inlined_call_operand.vmem [shape: bf16[9,128,128], index: 1, kind: input, shape index: {}]   ;;  %s3658_s2 = inlined_call_operand.vmem [shape: bf16[2,8,8,128], index: 2, kind: output, shape index: {0}]   ;;  %s3659_s3 = inlined_call_operand.vmem [shape: f32[2,2,128], index: 3, kind: output, shape index: {1}]  }
   0x1 LB: > { %s3206_s13 = sadd.s32 4294967295, %s3178_s12   ;;  %p2221_p0 = scmp.ge.s32.totalorder %s3178_s12, 1  ;;  %s3178_s12 = sphi %s3200_s12, %s14_s12  }
   0x2   : > { %p142_p1 = scmp.lt.s32.totalorder %s3178_s12, 3 }
   0x4   : > { %p143_p2 = pnand %p2221_p0, %p142_p1 }
   0x5   : > { %v3063_v0 = vld [vmem:[%s3657_s1 + $0x40] sm:$0xff] (!%p143_p2)   ;;  %s2222_s16 = sshll.u32 (!%p143_p2), %s3206_s13, 2  ;;  %v3065_v2 = vld [vmem:[%s3657_s1 + $0x48] sm:$0xff] (!%p143_p2)   ;;  %v3067_v4 = vld [vmem:[%s3657_s1 + $0x50] sm:$0xff] (!%p143_p2)   ;;  %vm681_vm0 = vsmask.f32 (!%p143_p2), 7424 }
   0x6   : > { %146 = sbr.rel (%p143_p2) target bundleno = 418 (0x1a2), region = 28  ;;  %v3064_v1 = vld [vmem:[%s3657_s1 + $0x100] sm:$0xff] (!%p143_p2)   ;;  %p172_p3 = scmp.lt.s32.totalorder (!%p143_p2), %s2222_s16, 7  ;;  %2634 = vmatprep.subr.bf16.mxu1 (!%p143_p2), %v3063_v0  ;;  %v3066_v3 = vld [vmem:[%s3657_s1 + $0x108] sm:$0xff] (!%p143_p2)   ;;  %v3068_v5 = vld [vmem:[%s3657_s1 + $0x110] sm:$0xff] (!%p143_p2)   ;;  %vm2128_vm1 = vcmask (!%p143_p2), 1040384  }
   0x7   : > { %2762 = vmatprep.subr.bf16.mxu0 (!%p143_p2), %v3064_v1  ;;  %2635 = vmatpush3.bf16.msra.mxu1 (!%p143_p2), %v3063_v0  ;;  %v3069_v6 = vld [vmem:[%s3657_s1 + $0x58] sm:$0xff] (!%p143_p2)   ;;  %v3071_v8 = vld [vmem:[%s3657_s1 + $0x60] sm:$0xff] (!%p143_p2)   ;;  %v3073_v10 = vld [vmem:[%s3657_s1 + $0x68] sm:$0xff] (!%p143_p2)   ;;  %p178_p4 = scmp.lt.s32.totalorder (!%p143_p2), %s3206_s13, 1 }
   0x8   : > { %2763 = vmatpush3.bf16.msra.mxu0 (!%p143_p2), %v3064_v1  ;;  %2636 = vmatprep.subr.bf16.mxu1 (!%p143_p2), %v3065_v2  ;;  %v3070_v7 = vld [vmem:[%s3657_s1 + $0x118] sm:$0xff] (!%p143_p2)   ;;  %v3072_v9 = vld [vmem:[%s3657_s1 + $0x120] sm:$0xff] (!%p143_p2)   ;;  %v3074_v11 = vld [vmem:[%s3657_s1 + $0x128] sm:$0xff] (!%p143_p2)  }
   0x9   : > { %2764 = vmatprep.subr.bf16.mxu0 (!%p143_p2), %v3066_v3  ;;  %v3075_v14 = vld [vmem:[%s3657_s1 + $0x70] sm:$0xff] (!%p143_p2)   ;;  %v3077_v16 = vld [vmem:[%s3657_s1 + $0x78] sm:$0xff] (!%p143_p2)   ;;  %v3082_v19 = vld [vmem:[%s3657_s1] sm:$0xff] (!%p143_p2)  }
   0xa   : > { %v3076_v15 = vld [vmem:[%s3657_s1 + $0x130] sm:$0xff] (!%p143_p2)   ;;  %v3078_v17 = vld [vmem:[%s3657_s1 + $0x138] sm:$0xff] (!%p143_p2)   ;;  %v3084_v20 = vld [vmem:[%s3657_s1 + $0x140] sm:$0xff] (!%p143_p2)  }
   0xb   : > { %2637 = vmatpush3.bf16.msra.mxu1 (!%p143_p2), %v3065_v2  ;;  %v3085_v22 = vld [vmem:[%s3657_s1 + $0x8] sm:$0xff] (!%p143_p2)   ;;  %v3090_v27 = vld [vmem:[%s3657_s1 + $0x10] sm:$0xff] (!%p143_p2)   ;;  %v3093_v30 = vld [vmem:[%s3657_s1 + $0x18] sm:$0xff] (!%p143_p2)  }
   0xc   : > { %2765 = vmatpush3.bf16.msra.mxu0 (!%p143_p2), %v3066_v3  ;;  %2638 = vmatprep.subr.bf16.mxu1 (!%p143_p2), %v3067_v4  ;;  %v3086_v23 = vld [vmem:[%s3657_s1 + $0x148] sm:$0xff] (!%p143_p2)   ;;  %v3092_v28 = vld [vmem:[%s3657_s1 + $0x150] sm:$0xff] (!%p143_p2)   ;;  %v3094_v31 = vld [vmem:[%s3657_s1 + $0x158] sm:$0xff] (!%p143_p2)  }
   0xd   : > { %s3661_s16 = smov (!%p172_p3, %s2222_s16), 7  ;;  %2766 = vmatprep.subr.bf16.mxu0 %v3068_v5  ;;  %v3098_v35 = vld [vmem:[%s3657_s1 + $0x20] sm:$0xff]   ;;  %v3101_v38 = vld [vmem:[%s3657_s1 + $0x28] sm:$0xff]   ;;  %v3106_v42 = vld [vmem:[%s3657_s1 + $0x30] sm:$0xff]   ;;  %s3663_s13 = smov (!%p178_p4, %s3206_s13), 1 }
   0xe   : > { %s3054_s4 = smul.u32 76, %s3661_s16  ;;  %v3100_v37 = vld [vmem:[%s3657_s1 + $0x160] sm:$0xff]   ;;  %v3102_v39 = vld [vmem:[%s3657_s1 + $0x168] sm:$0xff]   ;;  %v3108_v49 = vld [vmem:[%s3657_s1 + $0x170] sm:$0xff]   ;;  %s2226_s21 = sshll.u32 %s3663_s13, 1 }
   0xf   : > { %2639 = vmatpush3.bf16.msra.mxu1 %v3067_v4  ;;  %v3109_v51 = vld [vmem:[%s3657_s1 + $0x38] sm:$0xff]   ;;  %v3115_v1 = vld [vmem:[%s3657_s1 + $0x80] sm:$0xff]   ;;  %s186_s24 = scalar_lea.vmem %s3659_s3, %s2226_s21 }
  0x10   : > { %2767 = vmatpush3.bf16.msra.mxu0 %v3068_v5  ;;  %2640 = vmatprep.subr.bf16.mxu1 %v3069_v6  ;;  %s3244_s11 = scalar_lea.vmem %s3656_s0, %s3054_s4  ;;  %v3110_v54 = vld [vmem:[%s3657_s1 + $0x178] sm:$0xff]   ;;  %v3117_v3 = vld [vmem:[%s3657_s1 + $0x180] sm:$0xff]   ;;  %v3118_v5 = vld [vmem:[%s3657_s1 + $0x88] sm:$0xff]  }
  0x11   : > { %2768 = vmatprep.subr.bf16.mxu0 %v3070_v7  ;;  %v3079_v12 = vld [vmem:[%s3244_s11 + $0x4c] sm:$0xff]   ;;  %v3080_v13 = vld [vmem:[%s3244_s11 + $0xe4] sm:$0xff]   ;;  %v3267_v18 = vld [vmem:[%s3244_s11 + $0x54] sm:$0xff]  }
  0x12   : > { %2650 = vmatprep.mubr.bf16.mxu1 %v3079_v12  ;;  %2778 = vmatprep.mubr.bf16.mxu0 %v3080_v13  ;;  %v3083_v21 = vld [vmem:[%s3244_s11 + $0xec] sm:$0xff]   ;;  %v3283_v24 = vld [vmem:[%s3244_s11 + $0x5c] sm:$0xff]   ;;  %v3088_v25 = vld [vmem:[%s3244_s11 + $0xf4] sm:$0xff]  }
  0x13   : > { %2641 = vmatpush3.bf16.msra.mxu1 %v3069_v6  ;;  %v3288_v26 = vld [vmem:[%s3244_s11 + $0x64] sm:$0xff]   ;;  %v3091_v29 = vld [vmem:[%s3244_s11 + $0xfc] sm:$0xff]   ;;  %v3305_v32 = vld [vmem:[%s3244_s11 + $0x6c] sm:$0xff]  }
  0x14   : > { %2769 = vmatpush3.bf16.msra.mxu0 %v3070_v7  ;;  %2642 = vmatprep.subr.bf16.mxu1 %v3071_v8  ;;  %v3096_v33 = vld [vmem:[%s3244_s11 + $0x104] sm:$0xff]   ;;  %v3310_v34 = vld [vmem:[%s3244_s11 + $0x74] sm:$0xff]   ;;  %v3099_v36 = vld [vmem:[%s3244_s11 + $0x10c] sm:$0xff]  }
  0x15   : > { %2770 = vmatprep.subr.bf16.mxu0 %v3072_v9  ;;  %v3327_v40 = vld [vmem:[%s3244_s11 + $0x7c] sm:$0xff]   ;;  %v3104_v41 = vld [vmem:[%s3244_s11 + $0x114] sm:$0xff]   ;;  %v3341_v45 = vld [vmem:[%s3244_s11 + $0x84] sm:$0xff]  }
  0x16   : > { %v3335_v43 = vld [vmem:[%s3244_s11 + $0x98] sm:$0xff]   ;;  %v3338_v44 = vld [vmem:[%s3244_s11 + $0xa0] sm:$0xff]   ;;  %v3355_v53 = vld [vmem:[%s3244_s11 + $0xa8] sm:$0xff]  }
  0x17   : > { %2643 = vmatpush3.bf16.msra.mxu1 %v3071_v8  ;;  %v1344_v46 = vshrl.u32 %v3335_v43, 16  ;;  %v1346_v47 = vshll.u32 %v3335_v43, 16  ;;  %v3107_v48 = vld [vmem:[%s3244_s11 + $0x11c] sm:$0xff]   ;;  %v1351_v50 = vshll.u32 %v3338_v44, 16  ;;  %v1355_v57 = vshrl.u32 %v3338_v44, 16  ;;  %v3368_v61 = vld [vmem:[%s3244_s11 + $0xb0] sm:$0xff]  }
  0x18   : > { %2771 = vmatpush3.bf16.msra.mxu0 %v3072_v9  ;;  %2644 = vmatprep.subr.bf16.mxu1 %v3073_v10  ;;  %v1359_v58 = vshll.u32 %v3355_v53, 16  ;;  %v3363_v59 = vld [vmem:[%s3244_s11] sm:$0xff]   ;;  %v1363_v62 = vshrl.u32 %v3355_v53, 16  ;;  %v3372_v0 = vld [vmem:[%s3244_s11 + $0x8] sm:$0xff]   ;;  %v1367_v4 = vshll.u32 %v3368_v61, 16  ;;  %v3386_v6 = vld [vmem:[%s3244_s11 + $0xb8] sm:$0xff]  }
  0x19   : > { %2772 = vmatprep.subr.bf16.mxu0 %v3074_v11  ;;  %v1348_v52 = vrot.slane %v1346_v47, 1  ;;  %v1353_v55 = vrot.slane %v1351_v50, 1  ;;  %v3119_v7 = vld [vmem:[%s3657_s1 + $0x188] sm:$0xff]   ;;  %v1375_v12 = vshll.u32 %v3386_v6, 16  ;;  %v3395_v13 = vld [vmem:[%s3244_s11 + $0x10] sm:$0xff]   ;;  %v685_v50 = vshll.u32 %v3363_v59, 16 }
  0x1a   : > { %v1361_v2 = vrot.slane %v1359_v58, 1  ;;  %v1369_v9 = vrot.slane %v1367_v4, 1  ;;  %v3139_v4 = vld [vmem:[%s3657_s1 + $0xb0] sm:$0xff]  }
  0x1b   : > { %2645 = vmatpush3.bf16.msra.mxu1 %v3073_v10  ;;  %v1349_v56 = vor.u32 %v1348_v52, %v1344_v46  ;;  %v1357_v63 = vor.u32 %v1355_v57, %v1353_v55  ;;  %v3140_v52 = vld [vmem:[%s3244_s11 + $0xd8] ss:$0 sps:$4 sm:$0xff]  }
  0x1c   : > { %2773 = vmatpush3.bf16.msra.mxu0 %v3074_v11  ;;  %2646 = vmatprep.subr.bf16.mxu1 %v3075_v14  ;;  %v1365_v8 = vor.u32 %v1363_v62, %v1361_v2  ;;  %v1371_v11 = vshrl.u32 %v3368_v61, 16  ;;  %v3457_v62 = vld [vmem:[%s3244_s11 + $0x30] sm:$0xff]  }
  0x1d   : > { %2774 = vmatprep.subr.bf16.mxu0 %v3076_v15  ;;  %v1354_v60 = vsel %vm681_vm0, %v1349_v56, %v1353_v55  ;;  %v1362_v10 = vsel %vm681_vm0, %v1357_v63, %v1361_v2  ;;  %v690_v63 = vshll.u32 %v3372_v0, 16  ;;  %v687_v2 = vrot.slane %v685_v50, 1  ;;  %v3148_v50 = vld [vmem:[%s3657_s1 + $0xd0] sm:$0xff]  }
  0x1f   : > { %2647 = vmatpush3.bf16.msra.mxu1 %v3075_v14  ;;  %v1370_v14 = vsel %vm681_vm0, %v1365_v8, %v1369_v9  ;;  %v692_v8 = vrot.slane %v690_v63, 1  ;;  %v734_v63 = vshrl.u32 %v3457_v62, 16 }
  0x20   : > { %2775 = vmatpush3.bf16.msra.mxu0 %v3076_v15  ;;  %2648 = vmatprep.subr.bf16.mxu1 %v3077_v16  ;;  %v3400_v15 = vld [vmem:[%s3244_s11 + $0xc0] sm:$0xff]  }
  0x21   : > { %2776 = vmatprep.subr.bf16.mxu0 %v3078_v17 }
  0x23   : > { %2649 = vmatpush3.bf16.msra.mxu1 %v3077_v16  ;;  %v1379_v16 = vshrl.u32 %v3386_v6, 16 }
  0x24   : > { %2777 = vmatpush3.bf16.msra.mxu0 %v3078_v17  ;;  %2666 = vmatprep.subr.bf16.mxu1 %v3082_v19  ;;  %v3404_v17 = vld [vmem:[%s3244_s11 + $0x18] sm:$0xff]  }
  0x25   : > { %2794 = vmatprep.subr.bf16.mxu0 %v3084_v20 }
  0x26   : > { %2651 = vmatmul.mubr.bf16.vlgmr.msra.gmra.mrb[0].mxu1 %v3267_v18 }
  0x27   : > { %2779 = vmatmul.mubr.bf16.vlgmr.msra.gmra.mrb[0].mxu0 %v3083_v21  ;;  %2667 = vmatpush3.bf16.msra.mxu1 %v3082_v19  ;;  %v3123_v19 = vld [vmem:[%s3657_s1 + $0x90] sm:$0xff]   ;;  %v1377_v21 = vrot.slane %v1375_v12, 1  ;;  %v3142_v12 = vld [vmem:[%s3657_s1 + $0xb8] sm:$0xff]  }
  0x28   : > { %2795 = vmatpush3.bf16.msra.mxu0 %v3084_v20  ;;  %2668 = vmatprep.subr.bf16.mxu1 %v3085_v22  ;;  %v1373_v20 = vor.u32 %v1371_v11, %v1369_v9  ;;  %v3471_v9 = vld [vmem:[%s3244_s11 + $0x38] sm:$0xff]   ;;  %v694_v11 = vshrl.u32 %v3372_v0, 16 }
  0x29   : > { %2796 = vmatprep.subr.bf16.mxu0 %v3086_v23  ;;  %2654 = vmatprep.mubr.bf16.mxu1 %v3283_v24 }
  0x2a   : > { %2782 = vmatprep.mubr.bf16.mxu0 %v3088_v25  ;;  %v3126_v25 = vld [vmem:[%s3657_s1 + $0x98] sm:$0xff]  }
  0x2b   : > { %2669 = vmatpush3.bf16.msra.mxu1 %v3085_v22  ;;  %v3125_v22 = vld [vmem:[%s3657_s1 + $0x190] sm:$0xff]  }
  0x2c   : > { %2797 = vmatpush3.bf16.msra.mxu0 %v3086_v23  ;;  %2670 = vmatprep.subr.bf16.mxu1 %v3090_v27  ;;  %v1383_v23 = vshll.u32 %v3400_v15, 16 }
  0x2d   : > { %2798 = vmatprep.subr.bf16.mxu0 %v3092_v28 }
  0x2e   : > { %2655 = vmatmul.mubr.bf16.gmra.mrb[4].mxu1 %v3288_v26 }
  0x2f   : > { %2783 = vmatmul.mubr.bf16.gmra.mrb[4].mxu0 %v3091_v29  ;;  %2671 = vmatpush3.bf16.msra.mxu1 %v3090_v27  ;;  %v3418_v27 = vld [vmem:[%s3244_s11 + $0xc8] sm:$0xff]   ;;  %v1381_v29 = vor.u32 %v1379_v16, %v1377_v21 }
  0x30   : > { %2799 = vmatpush3.bf16.msra.mxu0 %v3092_v28  ;;  %2672 = vmatprep.subr.bf16.mxu1 %v3093_v30  ;;  %v3127_v28 = vld [vmem:[%s3657_s1 + $0x198] sm:$0xff]  }
  0x31   : > { %2800 = vmatprep.subr.bf16.mxu0 %v3094_v31  ;;  %2658 = vmatprep.mubr.bf16.mxu1 %v3305_v32 }
  0x32   : > { %2786 = vmatprep.mubr.bf16.mxu0 %v3096_v33  ;;  %v1387_v33 = vshrl.u32 %v3400_v15, 16 }
  0x33   : > { %2673 = vmatpush3.bf16.msra.mxu1 %v3093_v30  ;;  %v1385_v30 = vrot.slane %v1383_v23, 1  ;;  %v696_v23 = vor.u32 %v694_v11, %v692_v8 }
  0x34   : > { %2801 = vmatpush3.bf16.msra.mxu0 %v3094_v31  ;;  %2674 = vmatprep.subr.bf16.mxu1 %v3098_v35  ;;  %v1378_v31 = vsel %vm681_vm0, %v1373_v20, %v1377_v21  ;;  %v702_v20 = vshrl.u32 %v3395_v13, 16  ;;  %v706_v21 = vshll.u32 %v3404_v17, 16 }
  0x35   : > { %2802 = vmatprep.subr.bf16.mxu0 %v3100_v37  ;;  %v1389_v46 = vor.u32 %v1387_v33, %v1385_v30 }
  0x36   : > { %2659 = vmatmul.mubr.bf16.gmra.mrb[8].mxu1 %v3310_v34 }
  0x37   : > { %2787 = vmatmul.mubr.bf16.gmra.mrb[8].mxu0 %v3099_v36  ;;  %2675 = vmatpush3.bf16.msra.mxu1 %v3098_v35  ;;  %v1391_v35 = vshll.u32 %v3418_v27, 16  ;;  %v3427_v36 = vld [vmem:[%s3244_s11 + $0x20] sm:$0xff]  }
  0x38   : > { %2803 = vmatpush3.bf16.msra.mxu0 %v3100_v37  ;;  %2676 = vmatprep.subr.bf16.mxu1 %v3101_v38  ;;  %v1386_v37 = vsel %vm681_vm0, %v1381_v29, %v1385_v30  ;;  %v3145_v29 = vld [vmem:[%s3657_s1 + $0x1c0] sm:$0xff]  }
  0x39   : > { %2804 = vmatprep.subr.bf16.mxu0 %v3102_v39  ;;  %2662 = vmatprep.mubr.bf16.mxu1 %v3327_v40  ;;  %v1393_v47 = vrot.slane %v1391_v35, 1  ;;  %v3146_v35 = vld [vmem:[%s3657_s1 + $0xc8] sm:$0xff]  }
  0x3a   : > { %2790 = vmatprep.mubr.bf16.mxu0 %v3104_v41  ;;  %v3436_v41 = vld [vmem:[%s3244_s11 + $0x28] sm:$0xff]  }
  0x3b   : > { %2677 = vmatpush3.bf16.msra.mxu1 %v3101_v38  ;;  %v3432_v38 = vld [vmem:[%s3244_s11 + $0xd0] sm:$0xff]   ;;  %v1394_v57 = vsel %vm681_vm0, %v1389_v46, %v1393_v47  ;;  %v722_v46 = vshll.u32 %v3436_v41, 16 }
  0x3c   : > { %2805 = vmatpush3.bf16.msra.mxu0 %v3102_v39  ;;  %2678 = vmatprep.subr.bf16.mxu1 %v3106_v42  ;;  %v1395_v39 = vshrl.u32 %v3418_v27, 16  ;;  %v1403_v58 = vshrl.u32 %v3432_v38, 16 }
  0x3d   : > { %2806 = vmatprep.subr.bf16.mxu0 %v3108_v49 }
  0x3e   : > { %2663 = vmatmul.mubr.bf16.gmra.mrb[12].mxu1 %v3341_v45  ;;  %v1397_v55 = vor.u32 %v1395_v39, %v1393_v47  ;;  %v710_v39 = vshrl.u32 %v3404_v17, 16 }
  0x3f   : > { %2791 = vmatmul.mubr.bf16.gmra.mrb[12].mxu0 %v3107_v48  ;;  %2679 = vmatpush3.bf16.msra.mxu1 %v3106_v42  ;;  %v3131_v42 = vld [vmem:[%s3657_s1 + $0xa0] sm:$0xff]  }
  0x40   : > { %2807 = vmatpush3.bf16.msra.mxu0 %v3108_v49  ;;  %2680 = vmatprep.subr.bf16.mxu1 %v3109_v51  ;;  %v3133_v48 = vld [vmem:[%s3657_s1 + $0x1a0] sm:$0xff]   ;;  %v1399_v49 = vshll.u32 %v3432_v38, 16 }
  0x41   : > { %2808 = vmatprep.subr.bf16.mxu0 %v3110_v54  ;;  %2682 = vmatprep.mubr.bf16.mxu1 %v3363_v59 }
  0x42   : > { %2810 = vmatprep.mubr.bf16.mxu0 %v1354_v60  ;;  %v1401_v56 = vrot.slane %v1399_v49, 1  ;;  %v1407_v60 = vshll.u32 %v3140_v52, 16 }
  0x43   : > { %2681 = vmatpush3.bf16.msra.mxu1 %v3109_v51  ;;  %v3134_v51 = vld [vmem:[%s3657_s1 + $0xa8] sm:$0xff]  }
  0x44   : > { %2809 = vmatpush3.bf16.msra.mxu0 %v3110_v54  ;;  %2698 = vmatprep.subr.bf16.mxu1 %v3115_v1  ;;  %v3135_v54 = vld [vmem:[%s3657_s1 + $0x1a8] sm:$0xff]  }
  0x45   : > { %2826 = vmatprep.subr.bf16.mxu0 %v3117_v3 }
  0x46   : > { %2683 = vmatmul.mubr.bf16.vlgmr.msra.gmra.mrb[0].mxu1 %v3372_v0 }
  0x47   : > { %2811 = vmatmul.mubr.bf16.vlgmr.msra.gmra.mrb[0].mxu0 %v1362_v10  ;;  %2699 = vmatpush3.bf16.msra.mxu1 %v3115_v1  ;;  %v683_v1 = vshrl.u32 %v3363_v59, 16  ;;  %v3141_v59 = vld [vmem:[%s3657_s1 + $0x1b0] sm:$0xff]  }
  0x48   : > { %2827 = vmatpush3.bf16.msra.mxu0 %v3117_v3  ;;  %2700 = vmatprep.subr.bf16.mxu1 %v3118_v5  ;;  %v1402_v3 = vsel %vm681_vm0, %v1397_v55, %v1401_v56 }
  0x49   : > { %2828 = vmatprep.subr.bf16.mxu0 %v3119_v7  ;;  %2686 = vmatprep.mubr.bf16.mxu1 %v3395_v13  ;;  %v688_v10 = vor.u32 %v687_v2, %v683_v1  ;;  %v738_v1 = vshll.u32 %v3471_v9, 16 }
  0x4a   : > { %2814 = vmatprep.mubr.bf16.mxu0 %v1370_v14  ;;  %v698_v14 = vshll.u32 %v3395_v13, 16 }
  0x4b   : > { %2701 = vmatpush3.bf16.msra.mxu1 %v3118_v5  ;;  %v1405_v5 = vor.u32 %v1403_v58, %v1401_v56  ;;  %v726_v56 = vshrl.u32 %v3436_v41, 16  ;;  %v204_v58 = vld [vmem:[%s3244_s11 + $0x40] sm:$0xf] }
  0x4c   : > { %2829 = vmatpush3.bf16.msra.mxu0 %v3119_v7  ;;  %2702 = vmatprep.subr.bf16.mxu1 %v3123_v19  ;;  %v1409_v7 = vrot.slane %v1407_v60, 1 }
  0x4d   : > { %2830 = vmatprep.subr.bf16.mxu0 %v3125_v22 }
  0x4e   : > { %2687 = vmatmul.mubr.bf16.gmra.mrb[4].mxu1 %v3404_v17  ;;  %v1410_v16 = vsel %vm681_vm0, %v1405_v5, %v1409_v7  ;;  %v3152_v5 = vld [vmem:[%s3657_s1 + $0xe0] sm:$0xff]  }
  0x4f   : > { %2815 = vmatmul.mubr.bf16.gmra.mrb[4].mxu0 %v1378_v31  ;;  %2703 = vmatpush3.bf16.msra.mxu1 %v3123_v19  ;;  %v3143_v19 = vld [vmem:[%s3657_s1 + $0x1b8] sm:$0xff]   ;;  %v708_v31 = vrot.slane %v706_v21, 1  ;;  %v3153_v7 = vld [vmem:[%s3657_s1 + $0x1e0] sm:$0xff]  }
  0x50   : > { %2831 = vmatpush3.bf16.msra.mxu0 %v3125_v22  ;;  %2704 = vmatprep.subr.bf16.mxu1 %v3126_v25  ;;  %v693_v22 = vsel %vm681_vm0, %v688_v10, %v692_v8  ;;  %v742_v10 = vshrl.u32 %v3471_v9, 16  ;;  %v205_v21 = vld [vmem:[%s3244_s11 + $0x44] sm:$0xf] }
  0x51   : > { %2832 = vmatprep.subr.bf16.mxu0 %v3127_v28  ;;  %2690 = vmatprep.mubr.bf16.mxu1 %v3427_v36 }
  0x52   : > { %2818 = vmatprep.mubr.bf16.mxu0 %v1386_v37  ;;  %v3147_v37 = vld [vmem:[%s3657_s1 + $0x1c8] sm:$0xff]  }
  0x53   : > { %2705 = vmatpush3.bf16.msra.mxu1 %v3126_v25  ;;  %v700_v25 = vrot.slane %v698_v14, 1 }
  0x54   : > { %2833 = vmatpush3.bf16.msra.mxu0 %v3127_v28  ;;  %2706 = vmatprep.subr.bf16.mxu1 %v3131_v42  ;;  %v3144_v28 = vld [vmem:[%s3657_s1 + $0xc0] sm:$0xff]  }
  0x55   : > { %2834 = vmatprep.subr.bf16.mxu0 %v3133_v48  ;;  %v704_v30 = vor.u32 %v702_v20, %v700_v25  ;;  %v3494_v33 = vsel %vm681_vm0, %v696_v23, %v700_v25  ;;  %v3157_v20 = vld [vmem:[%s3657_s1 + $0xf0] sm:$0xff]   ;;  %v3574_v23 = vcombine.low %v204_v58, %v205_v21  ;;  %v3160_v25 = vld [vmem:[%s3657_s1 + $0xf8] sm:$0xff]  }
  0x56   : > { %2691 = vmatmul.mubr.bf16.gmra.mrb[8].mxu1 %v3436_v41 }
  0x57   : > { %2819 = vmatmul.mubr.bf16.gmra.mrb[8].mxu0 %v1394_v57  ;;  %2707 = vmatpush3.bf16.msra.mxu1 %v3131_v42  ;;  %v714_v42 = vshll.u32 %v3427_v36, 16  ;;  %v3508_v47 = vsel %vm681_vm0, %v704_v30, %v708_v31  ;;  %v730_v57 = vshll.u32 %v3457_v62, 16 }
  0x58   : > { %2835 = vmatpush3.bf16.msra.mxu0 %v3133_v48  ;;  %2708 = vmatprep.subr.bf16.mxu1 %v3134_v51  ;;  %v712_v48 = vor.u32 %v710_v39, %v708_v31 }
  0x59   : > { %2836 = vmatprep.subr.bf16.mxu0 %v3135_v54  ;;  %2694 = vmatprep.mubr.bf16.mxu1 %v3457_v62  ;;  %v716_v49 = vrot.slane %v714_v42, 1 }
  0x5a   : > { %2822 = vmatprep.mubr.bf16.mxu0 %v1402_v3  ;;  %v732_v3 = vrot.slane %v730_v57, 1 }
  0x5b   : > { %2709 = vmatpush3.bf16.msra.mxu1 %v3134_v51  ;;  %v3149_v51 = vld [vmem:[%s3657_s1 + $0x1d0] sm:$0xff]   ;;  %v3523_v55 = vsel %vm681_vm0, %v712_v48, %v716_v49 }
  0x5c   : > { %2837 = vmatpush3.bf16.msra.mxu0 %v3135_v54  ;;  %2710 = vmatprep.subr.bf16.mxu1 %v3139_v4  ;;  %v724_v54 = vrot.slane %v722_v46, 1 }
  0x5d   : > { %2838 = vmatprep.subr.bf16.mxu0 %v3141_v59 }
  0x5e   : > { %2695 = vmatmul.mubr.bf16.gmra.mrb[12].mxu1 %v3471_v9  ;;  %v728_v2 = vor.u32 %v726_v56, %v724_v54 }
  0x5f   : > { %2823 = vmatmul.mubr.bf16.gmra.mrb[12].mxu0 %v1410_v16  ;;  %2711 = vmatpush3.bf16.msra.mxu1 %v3139_v4  ;;  %v2291_v4 = vcombine.low %v204_v58, %v204_v58 }
  0x60   : > { %2839 = vmatpush3.bf16.msra.mxu0 %v3141_v59  ;;  %2712 = vmatprep.subr.bf16.mxu1 %v3142_v12  ;;  %v740_v59 = vrot.slane %v738_v1, 1  ;;  %v3547_v8 = vsel %vm681_vm0, %v728_v2, %v732_v3 }
  0x61   : > { %2840 = vmatprep.subr.bf16.mxu0 %v3143_v19  ;;  %2714 = vmatprep.mubr.bf16.mxu1 %v693_v22  ;;  %v746_v11 = vshll.u32 %v2291_v4, 16  ;;  %v3159_v22 = vld [vmem:[%s3657_s1 + $0x1f0] sm:$0xff]  }
  0x62   : > { %2842 = vmatprep.mubr.bf16.mxu0 %v3372_v0  ;;  %v718_v0 = vshrl.u32 %v3427_v36, 16  ;;  %v3561_v16 = vor.u32 %v742_v10, %v740_v59 }
  0x63   : > { %2713 = vmatpush3.bf16.msra.mxu1 %v3142_v12  ;;  %v3154_v12 = vld [vmem:[%s3657_s1 + $0xe8] sm:$0xff]  }
  0x64   : > { %2841 = vmatpush3.bf16.msra.mxu0 %v3143_v19  ;;  %2730 = vmatprep.subr.bf16.mxu1 %v3144_v28  ;;  %v720_v52 = vor.u32 %v718_v0, %v716_v49  ;;  %v748_v19 = vrot.slane %v746_v11, 1 }
  0x65   : > { %2858 = vmatprep.subr.bf16.mxu0 %v3145_v29 }
  0x66   : > { %2715 = vmatmul.mubr.bf16.vlgmr.msra.gmra.mrb[0].mxu1 %v3494_v33  ;;  %v3533_v60 = vsel %vm681_vm0, %v720_v52, %v724_v54 }
  0x67   : > { %2843 = vmatmul.mubr.bf16.vlgmr.msra.gmra.mrb[0].mxu0 %v3395_v13  ;;  %2731 = vmatpush3.bf16.msra.mxu1 %v3144_v28  ;;  %v3150_v13 = vld [vmem:[%s3657_s1 + $0xd8] sm:$0xff]  }
  0x68   : > { %2859 = vmatpush3.bf16.msra.mxu0 %v3145_v29  ;;  %2732 = vmatprep.subr.bf16.mxu1 %v3146_v35  ;;  %v3161_v28 = vld [vmem:[%s3657_s1 + $0x1f8] sm:$0xff]   ;;  %v3163_v29 = vld [vmem:[%s3657_s1 + $0x208] sm:$0xff]  }
  0x69   : > { %2860 = vmatprep.subr.bf16.mxu0 %v3147_v37  ;;  %2718 = vmatprep.mubr.bf16.mxu1 %v3508_v47 }
  0x6a   : > { %2846 = vmatprep.mubr.bf16.mxu0 %v3404_v17  ;;  %v3151_v17 = vld [vmem:[%s3657_s1 + $0x1d8] sm:$0xff]  }
  0x6b   : > { %2733 = vmatpush3.bf16.msra.mxu1 %v3146_v35 }
  0x6c   : > { %2861 = vmatpush3.bf16.msra.mxu0 %v3147_v37  ;;  %2734 = vmatprep.subr.bf16.mxu1 %v3148_v50 }
  0x6d   : > { %2862 = vmatprep.subr.bf16.mxu0 %v3149_v51 }
  0x6e   : > { %2719 = vmatmul.mubr.bf16.gmra.mrb[4].mxu1 %v3523_v55 }
  0x6f   : > { %2847 = vmatmul.mubr.bf16.gmra.mrb[4].mxu0 %v3427_v36  ;;  %2735 = vmatpush3.bf16.msra.mxu1 %v3148_v50  ;;  %v736_v36 = vor.u32 %v734_v63, %v732_v3 }
  0x70   : > { %2863 = vmatpush3.bf16.msra.mxu0 %v3149_v51  ;;  %2736 = vmatprep.subr.bf16.mxu1 %v3150_v13 }
  0x71   : > { %2864 = vmatprep.subr.bf16.mxu0 %v3151_v17  ;;  %2722 = vmatprep.mubr.bf16.mxu1 %v3533_v60  ;;  %v3558_v14 = vsel %vm681_vm0, %v736_v36, %v740_v59 }
  0x72   : > { %2850 = vmatprep.mubr.bf16.mxu0 %v3436_v41  ;;  %v3155_v41 = vld [vmem:[%s3657_s1 + $0x1e8] sm:$0xff]  }
  0x73   : > { %2737 = vmatpush3.bf16.msra.mxu1 %v3150_v13 }
  0x74   : > { %2865 = vmatpush3.bf16.msra.mxu0 %v3151_v17  ;;  %2738 = vmatprep.subr.bf16.mxu1 %v3152_v5 }
  0x75   : > { %2866 = vmatprep.subr.bf16.mxu0 %v3153_v7 }
  0x76   : > { %2723 = vmatmul.mubr.bf16.gmra.mrb[8].mxu1 %v3547_v8 }
  0x77   : > { %2851 = vmatmul.mubr.bf16.gmra.mrb[8].mxu0 %v3457_v62  ;;  %2739 = vmatpush3.bf16.msra.mxu1 %v3152_v5  ;;  %v749_v62 = vsel %vm681_vm0, %v3561_v16, %v748_v19 }
  0x78   : > { %2867 = vmatpush3.bf16.msra.mxu0 %v3153_v7  ;;  %2740 = vmatprep.subr.bf16.mxu1 %v3154_v12 }
  0x79   : > { %2868 = vmatprep.subr.bf16.mxu0 %v3155_v41  ;;  %2726 = vmatprep.mubr.bf16.mxu1 %v3558_v14 }
  0x7a   : > { %2854 = vmatprep.mubr.bf16.mxu0 %v3471_v9  ;;  %v3162_v9 = vld [vmem:[%s3657_s1 + $0x200] sm:$0xff]  }
  0x7b   : > { %2741 = vmatpush3.bf16.msra.mxu1 %v3154_v12 }
  0x7c   : > { %2869 = vmatpush3.bf16.msra.mxu0 %v3155_v41  ;;  %2742 = vmatprep.subr.bf16.mxu1 %v3157_v20 }
  0x7d   : > { %2870 = vmatprep.subr.bf16.mxu0 %v3159_v22 }
  0x7e   : > { %2727 = vmatmul.mubr.bf16.gmra.mrb[12].mxu1 %v749_v62 }
  0x7f   : > { %2855 = vmatmul.mubr.bf16.gmra.mrb[12].mxu0 %v3574_v23  ;;  %2743 = vmatpush3.bf16.msra.mxu1 %v3157_v20 }
  0x80   : > { %2871 = vmatpush3.bf16.msra.mxu0 %v3159_v22  ;;  %2744 = vmatprep.subr.bf16.mxu1 %v3160_v25 }
  0x81   : > { %2872 = vmatprep.subr.bf16.mxu0 %v3161_v28  ;;  %2746 = vmatprep.mubr.bf16.mxu1 %v3335_v43  ;;  %v3164_v43 = vld [vmem:[%s3657_s1 + $0x210] sm:$0xff]  }
  0x82   : > { %2874 = vmatprep.mubr.bf16.mxu0 %v3267_v18  ;;  %v3165_v18 = vld [vmem:[%s3657_s1 + $0x218] sm:$0xff]  }
  0x83   : > { %2745 = vmatpush3.bf16.msra.mxu1 %v3160_v25 }
  0x84   : > { %2873 = vmatpush3.bf16.msra.mxu0 %v3161_v28  ;;  %2922 = vmatprep.subr.bf16.mxu1 %v3162_v9 }
  0x85   : > { %2890 = vmatprep.subr.bf16.mxu0 %v3162_v9 }
  0x86   : > { %2747 = vmatmul.mubr.bf16.vlgmr.msra.gmra.mrb[0].mxu1 %v3338_v44  ;;  %v1919_v44 = vshll.u32 %v3574_v23, 16 }
  0x87   : > { %2875 = vmatmul.mubr.bf16.vlgmr.msra.gmra.mrb[0].mxu0 %v3283_v24  ;;  %2930 = vmatpush3.bf16.msra.mxu1 %v3162_v9  ;;  %v3166_v24 = vld [vmem:[%s3657_s1 + $0x220] sm:$0xff]  }
  0x88   : > { %2891 = vmatpush3.bf16.msra.mxu0 %v3162_v9  ;;  %2923 = vmatprep.subr.bf16.mxu1 %v3163_v29 }
  0x89   : > { %2892 = vmatprep.subr.bf16.mxu0 %v3163_v29  ;;  %2750 = vmatprep.mubr.bf16.mxu1 %v3355_v53  ;;  %v3171_v53 = vld [vmem:[%s3244_s11 + $0x48] ss:$0 sps:$4 sm:$0xff]  }
  0x8a   : > { %2878 = vmatprep.mubr.bf16.mxu0 %v3288_v26  ;;  %v3167_v26 = vld [vmem:[%s3657_s1 + $0x228] sm:$0xff]  }
  0x8b   : > { %2931 = vmatpush3.bf16.msra.mxu1 %v3163_v29 }
  0x8c   : > { %2893 = vmatpush3.bf16.msra.mxu0 %v3163_v29  ;;  %2924 = vmatprep.subr.bf16.mxu1 %v3164_v43 }
  0x8d   : > { %2894 = vmatprep.subr.bf16.mxu0 %v3164_v43 }
  0x8e   : > { %2751 = vmatmul.mubr.bf16.gmra.mrb[4].mxu1 %v3368_v61  ;;  %v1921_v61 = vrot.slane %v1919_v44, 1 }
  0x8f   : > { %2879 = vmatmul.mubr.bf16.gmra.mrb[4].mxu0 %v3305_v32  ;;  %2932 = vmatpush3.bf16.msra.mxu1 %v3164_v43  ;;  %v3169_v32 = vld [vmem:[%s3657_s1 + $0x230] sm:$0xff]  }
  0x90   : > { %2895 = vmatpush3.bf16.msra.mxu0 %v3164_v43  ;;  %2925 = vmatprep.subr.bf16.mxu1 %v3165_v18 }
  0x91   : > { %2896 = vmatprep.subr.bf16.mxu0 %v3165_v18  ;;  %2754 = vmatprep.mubr.bf16.mxu1 %v3386_v6  ;;  %v1927_v6 = vshll.u32 %v3171_v53, 16 }
  0x92   : > { %2882 = vmatprep.mubr.bf16.mxu0 %v3310_v34  ;;  %v3168_v34 = vld [vmem:[%s3244_s11 + $0x8c] sm:$0xff]   ;;  %s2466_s11 = sshll.u32 %s3663_s13, 5 }
  0x93   : > { %2933 = vmatpush3.bf16.msra.mxu1 %v3165_v18  ;;  %s3643_s20 = scalar_lea.vmem %s3658_s2, %s2466_s11 }
  0x94   : > { %2897 = vmatpush3.bf16.msra.mxu0 %v3165_v18  ;;  %2926 = vmatprep.subr.bf16.mxu1 %v3166_v24 }
  0x95   : > { %2898 = vmatprep.subr.bf16.mxu0 %v3166_v24 }
  0x96   : > { %2755 = vmatmul.mubr.bf16.gmra.mrb[8].mxu1 %v3400_v15  ;;  %v1922_v15 = vsel %vm681_vm0, %v3561_v16, %v1921_v61 }
  0x97   : > { %2883 = vmatmul.mubr.bf16.gmra.mrb[8].mxu0 %v3327_v40  ;;  %2934 = vmatpush3.bf16.msra.mxu1 %v3166_v24  ;;  %v3170_v40 = vld [vmem:[%s3657_s1 + $0x238] sm:$0xff]  }
  0x98   : > { %2899 = vmatpush3.bf16.msra.mxu0 %v3166_v24  ;;  %2927 = vmatprep.subr.bf16.mxu1 %v3167_v26 }
  0x99   : > { %2900 = vmatprep.subr.bf16.mxu0 %v3167_v26  ;;  %2758 = vmatprep.mubr.bf16.mxu1 %v3418_v27 }
  0x9a   : > { %2886 = vmatprep.mubr.bf16.mxu0 %v3341_v45  ;;  %v1923_v45 = vshrl.u32 %v3574_v23, 16 }
  0x9b   : > { %2935 = vmatpush3.bf16.msra.mxu1 %v3167_v26 }
  0x9c   : > { %2901 = vmatpush3.bf16.msra.mxu0 %v3167_v26  ;;  %2928 = vmatprep.subr.bf16.mxu1 %v3169_v32  ;;  %v1925_v27 = vor.u32 %v1923_v45, %v1921_v61 }
  0x9d   : > { %2902 = vmatprep.subr.bf16.mxu0 %v3169_v32 }
  0x9e   : > { %2759 = vmatmul.mubr.bf16.gmra.mrb[12].mxu1 %v3432_v38  ;;  %v1929_v38 = vrot.slane %v1927_v6, 1 }
  0x9f   : > { %2887 = vmatmul.mubr.bf16.gmra.mrb[12].mxu0 %v3168_v34  ;;  %2936 = vmatpush3.bf16.msra.mxu1 %v3169_v32 }
  0xa0   : > { %2903 = vmatpush3.bf16.msra.mxu0 %v3169_v32  ;;  %2929 = vmatprep.subr.bf16.mxu1 %v3170_v40  ;;  %v1930_v30 = vsel %vm681_vm0, %v1925_v27, %v1929_v38 }
  0xa1   : > { %2904 = vmatprep.subr.bf16.mxu0 %v3170_v40  ;;  %2906 = vmatprep.mubr.bf16.mxu0 %v3494_v33 }
  0xa2   : > { %2914 = vmatprep.mubr.bf16.mxu1 %v3547_v8 }
  0xa3   : > { %2937 = vmatpush3.bf16.msra.mxu1 %v3170_v40 }
  0xa4   : > { %2905 = vmatpush3.bf16.msra.mxu0 %v3170_v40 }
  0xa6   : > { %2915 = vmatmul.mubr.bf16.vlgmr.msra.gmra.mrb[16].mxu1 %v3558_v14 }
  0xa7   : > { %2907 = vmatmul.mubr.bf16.vlgmr.msra.gmra.mrb[0].mxu0 %v3508_v47  ;;  %2918 = vmatprep.mubr.bf16.mxu1 %v1922_v15 }
  0xa8   : > { %2910 = vmatprep.mubr.bf16.mxu0 %v3523_v55 }
  0xae   : > { %2919 = vmatmul.mubr.bf16.gmra.mrb[20].mxu1 %v1930_v30 }
  0xaf   : > { %2911 = vmatmul.mubr.bf16.gmra.mrb[4].mxu0 %v3533_v60 }
 0x159   : > { %v2748_v31 = vpop.f32.mrb[0].mxu1 }
 0x15a   : > { %v1050_v33 = vpop.f32.mrb[1].mxu1 }
 0x15b   : > { %v2749_v35 = vpop.f32.mrb[2].mxu1 }
 0x15c   : > { %v1053_v37 = vpop.f32.mrb[3].mxu1 }
 0x161   : > { %v2752_v39 = vpop.f32.mrb[4].mxu1 }
 0x162   : > { %v1064_v42 = vpop.f32.mrb[5].mxu1 }
 0x163   : > { %v2753_v0 = vpop.f32.mrb[6].mxu1 }
 0x164   : > { %v1067_v46 = vpop.f32.mrb[7].mxu1 }
 0x169   : > { %v2756_v47 = vpop.f32.mrb[8].mxu1 }
 0x16a   : > { %v2884_v48 = vpop.f32.mrb[8].mxu0  ;;  %v1078_v49 = vpop.f32.mrb[9].mxu1 }
 0x16b   : > { %v2942_v50 = vadd.f32 %v2884_v48, %v2756_v47  ;;  %v1863_v51 = vpop.f32.mrb[9].mxu0  ;;  %v2757_v13 = vpop.f32.mrb[10].mxu1 }
 0x16c   : > { %v2944_v52 = vadd.f32 %v1863_v51, %v1078_v49  ;;  %v2885_v54 = vpop.f32.mrb[10].mxu0  ;;  %v1081_v55 = vpop.f32.mrb[11].mxu1 }
 0x16d   : > { %v1866_v56 = vpop.f32.mrb[11].mxu0 }
 0x171   : > { %v2760_v57 = vpop.f32.mrb[12].mxu1 }
 0x172   : > { %v2888_v58 = vpop.f32.mrb[12].mxu0  ;;  %v1092_v17 = vpop.f32.mrb[13].mxu1 }
 0x173   : > { %v2946_v60 = vadd.f32 %v2888_v58, %v2760_v57  ;;  %v1877_v63 = vpop.f32.mrb[13].mxu0  ;;  %v2761_v1 = vpop.f32.mrb[14].mxu1 }
 0x174   : > { %v2948_v2 = vadd.f32 %v1877_v63, %v1092_v17  ;;  %v2889_v3 = vpop.f32.mrb[14].mxu0  ;;  %v1095_v4 = vpop.f32.mrb[15].mxu1 }
 0x175   : > { %v1880_v5 = vpop.f32.mrb[15].mxu0 }
 0x179   : > { %v2916_v7 = vpop.f32.mrb[16].mxu1 }
 0x17a   : > { %v2908_v36 = vpop.f32.mrb[0].mxu0  ;;  %v2943_v59 = vadd.f32 %v2942_v50, %v2916_v7  ;;  %v2043_v8 = vpop.f32.mrb[17].mxu1 }
 0x17b   : > { %v2938_v10 = vadd.f32 %v2908_v36, %v2748_v31  ;;  %v2015_v11 = vpop.f32.mrb[1].mxu0  ;;  %v2945_v12 = vadd.f32 %v2944_v52, %v2043_v8  ;;  %v2917_v41 = vpop.f32.mrb[18].mxu1 }
 0x17c   : > { %v2939_v14 = vadd.f32 %v2015_v11, %v1050_v33  ;;  %v2909_v16 = vpop.f32.mrb[2].mxu0  ;;  %v2046_v19 = vpop.f32.mrb[19].mxu1 }
 0x17d   : > { %v2108_v20 = vmul.f32 %v2938_v10, %v2938_v10  ;;  %v2480_v21 = vpack.c.bf16 %v2943_v59, %v2945_v12  ;;  %v2018_v22 = vpop.f32.mrb[3].mxu0  ;;  %v2111_v33 = vmul.f32 %v2945_v12, %v2945_v12 }
 0x17e   : > { %v2470_v62 = vpack.c.bf16 %v2938_v10, %v2939_v14  ;;  %v2094_v23 = vadd.f32 %v2939_v14, %v2938_v10  ;;  %v2107_v25 = vmul.f32 %v2939_v14, %v2939_v14 }
 0x17f   : > { %2488 = vst [vmem:[%s3643_s20 + $0x10] sm:$0xff] %v2480_v21  }
 0x180   : > { %2471 = vst [vmem:[%s3643_s20] sm:$0xff] %v2470_v62   ;;  %v2115_v28 = vadd.f32 %v2108_v20, %v2107_v25 }
 0x181   : > { %v2920_v9 = vpop.f32.mrb[20].mxu1 }
 0x182   : > { %v2912_v29 = vpop.f32.mrb[4].mxu0  ;;  %v2947_v43 = vadd.f32 %v2946_v60, %v2920_v9  ;;  %v2057_v18 = vpop.f32.mrb[21].mxu1 }
 0x183   : > { %v2940_v24 = vadd.f32 %v2912_v29, %v2752_v39  ;;  %v2029_v26 = vpop.f32.mrb[5].mxu0  ;;  %v2949_v32 = vadd.f32 %v2948_v2, %v2057_v18  ;;  %v2921_v34 = vpop.f32.mrb[22].mxu1  ;;  %v2112_v39 = vmul.f32 %v2943_v59, %v2943_v59 }
 0x184   : > { %v2941_v40 = vadd.f32 %v2029_v26, %v1064_v42  ;;  %v2913_v44 = vpop.f32.mrb[6].mxu0  ;;  %v2060_v53 = vpop.f32.mrb[23].mxu1  ;;  %v2114_v49 = vmul.f32 %v2947_v43, %v2947_v43 }
 0x185   : > { %v2485_v61 = vpack.c.bf16 %v2947_v43, %v2949_v32  ;;  %v2032_v45 = vpop.f32.mrb[7].mxu0  ;;  %v2110_v38 = vmul.f32 %v2940_v24, %v2940_v24  ;;  %v2113_v42 = vmul.f32 %v2949_v32, %v2949_v32 }
 0x186   : > { %v2475_v6 = vpack.c.bf16 %v2940_v24, %v2941_v40  ;;  %v2095_v15 = vadd.f32 %v2941_v40, %v2094_v23  ;;  %v2109_v27 = vmul.f32 %v2941_v40, %v2941_v40 }
 0x187   : > { %2489 = vst [vmem:[%s3643_s20 + $0x18] sm:$0xff] %v2485_v61  }
 0x188   : > { %2487 = vst [vmem:[%s3643_s20 + $0x8] sm:$0xff] %v2475_v6   ;;  %v2096_v30 = vadd.f32 %v2940_v24, %v2095_v15  ;;  %v2116_v31 = vadd.f32 %v2115_v28, %v2109_v27 }
 0x18a   : > { %v2117_v35 = vadd.f32 %v2116_v31, %v2110_v38  ;;  %v2097_v37 = vadd.f32 %v2945_v12, %v2096_v30 }
 0x18c   : > { %v2098_v0 = vadd.f32 %v2943_v59, %v2097_v37  ;;  %v2118_v46 = vadd.f32 %v2117_v35, %v2111_v33 }
 0x18e   : > { %v2099_v47 = vadd.f32 %v2949_v32, %v2098_v0  ;;  %v2119_v48 = vadd.f32 %v2118_v46, %v2112_v39 }
 0x190   : > { %v2100_v50 = vadd.f32 %v2947_v43, %v2099_v47  ;;  %v2120_v51 = vadd.f32 %v2119_v48, %v2113_v42 }
 0x192   : > { %v2101_v13 = vrot.slane %v2100_v50, 4  ;;  %v2121_v52 = vadd.f32 %v2120_v51, %v2114_v49 }
 0x194   : > { %v2102_v54 = vadd.f32 %v2101_v13, %v2100_v50  ;;  %v2122_v55 = vrot.slane %v2121_v52, 4 }
 0x196   : > { %v2103_v56 = vrot.slane %v2102_v54, 2  ;;  %v2123_v57 = vadd.f32 %v2122_v55, %v2121_v52 }
 0x198   : > { %v2104_v58 = vadd.f32 %v2103_v56, %v2102_v54  ;;  %v2124_v17 = vrot.slane %v2123_v57, 2 }
 0x19a   : > { %v2105_v60 = vrot.slane %v2104_v58, 1  ;;  %v2125_v63 = vadd.f32 %v2124_v17, %v2123_v57 }
 0x19c   : > { %v2126_v1 = vrot.slane %v2125_v63, 1  ;;  %v2106_v2 = vadd.f32 %v2105_v60, %v2104_v58 }
 0x19e   : > { %v2127_v3 = vadd.f32 %v2126_v1, %v2125_v63 }
 0x1a0   : > { %v2129_v4 = vsel %vm2128_vm1, %v2106_v2, %v2127_v3 }
 0x1a1   : > { %2130 = vst [vmem:[%s186_s24] sm:$0x3] %v2129_v4 }
 0x1a2 PF: > { %s14_s12 = sadd.s32 1, %s3178_s12  }
 0x1a3   : > { %p11_p5 = scmp.ge.s32.totalorder %s14_s12, 4  }
 0x1a5   :  { %13 = sbr.rel (!%p11_p5) target bundleno = 1 (0x1), region = 78 }

// kernel: bottleneck_forward_pallas.9
= control target key start
LH: loop header
LB: loop body
LE: loop exit
PB: predicated region body
PF: predicated region fallthrough
CT: control target
= control target key end

     0   :  { %s528_s0 = inlined_call_operand.vmem [shape: bf16[128,128], index: 0, kind: input, shape index: {}]   ;;  %s529_s1 = inlined_call_operand.vmem [shape: bf16[128,128], index: 1, kind: input, shape index: {}]   ;;  %s530_s2 = inlined_call_operand.vmem [shape: f32[1,128], index: 2, kind: input, shape index: {}]   ;;  %s531_s3 = inlined_call_operand.vmem [shape: f32[1,128], index: 3, kind: input, shape index: {}]   ;;  %s532_s4 = inlined_call_operand.vmem [shape: f32[1,128], index: 4, kind: input, shape index: {}]   ;;  %s533_s5 = inlined_call_operand.vmem [shape: f32[1,128], index: 5, kind: input, shape index: {}]   ;;  %s534_s6 = inlined_call_operand.vmem [shape: f32[128,128], index: 6, kind: output, shape index: {}]  }
   0x1   :  { %v236_v0 = vld [vmem:[%s528_s0] sm:$0xff]   ;;  %v299_v9 = vld [vmem:[%s528_s0 + $0x8] sm:$0xff]   ;;  %v300_v20 = vld [vmem:[%s528_s0 + $0x10] sm:$0xff]  }
   0x2   :  { %v354_v1 = vld [vmem:[%s530_s2] ss:$0 sm:$0xff]  ;;  %v237_v2 = vunpack.c.l.bf16 %v236_v0  ;;  %v238_v5 = vunpack.c.h.bf16 %v236_v0  ;;  %v306_v10 = vld [vmem:[%s529_s1 + $0x8] sm:$0xff]   ;;  %v241_v14 = vunpack.c.l.bf16 %v299_v9  ;;  %v242_v18 = vunpack.c.h.bf16 %v299_v9  ;;  %v307_v21 = vld [vmem:[%s529_s1 + $0x10] sm:$0xff]  }
   0x3   :  { %v268_v3 = vld [vmem:[%s529_s1] sm:$0xff]   ;;  %v273_v15 = vunpack.c.l.bf16 %v306_v10  ;;  %v274_v19 = vunpack.c.h.bf16 %v306_v10  ;;  %v245_v32 = vunpack.c.l.bf16 %v300_v20  ;;  %v277_v33 = vunpack.c.l.bf16 %v307_v21  ;;  %v301_v42 = vld [vmem:[%s528_s0 + $0x18] sm:$0xff]  }
   0x4   :  { %v362_v4 = vld [vmem:[%s532_s4] ss:$0 sm:$0xff]  ;;  %v269_v7 = vunpack.c.l.bf16 %v268_v3  ;;  %v270_v8 = vunpack.c.h.bf16 %v268_v3  ;;  %v62_v11 = vmul.f32 %v237_v2, %v354_v1  ;;  %v63_v13 = vmul.f32 %v238_v5, %v354_v1  ;;  %v308_v43 = vld [vmem:[%s529_s1 + $0x18] sm:$0xff]  }
   0x5   :  { %v367_v6 = vld [vmem:[%s531_s3] ss:$0 sm:$0xff]  ;;  %v64_v24 = vmul.f32 %v241_v14, %v354_v1  ;;  %v142_v25 = vmul.f32 %v273_v15, %v362_v4  ;;  %v65_v28 = vmul.f32 %v242_v18, %v354_v1  ;;  %v143_v29 = vmul.f32 %v274_v19, %v362_v4  ;;  %v303_v14 = vld [vmem:[%s528_s0 + $0x28] sm:$0xff]  }
   0x6   :  { %v379_v12 = vld [vmem:[%s533_s5] ss:$0 sm:$0xff]  ;;  %v140_v16 = vmul.f32 %v269_v7, %v362_v4  ;;  %v141_v17 = vmul.f32 %v270_v8, %v362_v4  ;;  %v85_v22 = vadd.f32 %v367_v6, %v62_v11  ;;  %v86_v23 = vadd.f32 %v367_v6, %v63_v13  ;;  %v310_v19 = vld [vmem:[%s529_s1 + $0x28] sm:$0xff]  }
   0x7   :  { %v87_v30 = vadd.f32 %v367_v6, %v64_v24  ;;  %v165_v31 = vadd.f32 %v379_v12, %v142_v25  ;;  %v88_v36 = vadd.f32 %v367_v6, %v65_v28  ;;  %v166_v37 = vadd.f32 %v379_v12, %v143_v29  ;;  %v302_v52 = vld [vmem:[%s528_s0 + $0x20] sm:$0xff]  }
   0x8   :  { %v163_v26 = vadd.f32 %v379_v12, %v140_v16  ;;  %v164_v27 = vadd.f32 %v379_v12, %v141_v17  ;;  %v66_v39 = vmul.f32 %v245_v32, %v354_v1  ;;  %v144_v40 = vmul.f32 %v277_v33, %v362_v4  ;;  %v309_v57 = vld [vmem:[%s529_s1 + $0x20] sm:$0xff]   ;;  %v304_v32 = vld [vmem:[%s528_s0 + $0x30] sm:$0xff]  }
   0x9   :  { %v181_v38 = vadd.f32 %v165_v31, %v87_v30  ;;  %v246_v41 = vunpack.c.h.bf16 %v300_v20  ;;  %v182_v46 = vadd.f32 %v166_v37, %v88_v36  ;;  %v278_v47 = vunpack.c.h.bf16 %v307_v21  ;;  %v311_v33 = vld [vmem:[%s529_s1 + $0x30] sm:$0xff]  }
   0xa   :  { %v179_v34 = vadd.f32 %v163_v26, %v85_v22  ;;  %v180_v35 = vadd.f32 %v164_v27, %v86_v23  ;;  %v89_v49 = vadd.f32 %v367_v6, %v66_v39  ;;  %v167_v50 = vadd.f32 %v379_v12, %v144_v40 }
   0xb   :  { %v197_v48 = vmax.f32 %v181_v38, 0.0  ;;  %v67_v51 = vmul.f32 %v246_v41, %v354_v1  ;;  %v198_v53 = vmax.f32 %v182_v46, 0.0  ;;  %v145_v54 = vmul.f32 %v278_v47, %v362_v4  ;;  %v305_v46 = vld [vmem:[%s528_s0 + $0x38] sm:$0xff]  }
   0xc   :  { %v195_v44 = vmax.f32 %v179_v34, 0.0  ;;  %v196_v45 = vmax.f32 %v180_v35, 0.0  ;;  %v249_v55 = vunpack.c.l.bf16 %v301_v42  ;;  %v281_v56 = vunpack.c.l.bf16 %v308_v43 }
   0xd   :  { %213 = vst [vmem:[%s534_s6 + $0x10] sm:$0xff] %v197_v48  ;;  %v183_v58 = vadd.f32 %v167_v50, %v89_v49  ;;  %v90_v59 = vadd.f32 %v367_v6, %v67_v51  ;;  %v250_v60 = vunpack.c.h.bf16 %v301_v42  ;;  %v282_v61 = vunpack.c.h.bf16 %v308_v43  ;;  %214 = vst [vmem:[%s534_s6 + $0x18] sm:$0xff] %v198_v53 }
   0xe   :  { %211 = vst [vmem:[%s534_s6] sm:$0xff] %v195_v44  ;;  %212 = vst [vmem:[%s534_s6 + $0x8] sm:$0xff] %v196_v45  ;;  %v168_v62 = vadd.f32 %v379_v12, %v145_v54  ;;  %v68_v63 = vmul.f32 %v249_v55, %v354_v1  ;;  %v146_v0 = vmul.f32 %v281_v56, %v362_v4  ;;  %v253_v2 = vunpack.c.l.bf16 %v302_v52  ;;  %v312_v55 = vld [vmem:[%s529_s1 + $0x38] sm:$0xff]  }
   0xf   :  { %v199_v3 = vmax.f32 %v183_v58, 0.0  ;;  %v69_v5 = vmul.f32 %v250_v60, %v354_v1  ;;  %v147_v7 = vmul.f32 %v282_v61, %v362_v4  ;;  %v285_v8 = vunpack.c.l.bf16 %v309_v57 }
  0x10   :  { %v184_v9 = vadd.f32 %v168_v62, %v90_v59  ;;  %v91_v10 = vadd.f32 %v367_v6, %v68_v63  ;;  %v169_v11 = vadd.f32 %v379_v12, %v146_v0  ;;  %v70_v13 = vmul.f32 %v253_v2, %v354_v1 }
  0x11   :  { %215 = vst [vmem:[%s534_s6 + $0x20] sm:$0xff] %v199_v3  ;;  %v92_v15 = vadd.f32 %v367_v6, %v69_v5  ;;  %v170_v16 = vadd.f32 %v379_v12, %v147_v7  ;;  %v148_v17 = vmul.f32 %v285_v8, %v362_v4  ;;  %v254_v18 = vunpack.c.h.bf16 %v302_v52 }
  0x12   :  { %v200_v20 = vmax.f32 %v184_v9, 0.0  ;;  %v185_v21 = vadd.f32 %v169_v11, %v91_v10  ;;  %v93_v22 = vadd.f32 %v367_v6, %v70_v13  ;;  %v286_v23 = vunpack.c.h.bf16 %v309_v57 }
  0x13   :  { %v186_v24 = vadd.f32 %v170_v16, %v92_v15  ;;  %v171_v25 = vadd.f32 %v379_v12, %v148_v17  ;;  %v71_v26 = vmul.f32 %v254_v18, %v354_v1  ;;  %v257_v27 = vunpack.c.l.bf16 %v303_v14 }
  0x14   :  { %216 = vst [vmem:[%s534_s6 + $0x28] sm:$0xff] %v200_v20  ;;  %v201_v28 = vmax.f32 %v185_v21, 0.0  ;;  %v149_v29 = vmul.f32 %v286_v23, %v362_v4  ;;  %v289_v30 = vunpack.c.l.bf16 %v310_v19  ;;  %v258_v31 = vunpack.c.h.bf16 %v303_v14 }
  0x15   :  { %v202_v34 = vmax.f32 %v186_v24, 0.0  ;;  %v187_v35 = vadd.f32 %v171_v25, %v93_v22  ;;  %v94_v36 = vadd.f32 %v367_v6, %v71_v26  ;;  %v72_v37 = vmul.f32 %v257_v27, %v354_v1 }
  0x16   :  { %217 = vst [vmem:[%s534_s6 + $0x30] sm:$0xff] %v201_v28  ;;  %v172_v38 = vadd.f32 %v379_v12, %v149_v29  ;;  %v150_v39 = vmul.f32 %v289_v30, %v362_v4  ;;  %v73_v40 = vmul.f32 %v258_v31, %v354_v1  ;;  %v290_v41 = vunpack.c.h.bf16 %v310_v19 }
  0x17   :  { %218 = vst [vmem:[%s534_s6 + $0x38] sm:$0xff] %v202_v34  ;;  %v203_v42 = vmax.f32 %v187_v35, 0.0  ;;  %v95_v43 = vadd.f32 %v367_v6, %v72_v37  ;;  %v261_v44 = vunpack.c.l.bf16 %v304_v32  ;;  %v293_v45 = vunpack.c.l.bf16 %v311_v33 }
  0x18   :  { %v188_v47 = vadd.f32 %v172_v38, %v94_v36  ;;  %v173_v48 = vadd.f32 %v379_v12, %v150_v39  ;;  %v96_v49 = vadd.f32 %v367_v6, %v73_v40  ;;  %v151_v50 = vmul.f32 %v290_v41, %v362_v4 }
  0x19   :  { %219 = vst [vmem:[%s534_s6 + $0x40] sm:$0xff] %v203_v42  ;;  %v74_v51 = vmul.f32 %v261_v44, %v354_v1  ;;  %v152_v52 = vmul.f32 %v293_v45, %v362_v4  ;;  %v262_v53 = vunpack.c.h.bf16 %v304_v32  ;;  %v294_v54 = vunpack.c.h.bf16 %v311_v33 }
  0x1a   :  { %v204_v56 = vmax.f32 %v188_v47, 0.0  ;;  %v189_v57 = vadd.f32 %v173_v48, %v95_v43  ;;  %v174_v58 = vadd.f32 %v379_v12, %v151_v50  ;;  %v265_v59 = vunpack.c.l.bf16 %v305_v46 }
  0x1b   :  { %v97_v60 = vadd.f32 %v367_v6, %v74_v51  ;;  %v175_v61 = vadd.f32 %v379_v12, %v152_v52  ;;  %v75_v62 = vmul.f32 %v262_v53, %v354_v1  ;;  %v153_v63 = vmul.f32 %v294_v54, %v362_v4 }
  0x1c   :  { %220 = vst [vmem:[%s534_s6 + $0x48] sm:$0xff] %v204_v56  ;;  %v205_v0 = vmax.f32 %v189_v57, 0.0  ;;  %v190_v2 = vadd.f32 %v174_v58, %v96_v49  ;;  %v76_v3 = vmul.f32 %v265_v59, %v354_v1  ;;  %v297_v5 = vunpack.c.l.bf16 %v312_v55 }
  0x1d   :  { %v191_v7 = vadd.f32 %v175_v61, %v97_v60  ;;  %v98_v8 = vadd.f32 %v367_v6, %v75_v62  ;;  %v176_v9 = vadd.f32 %v379_v12, %v153_v63  ;;  %v266_v10 = vunpack.c.h.bf16 %v305_v46 }
  0x1e   :  { %221 = vst [vmem:[%s534_s6 + $0x50] sm:$0xff] %v205_v0  ;;  %v206_v11 = vmax.f32 %v190_v2, 0.0  ;;  %v99_v13 = vadd.f32 %v367_v6, %v76_v3  ;;  %v154_v14 = vmul.f32 %v297_v5, %v362_v4  ;;  %v298_v15 = vunpack.c.h.bf16 %v312_v55 }
  0x1f   :  { %v207_v16 = vmax.f32 %v191_v7, 0.0  ;;  %v192_v17 = vadd.f32 %v176_v9, %v98_v8  ;;  %v77_v18 = vmul.f32 %v266_v10, %v354_v1 }
  0x20   :  { %222 = vst [vmem:[%s534_s6 + $0x58] sm:$0xff] %v206_v11  ;;  %v177_v19 = vadd.f32 %v379_v12, %v154_v14  ;;  %v155_v20 = vmul.f32 %v298_v15, %v362_v4 }
  0x21   :  { %223 = vst [vmem:[%s534_s6 + $0x60] sm:$0xff] %v207_v16  ;;  %v208_v21 = vmax.f32 %v192_v17, 0.0  ;;  %v100_v22 = vadd.f32 %v367_v6, %v77_v18 }
  0x22   :  { %v193_v23 = vadd.f32 %v177_v19, %v99_v13  ;;  %v178_v24 = vadd.f32 %v379_v12, %v155_v20 }
  0x23   :  { %224 = vst [vmem:[%s534_s6 + $0x68] sm:$0xff] %v208_v21 }
  0x24   :  { %v209_v1 = vmax.f32 %v193_v23, 0.0  ;;  %v194_v25 = vadd.f32 %v178_v24, %v100_v22 }
  0x26   :  { %225 = vst [vmem:[%s534_s6 + $0x70] sm:$0xff] %v209_v1  ;;  %v210_v4 = vmax.f32 %v194_v25, 0.0 }
  0x28   :  { %226 = vst [vmem:[%s534_s6 + $0x78] sm:$0xff] %v210_v4 }

// kernel: bottleneck_forward_pallas.8
= control target key start
LH: loop header
LB: loop body
LE: loop exit
PB: predicated region body
PF: predicated region fallthrough
CT: control target
= control target key end

     0   :  { %vm337_vm0 = vcmask 1040384   ;;  %s626_s1 = inlined_call_operand.vmem [shape: bf16[128,128], index: 1, kind: input, shape index: {}]   ;;  %s627_s0 = inlined_call_operand.vmem [shape: f32[128,128], index: 0, kind: input, shape index: {}]   ;;  %s628_s2 = inlined_call_operand.vmem [shape: bf16[128,128], index: 2, kind: output, shape index: {0}]   ;;  %s629_s3 = inlined_call_operand.vmem [shape: f32[1,2,128], index: 3, kind: output, shape index: {1}]  }
   0x1   :  { %v499_v0 = vld [vmem:[%s626_s1] sm:$0xff]   ;;  %v500_v1 = vld [vmem:[%s626_s1 + $0x8] sm:$0xff]   ;;  %v501_v2 = vld [vmem:[%s626_s1 + $0x10] sm:$0xff]  }
   0x2   :  { %451 = vmatprep.subr.bf16.mxu0 %v499_v0  ;;  %483 = vmatprep.subr.bf16.mxu1 %v499_v0  ;;  %v502_v3 = vld [vmem:[%s626_s1 + $0x18] sm:$0xff]   ;;  %v14_v4 = vld [vmem:[%s627_s0] sm:$0xff]  ;;  %v15_v5 = vld [vmem:[%s627_s0 + $0x8] sm:$0xff] }
   0x3   :  { %452 = vmatpush3.bf16.msra.mxu0 %v499_v0  ;;  %491 = vmatpush3.bf16.msra.mxu1 %v499_v0  ;;  %v30_v6 = vpack.c.bf16 %v15_v5, %v14_v4  ;;  %v22_v7 = vld [vmem:[%s627_s0 + $0x40] sm:$0xff]  ;;  %v23_v8 = vld [vmem:[%s627_s0 + $0x48] sm:$0xff]  ;;  %v505_v12 = vld [vmem:[%s626_s1 + $0x30] sm:$0xff]  }
   0x4   :  { %453 = vmatprep.subr.bf16.mxu0 %v500_v1  ;;  %484 = vmatprep.subr.bf16.mxu1 %v500_v1  ;;  %v503_v9 = vld [vmem:[%s626_s1 + $0x20] sm:$0xff]   ;;  %v34_v10 = vpack.c.bf16 %v23_v8, %v22_v7  ;;  %v504_v11 = vld [vmem:[%s626_s1 + $0x28] sm:$0xff]   ;;  %v506_v13 = vld [vmem:[%s626_s1 + $0x38] sm:$0xff]  }
   0x5   :  { %467 = vmatprep.mubr.bf16.mxu0 %v30_v6  ;;  %v16_v14 = vld [vmem:[%s627_s0 + $0x10] sm:$0xff]  ;;  %v17_v15 = vld [vmem:[%s627_s0 + $0x18] sm:$0xff]  ;;  %v18_v16 = vld [vmem:[%s627_s0 + $0x20] sm:$0xff] }
   0x6   :  { %475 = vmatprep.mubr.bf16.mxu1 %v34_v10  ;;  %v24_v17 = vld [vmem:[%s627_s0 + $0x50] sm:$0xff]  ;;  %v25_v18 = vld [vmem:[%s627_s0 + $0x58] sm:$0xff]  ;;  %v19_v19 = vld [vmem:[%s627_s0 + $0x28] sm:$0xff]  ;;  %v31_v22 = vpack.c.bf16 %v17_v15, %v16_v14 }
   0x7   :  { %454 = vmatpush3.bf16.msra.mxu0 %v500_v1  ;;  %492 = vmatpush3.bf16.msra.mxu1 %v500_v1  ;;  %v26_v20 = vld [vmem:[%s627_s0 + $0x60] sm:$0xff]  ;;  %v27_v21 = vld [vmem:[%s627_s0 + $0x68] sm:$0xff]  ;;  %v35_v23 = vpack.c.bf16 %v25_v18, %v24_v17  ;;  %v32_v24 = vpack.c.bf16 %v19_v19, %v18_v16  ;;  %v20_v26 = vld [vmem:[%s627_s0 + $0x30] sm:$0xff] }
   0x8   :  { %455 = vmatprep.subr.bf16.mxu0 %v501_v2  ;;  %485 = vmatprep.subr.bf16.mxu1 %v501_v2  ;;  %v36_v25 = vpack.c.bf16 %v27_v21, %v26_v20  ;;  %v21_v27 = vld [vmem:[%s627_s0 + $0x38] sm:$0xff]  ;;  %v28_v28 = vld [vmem:[%s627_s0 + $0x70] sm:$0xff] }
   0x9   :  { %v29_v29 = vld [vmem:[%s627_s0 + $0x78] sm:$0xff]  ;;  %v33_v30 = vpack.c.bf16 %v21_v27, %v20_v26 }
   0xa   :  { %v37_v31 = vpack.c.bf16 %v29_v29, %v28_v28 }
   0xb   :  { %456 = vmatpush3.bf16.msra.mxu0 %v501_v2  ;;  %493 = vmatpush3.bf16.msra.mxu1 %v501_v2 }
   0xc   :  { %457 = vmatprep.subr.bf16.mxu0 %v502_v3  ;;  %486 = vmatprep.subr.bf16.mxu1 %v502_v3 }
   0xf   :  { %458 = vmatpush3.bf16.msra.mxu0 %v502_v3  ;;  %494 = vmatpush3.bf16.msra.mxu1 %v502_v3 }
  0x10   :  { %459 = vmatprep.subr.bf16.mxu0 %v503_v9  ;;  %487 = vmatprep.subr.bf16.mxu1 %v503_v9 }
  0x13   :  { %460 = vmatpush3.bf16.msra.mxu0 %v503_v9  ;;  %495 = vmatpush3.bf16.msra.mxu1 %v503_v9 }
  0x14   :  { %461 = vmatprep.subr.bf16.mxu0 %v504_v11  ;;  %488 = vmatprep.subr.bf16.mxu1 %v504_v11 }
  0x17   :  { %462 = vmatpush3.bf16.msra.mxu0 %v504_v11  ;;  %496 = vmatpush3.bf16.msra.mxu1 %v504_v11 }
  0x18   :  { %463 = vmatprep.subr.bf16.mxu0 %v505_v12  ;;  %489 = vmatprep.subr.bf16.mxu1 %v505_v12 }
  0x1b   :  { %464 = vmatpush3.bf16.msra.mxu0 %v505_v12  ;;  %497 = vmatpush3.bf16.msra.mxu1 %v505_v12 }
  0x1c   :  { %465 = vmatprep.subr.bf16.mxu0 %v506_v13  ;;  %490 = vmatprep.subr.bf16.mxu1 %v506_v13 }
  0x1f   :  { %466 = vmatpush3.bf16.msra.mxu0 %v506_v13  ;;  %498 = vmatpush3.bf16.msra.mxu1 %v506_v13 }
  0x22   :  { %468 = vmatmul.mubr.bf16.vlgmr.msra.gmra.mrb[0].mxu0 %v31_v22  ;;  %476 = vmatmul.mubr.bf16.vlgmr.msra.gmra.mrb[0].mxu1 %v35_v23 }
  0x23   :  { %471 = vmatprep.mubr.bf16.mxu0 %v32_v24  ;;  %479 = vmatprep.mubr.bf16.mxu1 %v36_v25 }
  0x2a   :  { %472 = vmatmul.mubr.bf16.gmra.mrb[4].mxu0 %v33_v30  ;;  %480 = vmatmul.mubr.bf16.gmra.mrb[4].mxu1 %v37_v31 }
  0xf5   :  { %v469_v32 = vpop.f32.mrb[0].mxu0  ;;  %v477_v33 = vpop.f32.mrb[0].mxu1 }
  0xf6   :  { %v136_v34 = vpop.f32.mrb[1].mxu0  ;;  %v168_v35 = vpop.f32.mrb[1].mxu1  ;;  %v302_v47 = vmul.f32 %v469_v32, %v469_v32  ;;  %v310_v19 = vmul.f32 %v477_v33, %v477_v33 }
  0xf7   :  { %v470_v36 = vpop.f32.mrb[2].mxu0  ;;  %v478_v37 = vpop.f32.mrb[2].mxu1  ;;  %v300_v38 = vmul.f32 %v136_v34, %v136_v34  ;;  %v308_v13 = vmul.f32 %v168_v35, %v168_v35 }
  0xf8   :  { %v396_v39 = vpack.c.bf16 %v470_v36, %v469_v32  ;;  %v139_v40 = vpop.f32.mrb[3].mxu0  ;;  %v416_v41 = vpack.c.bf16 %v478_v37, %v477_v33  ;;  %v171_v42 = vpop.f32.mrb[3].mxu1  ;;  %v303_v50 = vmul.f32 %v470_v36, %v470_v36  ;;  %v311_v22 = vmul.f32 %v478_v37, %v478_v37 }
  0xf9   :  { %v391_v43 = vpack.c.bf16 %v139_v40, %v136_v34  ;;  %v279_v44 = vadd.f32 %v139_v40, %v136_v34  ;;  %v301_v45 = vmul.f32 %v139_v40, %v139_v40  ;;  %v411_v46 = vpack.c.bf16 %v171_v42, %v168_v35 }
  0xfa   :  { %428 = vst [vmem:[%s628_s2 + $0x8] sm:$0xff] %v396_v39   ;;  %432 = vst [vmem:[%s628_s2 + $0x28] sm:$0xff] %v416_v41   ;;  %v309_v18 = vmul.f32 %v171_v42, %v171_v42 }
  0xfb   :  { %392 = vst [vmem:[%s628_s2] sm:$0xff] %v391_v43   ;;  %v280_v48 = vadd.f32 %v469_v32, %v279_v44  ;;  %v316_v49 = vadd.f32 %v301_v45, %v300_v38  ;;  %431 = vst [vmem:[%s628_s2 + $0x20] sm:$0xff] %v411_v46  }
  0xfd   :  { %v317_v51 = vadd.f32 %v316_v49, %v302_v47  ;;  %v473_v52 = vpop.f32.mrb[4].mxu0  ;;  %v281_v53 = vadd.f32 %v470_v36, %v280_v48  ;;  %v481_v54 = vpop.f32.mrb[4].mxu1 }
  0xfe   :  { %v152_v55 = vpop.f32.mrb[5].mxu0  ;;  %v184_v56 = vpop.f32.mrb[5].mxu1  ;;  %v306_v7 = vmul.f32 %v473_v52, %v473_v52  ;;  %v314_v31 = vmul.f32 %v481_v54, %v481_v54 }
  0xff   :  { %v282_v57 = vadd.f32 %v281_v53, %v152_v55  ;;  %v304_v58 = vmul.f32 %v152_v55, %v152_v55  ;;  %v318_v59 = vadd.f32 %v317_v51, %v303_v50  ;;  %v474_v60 = vpop.f32.mrb[6].mxu0  ;;  %v482_v61 = vpop.f32.mrb[6].mxu1  ;;  %v312_v25 = vmul.f32 %v184_v56, %v184_v56 }
 0x100   :  { %v406_v62 = vpack.c.bf16 %v474_v60, %v473_v52  ;;  %v155_v63 = vpop.f32.mrb[7].mxu0  ;;  %v426_v0 = vpack.c.bf16 %v482_v61, %v481_v54  ;;  %v187_v1 = vpop.f32.mrb[7].mxu1  ;;  %v307_v10 = vmul.f32 %v474_v60, %v474_v60 }
 0x101   :  { %v319_v2 = vadd.f32 %v318_v59, %v304_v58  ;;  %v401_v3 = vpack.c.bf16 %v155_v63, %v152_v55  ;;  %v283_v4 = vadd.f32 %v282_v57, %v155_v63  ;;  %v305_v5 = vmul.f32 %v155_v63, %v155_v63 }
 0x102   :  { %430 = vst [vmem:[%s628_s2 + $0x18] sm:$0xff] %v406_v62   ;;  %434 = vst [vmem:[%s628_s2 + $0x38] sm:$0xff] %v426_v0   ;;  %v421_v6 = vpack.c.bf16 %v187_v1, %v184_v56  ;;  %v313_v30 = vmul.f32 %v187_v1, %v187_v1 }
 0x103   :  { %429 = vst [vmem:[%s628_s2 + $0x10] sm:$0xff] %v401_v3   ;;  %v284_v8 = vadd.f32 %v473_v52, %v283_v4  ;;  %v320_v9 = vadd.f32 %v319_v2, %v305_v5 }
 0x104   :  { %433 = vst [vmem:[%s628_s2 + $0x30] sm:$0xff] %v421_v6  }
 0x105   :  { %v321_v11 = vadd.f32 %v320_v9, %v306_v7  ;;  %v285_v12 = vadd.f32 %v474_v60, %v284_v8 }
 0x107   :  { %v286_v14 = vadd.f32 %v285_v12, %v168_v35  ;;  %v322_v15 = vadd.f32 %v321_v11, %v307_v10  ;;  %v315_v35 = vmul.f32 %v482_v61, %v482_v61 }
 0x109   :  { %v323_v16 = vadd.f32 %v322_v15, %v308_v13  ;;  %v287_v17 = vadd.f32 %v286_v14, %v171_v42 }
 0x10b   :  { %v288_v20 = vadd.f32 %v477_v33, %v287_v17  ;;  %v324_v21 = vadd.f32 %v323_v16, %v309_v18 }
 0x10d   :  { %v325_v23 = vadd.f32 %v324_v21, %v310_v19  ;;  %v289_v24 = vadd.f32 %v478_v37, %v288_v20 }
 0x10f   :  { %v290_v26 = vadd.f32 %v289_v24, %v184_v56  ;;  %v326_v27 = vadd.f32 %v325_v23, %v311_v22 }
 0x111   :  { %v327_v28 = vadd.f32 %v326_v27, %v312_v25  ;;  %v291_v29 = vadd.f32 %v290_v26, %v187_v1 }
 0x113   :  { %v292_v32 = vadd.f32 %v481_v54, %v291_v29  ;;  %v328_v34 = vadd.f32 %v327_v28, %v313_v30 }
 0x115   :  { %v293_v36 = vadd.f32 %v482_v61, %v292_v32  ;;  %v329_v38 = vadd.f32 %v328_v34, %v314_v31 }
 0x117   :  { %v294_v39 = vrot.slane %v293_v36, 4  ;;  %v330_v40 = vadd.f32 %v329_v38, %v315_v35 }
 0x119   :  { %v295_v41 = vadd.f32 %v294_v39, %v293_v36  ;;  %v331_v33 = vrot.slane %v330_v40, 4 }
 0x11b   :  { %v296_v42 = vrot.slane %v295_v41, 2  ;;  %v332_v43 = vadd.f32 %v331_v33, %v330_v40 }
 0x11d   :  { %v297_v44 = vadd.f32 %v296_v42, %v295_v41  ;;  %v333_v37 = vrot.slane %v332_v43, 2 }
 0x11f   :  { %v298_v45 = vrot.slane %v297_v44, 1  ;;  %v334_v46 = vadd.f32 %v333_v37, %v332_v43 }
 0x121   :  { %v335_v47 = vrot.slane %v334_v46, 1  ;;  %v299_v48 = vadd.f32 %v298_v45, %v297_v44 }
 0x123   :  { %v336_v49 = vadd.f32 %v335_v47, %v334_v46 }
 0x125   :  { %v338_v50 = vsel %vm337_vm0, %v299_v48, %v336_v49 }
 0x126   :  { %339 = vst [vmem:[%s629_s3] sm:$0x3] %v338_v50 }

</bundles_post_ra>
